<compile_context>
chip_gen: v7x
topology: tpu7x:2x2x1
jax: 0.10.0
libtpu: 0.0.40
codegen_flags: <defaults>
</compile_context>

<pallas_src>
import functools

import jax
import jax.numpy as jnp
from jax.experimental import pallas as pl
from jax.experimental.pallas import tpu as pltpu

KMAX = 7              # every branch kernel (7/5/3/1) is zero-packed into 7x7
PAD = KMAX // 2       # padding=3 for the packed 7x7 conv (equivalent semantics)
EPS = 1e-5            # torch.nn.GroupNorm default


def _spatial_attention_kernel(
    x_ref, g_ref, masks_ref,
    x_weff_ref, x_bias_ref, x_sw_ref,
    g_weff_ref, g_bias_ref, g_sw_ref,
    out_ref, pad_ref, *, num_groups, W, fpad):
  _, C, HW = x_ref.shape
  f32 = jnp.float32
  total = pad_ref.shape[1]

  # Zero only the two border lane strips of the padded scratch; the interior is
  # fully overwritten per path. Done every step -> correct per-core scratch
  # when the batch axis is sharded across TensorCores.
  pad_ref[:, :fpad] = jnp.zeros((C, fpad), f32)
  pad_ref[:, fpad + HW:] = jnp.zeros((C, total - fpad - HW), f32)

  def run_path(v_ref, weff_ref, bias_ref, sw_ref):
    v = v_ref[0].astype(f32)                          # (C, H*W), lane-dense

    # ---- ChannelPool (flat layout, cross-sublane reductions) ----
    ch_max = jnp.max(v, axis=0, keepdims=True)        # (1, HW)
    ch_mean = jnp.mean(v, axis=0, keepdims=True)      # (1, HW)

    # ---- GroupNorm xhat (shared by all 4 fused branches); one-pass stats ----
    gsize = C // num_groups
    n = float(gsize * HW)
    parts = []
    for gi in range(num_groups):
      vg = v[gi * gsize:(gi + 1) * gsize]
      s1 = jnp.sum(vg)
      s2 = jnp.sum(vg * vg)
      mu = s1 / n
      var = s2 / n - mu * mu
      parts.append((vg - mu) * jax.lax.rsqrt(var + EPS))
    xhat = parts[0] if num_groups == 1 else jnp.concatenate(parts, axis=0)

    # ---- pad xhat once (vertical zero pad is physical; horizontal handled by
    #      the per-offset masks). Interior store is lane-aligned (fpad % 128 == 0).
    pad_ref[:, fpad:fpad + HW] = xhat

    # ---- fused effective 7x7 conv (gamma already folded into weff,
    #      beta / conv_b / scale_b folded into bias_ref) ----
    conv_c = None
    for kw in range(KMAX):
      dw = kw - PAD
      tmp = None
      for kh in range(KMAX):
        shift = (kh - PAD) * W + dw
        tap = kh * KMAX + kw
        term = (weff_ref[:, tap:tap + 1] *
                pad_ref[:, fpad + shift:fpad + shift + HW])   # (C, HW)
        tmp = term if tmp is None else tmp + term
      if dw != 0:
        tmp = masks_ref[kw:kw + 1, :] * tmp           # zero the wrapped columns
      conv_c = tmp if conv_c is None else conv_c + tmp
    conv_out = jnp.sum(conv_c, axis=0, keepdims=True)  # (1, HW)

    # ---- 1x1 scale conv remainder: pooled channels + bias map ----
    return (bias_ref[...] + sw_ref[0] * ch_max + sw_ref[1] * ch_mean + conv_out)

  sx = run_path(x_ref, x_weff_ref, x_bias_ref, x_sw_ref)
  sg = run_path(g_ref, g_weff_ref, g_bias_ref, g_sw_ref)
  att = jax.nn.sigmoid(sx + sg)                       # (1, HW)
  # re-read x from its VMEM block here (short live range for the big slab)
  out_ref[0] = (x_ref[0].astype(f32) * att).astype(out_ref.dtype)


def spatial_attention_pallas(x, g, kp):
  B, C, H, W = x.shape
  assert C % 8 == 0 and C >= 8, "GroupNorm requires in_channel to be a multiple of 8"
  num_groups = C // 8
  HW = H * W
  # vertical-pad width (lanes) for the flat padded scratch; 128-aligned so the
  # interior store is lane-aligned. Must cover PAD rows + PAD columns of shift.
  fpad = ((PAD * W + PAD + 127) // 128) * 128

  x_flat = x.reshape(B, C, HW)
  g_flat = g.reshape(B, C, HW)

  # horizontal-wrap masks for the flat-layout conv, one per kw offset
  col = jnp.arange(HW, dtype=jnp.int32) % W
  masks = jnp.stack(
      [(((col + (kw - PAD)) >= 0) & ((col + (kw - PAD)) < W)).astype(jnp.float32)
       for kw in range(KMAX)], axis=0)                # (7, HW)

  batch_spec = pl.BlockSpec((1, C, HW), lambda b: (b, 0, 0))

  def vmem_full(a):
    nd = a.ndim
    return pl.BlockSpec(a.shape, lambda b: (0,) * nd)

  smem_full = lambda: pl.BlockSpec(memory_space=pltpu.MemorySpace.SMEM)

  args = [x_flat, g_flat, masks,
          kp["x_weff"], kp["x_bias"], kp["x_sw"],
          kp["g_weff"], kp["g_bias"], kp["g_sw"]]
  in_specs = [batch_spec, batch_spec, vmem_full(masks),
              vmem_full(kp["x_weff"]), vmem_full(kp["x_bias"]), smem_full(),
              vmem_full(kp["g_weff"]), vmem_full(kp["g_bias"]), smem_full()]

  kernel = functools.partial(_spatial_attention_kernel,
                             num_groups=num_groups, W=W, fpad=fpad)
  out_flat = pl.pallas_call(
      kernel,
      out_shape=jax.ShapeDtypeStruct((B, C, HW), x.dtype),
      grid_spec=pltpu.PrefetchScalarGridSpec(
          num_scalar_prefetch=0,
          grid=(B,),
          in_specs=in_specs,
          out_specs=batch_spec,
          scratch_shapes=[pltpu.VMEM((C, fpad + HW + fpad), jnp.float32)]),
      compiler_params=pltpu.CompilerParams(
          dimension_semantics=("parallel",),      # batch steps are independent
          vmem_limit_bytes=64 * 1024 * 1024),
  )(*args)
  return out_flat.reshape(B, C, H, W)


# ---------------- parameter init / packing (plain-JAX glue) -----------------

def init_params(key, C):
  keys = iter(jax.random.split(key, 32))
  nrm = lambda shape, s=0.1: s * jax.random.normal(next(keys), shape, jnp.float32)

  def make_path():
    return dict(
        gn_gamma=1.0 + nrm((4, C)),
        gn_beta=nrm((4, C)),
        conv_ws=[nrm((1, C, k, k)) for k in (7, 5, 3, 1)],
        conv_bs=nrm((4,)),
        scale_w=nrm((1, 6, 1, 1)),
        scale_b=nrm((1,)))

  return dict(x=make_path(), g=make_path())


def pack_path(p, C, H, W):
  # zero-pack the 7/5/3/1 kernels into a common 7x7 support
  Wp = jnp.zeros((4, C, KMAX, KMAX), jnp.float32)
  for i, k in enumerate((7, 5, 3, 1)):
    off = (KMAX - k) // 2
    Wp = Wp.at[i, :, off:off + k, off:off + k].set(p["conv_ws"][i][0])

  sw = p["scale_w"].reshape(6)          # 1x1 scale-conv weights (dilation=4 is a no-op)
  sb = p["scale_b"].reshape(())
  gamma = p["gn_gamma"]                 # (4, C)
  beta = p["gn_beta"]                   # (4, C)
  cb = p["conv_bs"]                     # (4,)

  # gamma folded into the effective 7x7 weights, weighted by the 1x1 scale conv
  wsum = sw[2:][:, None, None, None] * Wp                        # (4,C,7,7)
  weff = jnp.sum(wsum * gamma[:, :, None, None], axis=0)         # (C,7,7)
  weff = weff.reshape(C, KMAX * KMAX)                            # tap = kh*7+kw

  # beta / conv bias / scale bias folded into a data-independent (H,W) map;
  # the ones-mask conv keeps the beta contribution exact at the borders.
  s_map = jnp.sum(wsum * beta[:, :, None, None], axis=(0, 1))    # (7,7)
  ones = jnp.ones((1, 1, H, W), jnp.float32)
  beta_map = jax.lax.conv_general_dilated(
      ones, s_map[None, None], (1, 1), [(PAD, PAD), (PAD, PAD)],
      dimension_numbers=("NCHW", "OIHW", "NCHW"),
      precision=jax.lax.Precision.HIGHEST)[0, 0]                 # (H,W)
  bias = (beta_map + sb + jnp.sum(sw[2:] * cb)).reshape(1, H * W)

  return dict(weff=weff, bias=bias, sw=sw[:2])


# ---------------- pure-JAX reference (for correctness check) ----------------

def reference(x, g, params, num_groups):
  def channel_pool(v):
    return jnp.concatenate(
        [jnp.max(v, axis=1, keepdims=True), jnp.mean(v, axis=1, keepdims=True)], axis=1)

  def group_norm(v, gamma, beta):
    B, C, H, W = v.shape
    vr = v.reshape(B, num_groups, C // num_groups, H, W)
    mu = jnp.mean(vr, axis=(2, 3, 4), keepdims=True)
    var = jnp.mean((vr - mu) ** 2, axis=(2, 3, 4), keepdims=True)
    xhat = ((vr - mu) * jax.lax.rsqrt(var + EPS)).reshape(B, C, H, W)
    return xhat * gamma[None, :, None, None] + beta[None, :, None, None]

  def conv(v, w, b, pad):
    out = jax.lax.conv_general_dilated(
        v, w, window_strides=(1, 1), padding=[(pad, pad), (pad, pad)],
        dimension_numbers=("NCHW", "OIHW", "NCHW"),
        precision=jax.lax.Precision.HIGHEST)
    return out + b[None, :, None, None]

  def spatial_block(v, p):
    outs = []
    for i, (k, pad) in enumerate(((7, 3), (5, 2), (3, 1), (1, 0))):
      vn = group_norm(v, p["gn_gamma"][i], p["gn_beta"][i])
      outs.append(conv(vn, p["conv_ws"][i], p["conv_bs"][i:i + 1], pad))
    return jnp.concatenate(outs, axis=1)

  def path(v, p):
    out6 = jnp.concatenate([channel_pool(v), spatial_block(v, p)], axis=1)
    return conv(out6, p["scale_w"], p["scale_b"], 0)

  return x * jax.nn.sigmoid(path(x, params["x"]) + path(g, params["g"]))


if __name__ == "__main__":
  key = jax.random.PRNGKey(0)
  kx, kg, kparam = jax.random.split(key, 3)
  B, C, H, W = 2, 8, 16, 16   # in_channel must be a multiple of 8 (GroupNorm groups)
  x = jax.random.normal(kx, (B, C, H, W), jnp.float32)
  g = jax.random.normal(kg, (B, C, H, W), jnp.float32)

  params = init_params(kparam, C)
  px = pack_path(params["x"], C, H, W)
  pg = pack_path(params["g"], C, H, W)
  kp = {f"x_{k}": v for k, v in px.items()}
  kp.update({f"g_{k}": v for k, v in pg.items()})

  out = jax.block_until_ready(spatial_attention_pallas(x, g, kp))
  ref = reference(x, g, params, C // 8)

  assert out.shape == (B, C, H, W)
  err = float(jnp.max(jnp.abs(out - ref)))
  assert jnp.allclose(out, ref, atol=2e-4, rtol=2e-4), err
  print("KERNEL_OK")
</pallas_src>

<mosaic_0001>
module attributes {stable_mosaic.version = 11 : i64} {
  func.func @_spatial_attention_kernel(%arg0: i32, %arg1: memref<1x8x256xf32, #tpu.memory_space<vmem>>, %arg2: memref<1x8x256xf32, #tpu.memory_space<vmem>>, %arg3: memref<7x256xf32, #tpu.memory_space<vmem>>, %arg4: memref<8x49xf32, #tpu.memory_space<vmem>>, %arg5: memref<1x256xf32, #tpu.memory_space<vmem>>, %arg6: memref<2xf32, #tpu.memory_space<smem>>, %arg7: memref<8x49xf32, #tpu.memory_space<vmem>>, %arg8: memref<1x256xf32, #tpu.memory_space<vmem>>, %arg9: memref<2xf32, #tpu.memory_space<smem>>, %arg10: memref<1x8x256xf32, #tpu.memory_space<vmem>>, %arg11: memref<8x512xf32, #tpu.memory_space<vmem>>) attributes {dimension_semantics = [#tpu.dimension_semantics<parallel>], iteration_bounds = array<i64: 2>, scalar_prefetch = 0 : i64, scratch_operands = 1 : i64, tpu.core_type = #tpu.core_type<tc>, window_params = [{transform_indices = @transform_0, window_bounds = array<i64: 1, 8, 256>}, {transform_indices = @transform_1, window_bounds = array<i64: 1, 8, 256>}, {pipeline_mode = #tpu.pipeline_mode<synchronous>, transform_indices = @transform_2, window_bounds = array<i64: 7, 256>}, {pipeline_mode = #tpu.pipeline_mode<synchronous>, transform_indices = @transform_3, window_bounds = array<i64: 8, 49>}, {pipeline_mode = #tpu.pipeline_mode<synchronous>, transform_indices = @transform_4, window_bounds = array<i64: 1, 256>}, {transform_indices = @transform_5, window_bounds = array<i64: 2>}, {pipeline_mode = #tpu.pipeline_mode<synchronous>, transform_indices = @transform_6, window_bounds = array<i64: 8, 49>}, {pipeline_mode = #tpu.pipeline_mode<synchronous>, transform_indices = @transform_7, window_bounds = array<i64: 1, 256>}, {transform_indices = @transform_8, window_bounds = array<i64: 2>}, {transform_indices = @transform_9, window_bounds = array<i64: 1, 8, 256>}]} {
    %cst = arith.constant 0.000000e+00 : f32
    %0 = vector.broadcast %cst : f32 to vector<8x128xf32>
    %c0 = arith.constant 0 : index
    %c0_0 = arith.constant 0 : index
    %1 = vector.load %arg11[%c0, %c0_0] : memref<8x512xf32, #tpu.memory_space<vmem>>, vector<8x128xf32>
    tpu.vector_store %arg11[%c0, %c0_0], %0 {strides = array<i32>} : memref<8x512xf32, #tpu.memory_space<vmem>>, vector<8x128xf32>,
    %cst_1 = arith.constant 0.000000e+00 : f32
    %2 = vector.broadcast %cst_1 : f32 to vector<8x128xf32>
    %c0_2 = arith.constant 0 : index
    %c384 = arith.constant 384 : index
    %3 = vector.load %arg11[%c0_2, %c384] : memref<8x512xf32, #tpu.memory_space<vmem>>, vector<8x128xf32>
    tpu.vector_store %arg11[%c0_2, %c384], %2 {strides = array<i32>} : memref<8x512xf32, #tpu.memory_space<vmem>>, vector<8x128xf32>,
    %c0_3 = arith.constant 0 : index
    %c0_4 = arith.constant 0 : index
    %c0_5 = arith.constant 0 : index
    %4 = vector.load %arg1[%c0_3, %c0_4, %c0_5] : memref<1x8x256xf32, #tpu.memory_space<vmem>>, vector<1x8x256xf32>
    %5 = vector.shape_cast %4 : vector<1x8x256xf32> to vector<8x256xf32>
    %cst_6 = arith.constant dense<0xFF800000> : vector<256xf32>
    %6 = vector.multi_reduction <maximumf>, %5, %cst_6 [0] : vector<8x256xf32> to vector<256xf32>
    %7 = vector.shape_cast %6 : vector<256xf32> to vector<1x256xf32>
    %cst_7 = arith.constant dense<0.000000e+00> : vector<256xf32>
    %8 = vector.multi_reduction <add>, %5, %cst_7 [0] : vector<8x256xf32> to vector<256xf32>
    %9 = vector.shape_cast %8 : vector<256xf32> to vector<1x256xf32>
    %cst_8 = arith.constant 8.000000e+00 : f32
    %10 = vector.broadcast %cst_8 : f32 to vector<1x256xf32>
    %11 = arith.divf %9, %10 : vector<1x256xf32>
    %12 = vector.shape_cast %5 : vector<8x256xf32> to vector<1x8x256xf32>
    %cst_9 = arith.constant dense<0.000000e+00> : vector<1xf32>
    %13 = vector.multi_reduction <add>, %12, %cst_9 [1, 2] : vector<1x8x256xf32> to vector<1xf32>
    %14 = vector.shape_cast %13 : vector<1xf32> to vector<1x1x1xf32>
    %15 = vector.extract %14[0, 0, 0] : f32 from vector<1x1x1xf32>
    %16 = arith.mulf %5, %5 : vector<8x256xf32>
    %17 = vector.shape_cast %16 : vector<8x256xf32> to vector<1x8x256xf32>
    %cst_10 = arith.constant dense<0.000000e+00> : vector<1xf32>
    %18 = vector.multi_reduction <add>, %17, %cst_10 [1, 2] : vector<1x8x256xf32> to vector<1xf32>
    %19 = vector.shape_cast %18 : vector<1xf32> to vector<1x1x1xf32>
    %20 = vector.extract %19[0, 0, 0] : f32 from vector<1x1x1xf32>
    %cst_11 = arith.constant 2.048000e+03 : f32
    %21 = arith.divf %15, %cst_11 : f32
    %cst_12 = arith.constant 2.048000e+03 : f32
    %22 = arith.divf %20, %cst_12 : f32
    %23 = arith.mulf %21, %21 : f32
    %24 = arith.subf %22, %23 : f32
    %25 = vector.broadcast %21 : f32 to vector<8x256xf32>
    %26 = arith.subf %5, %25 : vector<8x256xf32>
    %cst_13 = arith.constant 9.99999974E-6 : f32
    %27 = arith.addf %24, %cst_13 : f32
    %28 = math.rsqrt %27 : f32
    %29 = vector.broadcast %28 : f32 to vector<8x256xf32>
    %30 = arith.mulf %26, %29 : vector<8x256xf32>
    %c0_14 = arith.constant 0 : index
    %c128 = arith.constant 128 : index
    %31 = vector.load %arg11[%c0_14, %c128] : memref<8x512xf32, #tpu.memory_space<vmem>>, vector<8x256xf32>
    tpu.vector_store %arg11[%c0_14, %c128], %30 {strides = array<i32>} : memref<8x512xf32, #tpu.memory_space<vmem>>, vector<8x256xf32>,
    %c0_15 = arith.constant 0 : index
    %c0_16 = arith.constant 0 : index
    %32 = vector.load %arg4[%c0_15, %c0_16] : memref<8x49xf32, #tpu.memory_space<vmem>>, vector<8x1xf32>
    %c0_17 = arith.constant 0 : index
    %c77 = arith.constant 77 : index
    %33 = vector.load %arg11[%c0_17, %c77] : memref<8x512xf32, #tpu.memory_space<vmem>>, vector<8x256xf32>
    %34 = vector.broadcast %32 : vector<8x1xf32> to vector<8x256xf32>
    %35 = arith.mulf %34, %33 : vector<8x256xf32>
    %c0_18 = arith.constant 0 : index
    %c7 = arith.constant 7 : index
    %36 = vector.load %arg4[%c0_18, %c7] : memref<8x49xf32, #tpu.memory_space<vmem>>, vector<8x1xf32>
    %c0_19 = arith.constant 0 : index
    %c93 = arith.constant 93 : index
    %37 = vector.load %arg11[%c0_19, %c93] : memref<8x512xf32, #tpu.memory_space<vmem>>, vector<8x256xf32>
    %38 = vector.broadcast %36 : vector<8x1xf32> to vector<8x256xf32>
    %39 = arith.mulf %38, %37 : vector<8x256xf32>
    %40 = arith.addf %35, %39 : vector<8x256xf32>
    %c0_20 = arith.constant 0 : index
    %c14 = arith.constant 14 : index
    %41 = vector.load %arg4[%c0_20, %c14] : memref<8x49xf32, #tpu.memory_space<vmem>>, vector<8x1xf32>
    %c0_21 = arith.constant 0 : index
    %c109 = arith.constant 109 : index
    %42 = vector.load %arg11[%c0_21, %c109] : memref<8x512xf32, #tpu.memory_space<vmem>>, vector<8x256xf32>
    %43 = vector.broadcast %41 : vector<8x1xf32> to vector<8x256xf32>
    %44 = arith.mulf %43, %42 : vector<8x256xf32>
    %45 = arith.addf %40, %44 : vector<8x256xf32>
    %c0_22 = arith.constant 0 : index
    %c21 = arith.constant 21 : index
    %46 = vector.load %arg4[%c0_22, %c21] : memref<8x49xf32, #tpu.memory_space<vmem>>, vector<8x1xf32>
    %c0_23 = arith.constant 0 : index
    %c125 = arith.constant 125 : index
    %47 = vector.load %arg11[%c0_23, %c125] : memref<8x512xf32, #tpu.memory_space<vmem>>, vector<8x256xf32>
    %48 = vector.broadcast %46 : vector<8x1xf32> to vector<8x256xf32>
    %49 = arith.mulf %48, %47 : vector<8x256xf32>
    %50 = arith.addf %45, %49 : vector<8x256xf32>
    %c0_24 = arith.constant 0 : index
    %c28 = arith.constant 28 : index
    %51 = vector.load %arg4[%c0_24, %c28] : memref<8x49xf32, #tpu.memory_space<vmem>>, vector<8x1xf32>
    %c0_25 = arith.constant 0 : index
    %c141 = arith.constant 141 : index
    %52 = vector.load %arg11[%c0_25, %c141] : memref<8x512xf32, #tpu.memory_space<vmem>>, vector<8x256xf32>
    %53 = vector.broadcast %51 : vector<8x1xf32> to vector<8x256xf32>
    %54 = arith.mulf %53, %52 : vector<8x256xf32>
    %55 = arith.addf %50, %54 : vector<8x256xf32>
    %c0_26 = arith.constant 0 : index
    %c35 = arith.constant 35 : index
    %56 = vector.load %arg4[%c0_26, %c35] : memref<8x49xf32, #tpu.memory_space<vmem>>, vector<8x1xf32>
    %c0_27 = arith.constant 0 : index
    %c157 = arith.constant 157 : index
    %57 = vector.load %arg11[%c0_27, %c157] : memref<8x512xf32, #tpu.memory_space<vmem>>, vector<8x256xf32>
    %58 = vector.broadcast %56 : vector<8x1xf32> to vector<8x256xf32>
    %59 = arith.mulf %58, %57 : vector<8x256xf32>
    %60 = arith.addf %55, %59 : vector<8x256xf32>
    %c0_28 = arith.constant 0 : index
    %c42 = arith.constant 42 : index
    %61 = vector.load %arg4[%c0_28, %c42] : memref<8x49xf32, #tpu.memory_space<vmem>>, vector<8x1xf32>
    %c0_29 = arith.constant 0 : index
    %c173 = arith.constant 173 : index
    %62 = vector.load %arg11[%c0_29, %c173] : memref<8x512xf32, #tpu.memory_space<vmem>>, vector<8x256xf32>
    %63 = vector.broadcast %61 : vector<8x1xf32> to vector<8x256xf32>
    %64 = arith.mulf %63, %62 : vector<8x256xf32>
    %65 = arith.addf %60, %64 : vector<8x256xf32>
    %c0_30 = arith.constant 0 : index
    %c0_31 = arith.constant 0 : index
    %66 = vector.load %arg3[%c0_30, %c0_31] : memref<7x256xf32, #tpu.memory_space<vmem>>, vector<1x256xf32>
    %67 = vector.broadcast %66 : vector<1x256xf32> to vector<8x256xf32>
    %68 = arith.mulf %67, %65 : vector<8x256xf32>
    %c0_32 = arith.constant 0 : index
    %c1 = arith.constant 1 : index
    %69 = vector.load %arg4[%c0_32, %c1] : memref<8x49xf32, #tpu.memory_space<vmem>>, vector<8x1xf32>
    %c0_33 = arith.constant 0 : index
    %c78 = arith.constant 78 : index
    %70 = vector.load %arg11[%c0_33, %c78] : memref<8x512xf32, #tpu.memory_space<vmem>>, vector<8x256xf32>
    %71 = vector.broadcast %69 : vector<8x1xf32> to vector<8x256xf32>
    %72 = arith.mulf %71, %70 : vector<8x256xf32>
    %c0_34 = arith.constant 0 : index
    %c8 = arith.constant 8 : index
    %73 = vector.load %arg4[%c0_34, %c8] : memref<8x49xf32, #tpu.memory_space<vmem>>, vector<8x1xf32>
    %c0_35 = arith.constant 0 : index
    %c94 = arith.constant 94 : index
    %74 = vector.load %arg11[%c0_35, %c94] : memref<8x512xf32, #tpu.memory_space<vmem>>, vector<8x256xf32>
    %75 = vector.broadcast %73 : vector<8x1xf32> to vector<8x256xf32>
    %76 = arith.mulf %75, %74 : vector<8x256xf32>
    %77 = arith.addf %72, %76 : vector<8x256xf32>
    %c0_36 = arith.constant 0 : index
    %c15 = arith.constant 15 : index
    %78 = vector.load %arg4[%c0_36, %c15] : memref<8x49xf32, #tpu.memory_space<vmem>>, vector<8x1xf32>
    %c0_37 = arith.constant 0 : index
    %c110 = arith.constant 110 : index
    %79 = vector.load %arg11[%c0_37, %c110] : memref<8x512xf32, #tpu.memory_space<vmem>>, vector<8x256xf32>
    %80 = vector.broadcast %78 : vector<8x1xf32> to vector<8x256xf32>
    %81 = arith.mulf %80, %79 : vector<8x256xf32>
    %82 = arith.addf %77, %81 : vector<8x256xf32>
    %c0_38 = arith.constant 0 : index
    %c22 = arith.constant 22 : index
    %83 = vector.load %arg4[%c0_38, %c22] : memref<8x49xf32, #tpu.memory_space<vmem>>, vector<8x1xf32>
    %c0_39 = arith.constant 0 : index
    %c126 = arith.constant 126 : index
    %84 = vector.load %arg11[%c0_39, %c126] : memref<8x512xf32, #tpu.memory_space<vmem>>, vector<8x256xf32>
    %85 = vector.broadcast %83 : vector<8x1xf32> to vector<8x256xf32>
    %86 = arith.mulf %85, %84 : vector<8x256xf32>
    %87 = arith.addf %82, %86 : vector<8x256xf32>
    %c0_40 = arith.constant 0 : index
    %c29 = arith.constant 29 : index
    %88 = vector.load %arg4[%c0_40, %c29] : memref<8x49xf32, #tpu.memory_space<vmem>>, vector<8x1xf32>
    %c0_41 = arith.constant 0 : index
    %c142 = arith.constant 142 : index
    %89 = vector.load %arg11[%c0_41, %c142] : memref<8x512xf32, #tpu.memory_space<vmem>>, vector<8x256xf32>
    %90 = vector.broadcast %88 : vector<8x1xf32> to vector<8x256xf32>
    %91 = arith.mulf %90, %89 : vector<8x256xf32>
    %92 = arith.addf %87, %91 : vector<8x256xf32>
    %c0_42 = arith.constant 0 : index
    %c36 = arith.constant 36 : index
    %93 = vector.load %arg4[%c0_42, %c36] : memref<8x49xf32, #tpu.memory_space<vmem>>, vector<8x1xf32>
    %c0_43 = arith.constant 0 : index
    %c158 = arith.constant 158 : index
    %94 = vector.load %arg11[%c0_43, %c158] : memref<8x512xf32, #tpu.memory_space<vmem>>, vector<8x256xf32>
    %95 = vector.broadcast %93 : vector<8x1xf32> to vector<8x256xf32>
    %96 = arith.mulf %95, %94 : vector<8x256xf32>
    %97 = arith.addf %92, %96 : vector<8x256xf32>
    %c0_44 = arith.constant 0 : index
    %c43 = arith.constant 43 : index
    %98 = vector.load %arg4[%c0_44, %c43] : memref<8x49xf32, #tpu.memory_space<vmem>>, vector<8x1xf32>
    %c0_45 = arith.constant 0 : index
    %c174 = arith.constant 174 : index
    %99 = vector.load %arg11[%c0_45, %c174] : memref<8x512xf32, #tpu.memory_space<vmem>>, vector<8x256xf32>
    %100 = vector.broadcast %98 : vector<8x1xf32> to vector<8x256xf32>
    %101 = arith.mulf %100, %99 : vector<8x256xf32>
    %102 = arith.addf %97, %101 : vector<8x256xf32>
    %c1_46 = arith.constant 1 : index
    %c0_47 = arith.constant 0 : index
    %103 = vector.load %arg3[%c1_46, %c0_47] : memref<7x256xf32, #tpu.memory_space<vmem>>, vector<1x256xf32>
    %104 = vector.broadcast %103 : vector<1x256xf32> to vector<8x256xf32>
    %105 = arith.mulf %104, %102 : vector<8x256xf32>
    %106 = arith.addf %68, %105 : vector<8x256xf32>
    %c0_48 = arith.constant 0 : index
    %c2 = arith.constant 2 : index
    %107 = vector.load %arg4[%c0_48, %c2] : memref<8x49xf32, #tpu.memory_space<vmem>>, vector<8x1xf32>
    %c0_49 = arith.constant 0 : index
    %c79 = arith.constant 79 : index
    %108 = vector.load %arg11[%c0_49, %c79] : memref<8x512xf32, #tpu.memory_space<vmem>>, vector<8x256xf32>
    %109 = vector.broadcast %107 : vector<8x1xf32> to vector<8x256xf32>
    %110 = arith.mulf %109, %108 : vector<8x256xf32>
    %c0_50 = arith.constant 0 : index
    %c9 = arith.constant 9 : index
    %111 = vector.load %arg4[%c0_50, %c9] : memref<8x49xf32, #tpu.memory_space<vmem>>, vector<8x1xf32>
    %c0_51 = arith.constant 0 : index
    %c95 = arith.constant 95 : index
    %112 = vector.load %arg11[%c0_51, %c95] : memref<8x512xf32, #tpu.memory_space<vmem>>, vector<8x256xf32>
    %113 = vector.broadcast %111 : vector<8x1xf32> to vector<8x256xf32>
    %114 = arith.mulf %113, %112 : vector<8x256xf32>
    %115 = arith.addf %110, %114 : vector<8x256xf32>
    %c0_52 = arith.constant 0 : index
    %c16 = arith.constant 16 : index
    %116 = vector.load %arg4[%c0_52, %c16] : memref<8x49xf32, #tpu.memory_space<vmem>>, vector<8x1xf32>
    %c0_53 = arith.constant 0 : index
    %c111 = arith.constant 111 : index
    %117 = vector.load %arg11[%c0_53, %c111] : memref<8x512xf32, #tpu.memory_space<vmem>>, vector<8x256xf32>
    %118 = vector.broadcast %116 : vector<8x1xf32> to vector<8x256xf32>
    %119 = arith.mulf %118, %117 : vector<8x256xf32>
    %120 = arith.addf %115, %119 : vector<8x256xf32>
    %c0_54 = arith.constant 0 : index
    %c23 = arith.constant 23 : index
    %121 = vector.load %arg4[%c0_54, %c23] : memref<8x49xf32, #tpu.memory_space<vmem>>, vector<8x1xf32>
    %c0_55 = arith.constant 0 : index
    %c127 = arith.constant 127 : index
    %122 = vector.load %arg11[%c0_55, %c127] : memref<8x512xf32, #tpu.memory_space<vmem>>, vector<8x256xf32>
    %123 = vector.broadcast %121 : vector<8x1xf32> to vector<8x256xf32>
    %124 = arith.mulf %123, %122 : vector<8x256xf32>
    %125 = arith.addf %120, %124 : vector<8x256xf32>
    %c0_56 = arith.constant 0 : index
    %c30 = arith.constant 30 : index
    %126 = vector.load %arg4[%c0_56, %c30] : memref<8x49xf32, #tpu.memory_space<vmem>>, vector<8x1xf32>
    %c0_57 = arith.constant 0 : index
    %c143 = arith.constant 143 : index
    %127 = vector.load %arg11[%c0_57, %c143] : memref<8x512xf32, #tpu.memory_space<vmem>>, vector<8x256xf32>
    %128 = vector.broadcast %126 : vector<8x1xf32> to vector<8x256xf32>
    %129 = arith.mulf %128, %127 : vector<8x256xf32>
    %130 = arith.addf %125, %129 : vector<8x256xf32>
    %c0_58 = arith.constant 0 : index
    %c37 = arith.constant 37 : index
    %131 = vector.load %arg4[%c0_58, %c37] : memref<8x49xf32, #tpu.memory_space<vmem>>, vector<8x1xf32>
    %c0_59 = arith.constant 0 : index
    %c159 = arith.constant 159 : index
    %132 = vector.load %arg11[%c0_59, %c159] : memref<8x512xf32, #tpu.memory_space<vmem>>, vector<8x256xf32>
    %133 = vector.broadcast %131 : vector<8x1xf32> to vector<8x256xf32>
    %134 = arith.mulf %133, %132 : vector<8x256xf32>
    %135 = arith.addf %130, %134 : vector<8x256xf32>
    %c0_60 = arith.constant 0 : index
    %c44 = arith.constant 44 : index
    %136 = vector.load %arg4[%c0_60, %c44] : memref<8x49xf32, #tpu.memory_space<vmem>>, vector<8x1xf32>
    %c0_61 = arith.constant 0 : index
    %c175 = arith.constant 175 : index
    %137 = vector.load %arg11[%c0_61, %c175] : memref<8x512xf32, #tpu.memory_space<vmem>>, vector<8x256xf32>
    %138 = vector.broadcast %136 : vector<8x1xf32> to vector<8x256xf32>
    %139 = arith.mulf %138, %137 : vector<8x256xf32>
    %140 = arith.addf %135, %139 : vector<8x256xf32>
    %c2_62 = arith.constant 2 : index
    %c0_63 = arith.constant 0 : index
    %141 = vector.load %arg3[%c2_62, %c0_63] : memref<7x256xf32, #tpu.memory_space<vmem>>, vector<1x256xf32>
    %142 = vector.broadcast %141 : vector<1x256xf32> to vector<8x256xf32>
    %143 = arith.mulf %142, %140 : vector<8x256xf32>
    %144 = arith.addf %106, %143 : vector<8x256xf32>
    %c0_64 = arith.constant 0 : index
    %c3 = arith.constant 3 : index
    %145 = vector.load %arg4[%c0_64, %c3] : memref<8x49xf32, #tpu.memory_space<vmem>>, vector<8x1xf32>
    %c0_65 = arith.constant 0 : index
    %c80 = arith.constant 80 : index
    %146 = vector.load %arg11[%c0_65, %c80] : memref<8x512xf32, #tpu.memory_space<vmem>>, vector<8x256xf32>
    %147 = vector.broadcast %145 : vector<8x1xf32> to vector<8x256xf32>
    %148 = arith.mulf %147, %146 : vector<8x256xf32>
    %c0_66 = arith.constant 0 : index
    %c10 = arith.constant 10 : index
    %149 = vector.load %arg4[%c0_66, %c10] : memref<8x49xf32, #tpu.memory_space<vmem>>, vector<8x1xf32>
    %c0_67 = arith.constant 0 : index
    %c96 = arith.constant 96 : index
    %150 = vector.load %arg11[%c0_67, %c96] : memref<8x512xf32, #tpu.memory_space<vmem>>, vector<8x256xf32>
    %151 = vector.broadcast %149 : vector<8x1xf32> to vector<8x256xf32>
    %152 = arith.mulf %151, %150 : vector<8x256xf32>
    %153 = arith.addf %148, %152 : vector<8x256xf32>
    %c0_68 = arith.constant 0 : index
    %c17 = arith.constant 17 : index
    %154 = vector.load %arg4[%c0_68, %c17] : memref<8x49xf32, #tpu.memory_space<vmem>>, vector<8x1xf32>
    %c0_69 = arith.constant 0 : index
    %c112 = arith.constant 112 : index
    %155 = vector.load %arg11[%c0_69, %c112] : memref<8x512xf32, #tpu.memory_space<vmem>>, vector<8x256xf32>
    %156 = vector.broadcast %154 : vector<8x1xf32> to vector<8x256xf32>
    %157 = arith.mulf %156, %155 : vector<8x256xf32>
    %158 = arith.addf %153, %157 : vector<8x256xf32>
    %c0_70 = arith.constant 0 : index
    %c24 = arith.constant 24 : index
    %159 = vector.load %arg4[%c0_70, %c24] : memref<8x49xf32, #tpu.memory_space<vmem>>, vector<8x1xf32>
    %c0_71 = arith.constant 0 : index
    %c128_72 = arith.constant 128 : index
    %160 = vector.load %arg11[%c0_71, %c128_72] : memref<8x512xf32, #tpu.memory_space<vmem>>, vector<8x256xf32>
    %161 = vector.broadcast %159 : vector<8x1xf32> to vector<8x256xf32>
    %162 = arith.mulf %161, %160 : vector<8x256xf32>
    %163 = arith.addf %158, %162 : vector<8x256xf32>
    %c0_73 = arith.constant 0 : index
    %c31 = arith.constant 31 : index
    %164 = vector.load %arg4[%c0_73, %c31] : memref<8x49xf32, #tpu.memory_space<vmem>>, vector<8x1xf32>
    %c0_74 = arith.constant 0 : index
    %c144 = arith.constant 144 : index
    %165 = vector.load %arg11[%c0_74, %c144] : memref<8x512xf32, #tpu.memory_space<vmem>>, vector<8x256xf32>
    %166 = vector.broadcast %164 : vector<8x1xf32> to vector<8x256xf32>
    %167 = arith.mulf %166, %165 : vector<8x256xf32>
    %168 = arith.addf %163, %167 : vector<8x256xf32>
    %c0_75 = arith.constant 0 : index
    %c38 = arith.constant 38 : index
    %169 = vector.load %arg4[%c0_75, %c38] : memref<8x49xf32, #tpu.memory_space<vmem>>, vector<8x1xf32>
    %c0_76 = arith.constant 0 : index
    %c160 = arith.constant 160 : index
    %170 = vector.load %arg11[%c0_76, %c160] : memref<8x512xf32, #tpu.memory_space<vmem>>, vector<8x256xf32>
    %171 = vector.broadcast %169 : vector<8x1xf32> to vector<8x256xf32>
    %172 = arith.mulf %171, %170 : vector<8x256xf32>
    %173 = arith.addf %168, %172 : vector<8x256xf32>
    %c0_77 = arith.constant 0 : index
    %c45 = arith.constant 45 : index
    %174 = vector.load %arg4[%c0_77, %c45] : memref<8x49xf32, #tpu.memory_space<vmem>>, vector<8x1xf32>
    %c0_78 = arith.constant 0 : index
    %c176 = arith.constant 176 : index
    %175 = vector.load %arg11[%c0_78, %c176] : memref<8x512xf32, #tpu.memory_space<vmem>>, vector<8x256xf32>
    %176 = vector.broadcast %174 : vector<8x1xf32> to vector<8x256xf32>
    %177 = arith.mulf %176, %175 : vector<8x256xf32>
    %178 = arith.addf %173, %177 : vector<8x256xf32>
    %179 = arith.addf %144, %178 : vector<8x256xf32>
    %c0_79 = arith.constant 0 : index
    %c4 = arith.constant 4 : index
    %180 = vector.load %arg4[%c0_79, %c4] : memref<8x49xf32, #tpu.memory_space<vmem>>, vector<8x1xf32>
    %c0_80 = arith.constant 0 : index
    %c81 = arith.constant 81 : index
    %181 = vector.load %arg11[%c0_80, %c81] : memref<8x512xf32, #tpu.memory_space<vmem>>, vector<8x256xf32>
    %182 = vector.broadcast %180 : vector<8x1xf32> to vector<8x256xf32>
    %183 = arith.mulf %182, %181 : vector<8x256xf32>
    %c0_81 = arith.constant 0 : index
    %c11 = arith.constant 11 : index
    %184 = vector.load %arg4[%c0_81, %c11] : memref<8x49xf32, #tpu.memory_space<vmem>>, vector<8x1xf32>
    %c0_82 = arith.constant 0 : index
    %c97 = arith.constant 97 : index
    %185 = vector.load %arg11[%c0_82, %c97] : memref<8x512xf32, #tpu.memory_space<vmem>>, vector<8x256xf32>
    %186 = vector.broadcast %184 : vector<8x1xf32> to vector<8x256xf32>
    %187 = arith.mulf %186, %185 : vector<8x256xf32>
    %188 = arith.addf %183, %187 : vector<8x256xf32>
    %c0_83 = arith.constant 0 : index
    %c18 = arith.constant 18 : index
    %189 = vector.load %arg4[%c0_83, %c18] : memref<8x49xf32, #tpu.memory_space<vmem>>, vector<8x1xf32>
    %c0_84 = arith.constant 0 : index
    %c113 = arith.constant 113 : index
    %190 = vector.load %arg11[%c0_84, %c113] : memref<8x512xf32, #tpu.memory_space<vmem>>, vector<8x256xf32>
    %191 = vector.broadcast %189 : vector<8x1xf32> to vector<8x256xf32>
    %192 = arith.mulf %191, %190 : vector<8x256xf32>
    %193 = arith.addf %188, %192 : vector<8x256xf32>
    %c0_85 = arith.constant 0 : index
    %c25 = arith.constant 25 : index
    %194 = vector.load %arg4[%c0_85, %c25] : memref<8x49xf32, #tpu.memory_space<vmem>>, vector<8x1xf32>
    %c0_86 = arith.constant 0 : index
    %c129 = arith.constant 129 : index
    %195 = vector.load %arg11[%c0_86, %c129] : memref<8x512xf32, #tpu.memory_space<vmem>>, vector<8x256xf32>
    %196 = vector.broadcast %194 : vector<8x1xf32> to vector<8x256xf32>
    %197 = arith.mulf %196, %195 : vector<8x256xf32>
    %198 = arith.addf %193, %197 : vector<8x256xf32>
    %c0_87 = arith.constant 0 : index
    %c32 = arith.constant 32 : index
    %199 = vector.load %arg4[%c0_87, %c32] : memref<8x49xf32, #tpu.memory_space<vmem>>, vector<8x1xf32>
    %c0_88 = arith.constant 0 : index
    %c145 = arith.constant 145 : index
    %200 = vector.load %arg11[%c0_88, %c145] : memref<8x512xf32, #tpu.memory_space<vmem>>, vector<8x256xf32>
    %201 = vector.broadcast %199 : vector<8x1xf32> to vector<8x256xf32>
    %202 = arith.mulf %201, %200 : vector<8x256xf32>
    %203 = arith.addf %198, %202 : vector<8x256xf32>
    %c0_89 = arith.constant 0 : index
    %c39 = arith.constant 39 : index
    %204 = vector.load %arg4[%c0_89, %c39] : memref<8x49xf32, #tpu.memory_space<vmem>>, vector<8x1xf32>
    %c0_90 = arith.constant 0 : index
    %c161 = arith.constant 161 : index
    %205 = vector.load %arg11[%c0_90, %c161] : memref<8x512xf32, #tpu.memory_space<vmem>>, vector<8x256xf32>
    %206 = vector.broadcast %204 : vector<8x1xf32> to vector<8x256xf32>
    %207 = arith.mulf %206, %205 : vector<8x256xf32>
    %208 = arith.addf %203, %207 : vector<8x256xf32>
    %c0_91 = arith.constant 0 : index
    %c46 = arith.constant 46 : index
    %209 = vector.load %arg4[%c0_91, %c46] : memref<8x49xf32, #tpu.memory_space<vmem>>, vector<8x1xf32>
    %c0_92 = arith.constant 0 : index
    %c177 = arith.constant 177 : index
    %210 = vector.load %arg11[%c0_92, %c177] : memref<8x512xf32, #tpu.memory_space<vmem>>, vector<8x256xf32>
    %211 = vector.broadcast %209 : vector<8x1xf32> to vector<8x256xf32>
    %212 = arith.mulf %211, %210 : vector<8x256xf32>
    %213 = arith.addf %208, %212 : vector<8x256xf32>
    %c4_93 = arith.constant 4 : index
    %c0_94 = arith.constant 0 : index
    %214 = vector.load %arg3[%c4_93, %c0_94] : memref<7x256xf32, #tpu.memory_space<vmem>>, vector<1x256xf32>
    %215 = vector.broadcast %214 : vector<1x256xf32> to vector<8x256xf32>
    %216 = arith.mulf %215, %213 : vector<8x256xf32>
    %217 = arith.addf %179, %216 : vector<8x256xf32>
    %c0_95 = arith.constant 0 : index
    %c5 = arith.constant 5 : index
    %218 = vector.load %arg4[%c0_95, %c5] : memref<8x49xf32, #tpu.memory_space<vmem>>, vector<8x1xf32>
    %c0_96 = arith.constant 0 : index
    %c82 = arith.constant 82 : index
    %219 = vector.load %arg11[%c0_96, %c82] : memref<8x512xf32, #tpu.memory_space<vmem>>, vector<8x256xf32>
    %220 = vector.broadcast %218 : vector<8x1xf32> to vector<8x256xf32>
    %221 = arith.mulf %220, %219 : vector<8x256xf32>
    %c0_97 = arith.constant 0 : index
    %c12 = arith.constant 12 : index
    %222 = vector.load %arg4[%c0_97, %c12] : memref<8x49xf32, #tpu.memory_space<vmem>>, vector<8x1xf32>
    %c0_98 = arith.constant 0 : index
    %c98 = arith.constant 98 : index
    %223 = vector.load %arg11[%c0_98, %c98] : memref<8x512xf32, #tpu.memory_space<vmem>>, vector<8x256xf32>
    %224 = vector.broadcast %222 : vector<8x1xf32> to vector<8x256xf32>
    %225 = arith.mulf %224, %223 : vector<8x256xf32>
    %226 = arith.addf %221, %225 : vector<8x256xf32>
    %c0_99 = arith.constant 0 : index
    %c19 = arith.constant 19 : index
    %227 = vector.load %arg4[%c0_99, %c19] : memref<8x49xf32, #tpu.memory_space<vmem>>, vector<8x1xf32>
    %c0_100 = arith.constant 0 : index
    %c114 = arith.constant 114 : index
    %228 = vector.load %arg11[%c0_100, %c114] : memref<8x512xf32, #tpu.memory_space<vmem>>, vector<8x256xf32>
    %229 = vector.broadcast %227 : vector<8x1xf32> to vector<8x256xf32>
    %230 = arith.mulf %229, %228 : vector<8x256xf32>
    %231 = arith.addf %226, %230 : vector<8x256xf32>
    %c0_101 = arith.constant 0 : index
    %c26 = arith.constant 26 : index
    %232 = vector.load %arg4[%c0_101, %c26] : memref<8x49xf32, #tpu.memory_space<vmem>>, vector<8x1xf32>
    %c0_102 = arith.constant 0 : index
    %c130 = arith.constant 130 : index
    %233 = vector.load %arg11[%c0_102, %c130] : memref<8x512xf32, #tpu.memory_space<vmem>>, vector<8x256xf32>
    %234 = vector.broadcast %232 : vector<8x1xf32> to vector<8x256xf32>
    %235 = arith.mulf %234, %233 : vector<8x256xf32>
    %236 = arith.addf %231, %235 : vector<8x256xf32>
    %c0_103 = arith.constant 0 : index
    %c33 = arith.constant 33 : index
    %237 = vector.load %arg4[%c0_103, %c33] : memref<8x49xf32, #tpu.memory_space<vmem>>, vector<8x1xf32>
    %c0_104 = arith.constant 0 : index
    %c146 = arith.constant 146 : index
    %238 = vector.load %arg11[%c0_104, %c146] : memref<8x512xf32, #tpu.memory_space<vmem>>, vector<8x256xf32>
    %239 = vector.broadcast %237 : vector<8x1xf32> to vector<8x256xf32>
    %240 = arith.mulf %239, %238 : vector<8x256xf32>
    %241 = arith.addf %236, %240 : vector<8x256xf32>
    %c0_105 = arith.constant 0 : index
    %c40 = arith.constant 40 : index
    %242 = vector.load %arg4[%c0_105, %c40] : memref<8x49xf32, #tpu.memory_space<vmem>>, vector<8x1xf32>
    %c0_106 = arith.constant 0 : index
    %c162 = arith.constant 162 : index
    %243 = vector.load %arg11[%c0_106, %c162] : memref<8x512xf32, #tpu.memory_space<vmem>>, vector<8x256xf32>
    %244 = vector.broadcast %242 : vector<8x1xf32> to vector<8x256xf32>
    %245 = arith.mulf %244, %243 : vector<8x256xf32>
    %246 = arith.addf %241, %245 : vector<8x256xf32>
    %c0_107 = arith.constant 0 : index
    %c47 = arith.constant 47 : index
    %247 = vector.load %arg4[%c0_107, %c47] : memref<8x49xf32, #tpu.memory_space<vmem>>, vector<8x1xf32>
    %c0_108 = arith.constant 0 : index
    %c178 = arith.constant 178 : index
    %248 = vector.load %arg11[%c0_108, %c178] : memref<8x512xf32, #tpu.memory_space<vmem>>, vector<8x256xf32>
    %249 = vector.broadcast %247 : vector<8x1xf32> to vector<8x256xf32>
    %250 = arith.mulf %249, %248 : vector<8x256xf32>
    %251 = arith.addf %246, %250 : vector<8x256xf32>
    %c5_109 = arith.constant 5 : index
    %c0_110 = arith.constant 0 : index
    %252 = vector.load %arg3[%c5_109, %c0_110] : memref<7x256xf32, #tpu.memory_space<vmem>>, vector<1x256xf32>
    %253 = vector.broadcast %252 : vector<1x256xf32> to vector<8x256xf32>
    %254 = arith.mulf %253, %251 : vector<8x256xf32>
    %255 = arith.addf %217, %254 : vector<8x256xf32>
    %c0_111 = arith.constant 0 : index
    %c6 = arith.constant 6 : index
    %256 = vector.load %arg4[%c0_111, %c6] : memref<8x49xf32, #tpu.memory_space<vmem>>, vector<8x1xf32>
    %c0_112 = arith.constant 0 : index
    %c83 = arith.constant 83 : index
    %257 = vector.load %arg11[%c0_112, %c83] : memref<8x512xf32, #tpu.memory_space<vmem>>, vector<8x256xf32>
    %258 = vector.broadcast %256 : vector<8x1xf32> to vector<8x256xf32>
    %259 = arith.mulf %258, %257 : vector<8x256xf32>
    %c0_113 = arith.constant 0 : index
    %c13 = arith.constant 13 : index
    %260 = vector.load %arg4[%c0_113, %c13] : memref<8x49xf32, #tpu.memory_space<vmem>>, vector<8x1xf32>
    %c0_114 = arith.constant 0 : index
    %c99 = arith.constant 99 : index
    %261 = vector.load %arg11[%c0_114, %c99] : memref<8x512xf32, #tpu.memory_space<vmem>>, vector<8x256xf32>
    %262 = vector.broadcast %260 : vector<8x1xf32> to vector<8x256xf32>
    %263 = arith.mulf %262, %261 : vector<8x256xf32>
    %264 = arith.addf %259, %263 : vector<8x256xf32>
    %c0_115 = arith.constant 0 : index
    %c20 = arith.constant 20 : index
    %265 = vector.load %arg4[%c0_115, %c20] : memref<8x49xf32, #tpu.memory_space<vmem>>, vector<8x1xf32>
    %c0_116 = arith.constant 0 : index
    %c115 = arith.constant 115 : index
    %266 = vector.load %arg11[%c0_116, %c115] : memref<8x512xf32, #tpu.memory_space<vmem>>, vector<8x256xf32>
    %267 = vector.broadcast %265 : vector<8x1xf32> to vector<8x256xf32>
    %268 = arith.mulf %267, %266 : vector<8x256xf32>
    %269 = arith.addf %264, %268 : vector<8x256xf32>
    %c0_117 = arith.constant 0 : index
    %c27 = arith.constant 27 : index
    %270 = vector.load %arg4[%c0_117, %c27] : memref<8x49xf32, #tpu.memory_space<vmem>>, vector<8x1xf32>
    %c0_118 = arith.constant 0 : index
    %c131 = arith.constant 131 : index
    %271 = vector.load %arg11[%c0_118, %c131] : memref<8x512xf32, #tpu.memory_space<vmem>>, vector<8x256xf32>
    %272 = vector.broadcast %270 : vector<8x1xf32> to vector<8x256xf32>
    %273 = arith.mulf %272, %271 : vector<8x256xf32>
    %274 = arith.addf %269, %273 : vector<8x256xf32>
    %c0_119 = arith.constant 0 : index
    %c34 = arith.constant 34 : index
    %275 = vector.load %arg4[%c0_119, %c34] : memref<8x49xf32, #tpu.memory_space<vmem>>, vector<8x1xf32>
    %c0_120 = arith.constant 0 : index
    %c147 = arith.constant 147 : index
    %276 = vector.load %arg11[%c0_120, %c147] : memref<8x512xf32, #tpu.memory_space<vmem>>, vector<8x256xf32>
    %277 = vector.broadcast %275 : vector<8x1xf32> to vector<8x256xf32>
    %278 = arith.mulf %277, %276 : vector<8x256xf32>
    %279 = arith.addf %274, %278 : vector<8x256xf32>
    %c0_121 = arith.constant 0 : index
    %c41 = arith.constant 41 : index
    %280 = vector.load %arg4[%c0_121, %c41] : memref<8x49xf32, #tpu.memory_space<vmem>>, vector<8x1xf32>
    %c0_122 = arith.constant 0 : index
    %c163 = arith.constant 163 : index
    %281 = vector.load %arg11[%c0_122, %c163] : memref<8x512xf32, #tpu.memory_space<vmem>>, vector<8x256xf32>
    %282 = vector.broadcast %280 : vector<8x1xf32> to vector<8x256xf32>
    %283 = arith.mulf %282, %281 : vector<8x256xf32>
    %284 = arith.addf %279, %283 : vector<8x256xf32>
    %c0_123 = arith.constant 0 : index
    %c48 = arith.constant 48 : index
    %285 = vector.load %arg4[%c0_123, %c48] : memref<8x49xf32, #tpu.memory_space<vmem>>, vector<8x1xf32>
    %c0_124 = arith.constant 0 : index
    %c179 = arith.constant 179 : index
    %286 = vector.load %arg11[%c0_124, %c179] : memref<8x512xf32, #tpu.memory_space<vmem>>, vector<8x256xf32>
    %287 = vector.broadcast %285 : vector<8x1xf32> to vector<8x256xf32>
    %288 = arith.mulf %287, %286 : vector<8x256xf32>
    %289 = arith.addf %284, %288 : vector<8x256xf32>
    %c6_125 = arith.constant 6 : index
    %c0_126 = arith.constant 0 : index
    %290 = vector.load %arg3[%c6_125, %c0_126] : memref<7x256xf32, #tpu.memory_space<vmem>>, vector<1x256xf32>
    %291 = vector.broadcast %290 : vector<1x256xf32> to vector<8x256xf32>
    %292 = arith.mulf %291, %289 : vector<8x256xf32>
    %293 = arith.addf %255, %292 : vector<8x256xf32>
    %cst_127 = arith.constant dense<0.000000e+00> : vector<256xf32>
    %294 = vector.multi_reduction <add>, %293, %cst_127 [0] : vector<8x256xf32> to vector<256xf32>
    %295 = vector.shape_cast %294 : vector<256xf32> to vector<1x256xf32>
    %c0_128 = arith.constant 0 : index
    %c0_129 = arith.constant 0 : index
    %296 = vector.load %arg5[%c0_128, %c0_129] : memref<1x256xf32, #tpu.memory_space<vmem>>, vector<1x256xf32>
    %c0_130 = arith.constant 0 : index
    %297 = memref.load %arg6[%c0_130] : memref<2xf32, #tpu.memory_space<smem>>
    %298 = vector.broadcast %297 : f32 to vector<1x256xf32>
    %299 = arith.mulf %298, %7 : vector<1x256xf32>
    %300 = arith.addf %296, %299 : vector<1x256xf32>
    %c1_131 = arith.constant 1 : index
    %301 = memref.load %arg6[%c1_131] : memref<2xf32, #tpu.memory_space<smem>>
    %302 = vector.broadcast %301 : f32 to vector<1x256xf32>
    %303 = arith.mulf %302, %11 : vector<1x256xf32>
    %304 = arith.addf %300, %303 : vector<1x256xf32>
    %305 = arith.addf %304, %295 : vector<1x256xf32>
    %c0_132 = arith.constant 0 : index
    %c0_133 = arith.constant 0 : index
    %c0_134 = arith.constant 0 : index
    %306 = vector.load %arg2[%c0_132, %c0_133, %c0_134] : memref<1x8x256xf32, #tpu.memory_space<vmem>>, vector<1x8x256xf32>
    %307 = vector.shape_cast %306 : vector<1x8x256xf32> to vector<8x256xf32>
    %cst_135 = arith.constant dense<0xFF800000> : vector<256xf32>
    %308 = vector.multi_reduction <maximumf>, %307, %cst_135 [0] : vector<8x256xf32> to vector<256xf32>
    %309 = vector.shape_cast %308 : vector<256xf32> to vector<1x256xf32>
    %cst_136 = arith.constant dense<0.000000e+00> : vector<256xf32>
    %310 = vector.multi_reduction <add>, %307, %cst_136 [0] : vector<8x256xf32> to vector<256xf32>
    %311 = vector.shape_cast %310 : vector<256xf32> to vector<1x256xf32>
    %cst_137 = arith.constant 8.000000e+00 : f32
    %312 = vector.broadcast %cst_137 : f32 to vector<1x256xf32>
    %313 = arith.divf %311, %312 : vector<1x256xf32>
    %314 = vector.shape_cast %307 : vector<8x256xf32> to vector<1x8x256xf32>
    %cst_138 = arith.constant dense<0.000000e+00> : vector<1xf32>
    %315 = vector.multi_reduction <add>, %314, %cst_138 [1, 2] : vector<1x8x256xf32> to vector<1xf32>
    %316 = vector.shape_cast %315 : vector<1xf32> to vector<1x1x1xf32>
    %317 = vector.extract %316[0, 0, 0] : f32 from vector<1x1x1xf32>
    %318 = arith.mulf %307, %307 : vector<8x256xf32>
    %319 = vector.shape_cast %318 : vector<8x256xf32> to vector<1x8x256xf32>
    %cst_139 = arith.constant dense<0.000000e+00> : vector<1xf32>
    %320 = vector.multi_reduction <add>, %319, %cst_139 [1, 2] : vector<1x8x256xf32> to vector<1xf32>
    %321 = vector.shape_cast %320 : vector<1xf32> to vector<1x1x1xf32>
    %322 = vector.extract %321[0, 0, 0] : f32 from vector<1x1x1xf32>
    %cst_140 = arith.constant 2.048000e+03 : f32
    %323 = arith.divf %317, %cst_140 : f32
    %cst_141 = arith.constant 2.048000e+03 : f32
    %324 = arith.divf %322, %cst_141 : f32
    %325 = arith.mulf %323, %323 : f32
    %326 = arith.subf %324, %325 : f32
    %327 = vector.broadcast %323 : f32 to vector<8x256xf32>
    %328 = arith.subf %307, %327 : vector<8x256xf32>
    %cst_142 = arith.constant 9.99999974E-6 : f32
    %329 = arith.addf %326, %cst_142 : f32
    %330 = math.rsqrt %329 : f32
    %331 = vector.broadcast %330 : f32 to vector<8x256xf32>
    %332 = arith.mulf %328, %331 : vector<8x256xf32>
    %c0_143 = arith.constant 0 : index
    %c128_144 = arith.constant 128 : index
    %333 = vector.load %arg11[%c0_143, %c128_144] : memref<8x512xf32, #tpu.memory_space<vmem>>, vector<8x256xf32>
    tpu.vector_store %arg11[%c0_143, %c128_144], %332 {strides = array<i32>} : memref<8x512xf32, #tpu.memory_space<vmem>>, vector<8x256xf32>,
    %c0_145 = arith.constant 0 : index
    %c0_146 = arith.constant 0 : index
    %334 = vector.load %arg7[%c0_145, %c0_146] : memref<8x49xf32, #tpu.memory_space<vmem>>, vector<8x1xf32>
    %c0_147 = arith.constant 0 : index
    %c77_148 = arith.constant 77 : index
    %335 = vector.load %arg11[%c0_147, %c77_148] : memref<8x512xf32, #tpu.memory_space<vmem>>, vector<8x256xf32>
    %336 = vector.broadcast %334 : vector<8x1xf32> to vector<8x256xf32>
    %337 = arith.mulf %336, %335 : vector<8x256xf32>
    %c0_149 = arith.constant 0 : index
    %c7_150 = arith.constant 7 : index
    %338 = vector.load %arg7[%c0_149, %c7_150] : memref<8x49xf32, #tpu.memory_space<vmem>>, vector<8x1xf32>
    %c0_151 = arith.constant 0 : index
    %c93_152 = arith.constant 93 : index
    %339 = vector.load %arg11[%c0_151, %c93_152] : memref<8x512xf32, #tpu.memory_space<vmem>>, vector<8x256xf32>
    %340 = vector.broadcast %338 : vector<8x1xf32> to vector<8x256xf32>
    %341 = arith.mulf %340, %339 : vector<8x256xf32>
    %342 = arith.addf %337, %341 : vector<8x256xf32>
    %c0_153 = arith.constant 0 : index
    %c14_154 = arith.constant 14 : index
    %343 = vector.load %arg7[%c0_153, %c14_154] : memref<8x49xf32, #tpu.memory_space<vmem>>, vector<8x1xf32>
    %c0_155 = arith.constant 0 : index
    %c109_156 = arith.constant 109 : index
    %344 = vector.load %arg11[%c0_155, %c109_156] : memref<8x512xf32, #tpu.memory_space<vmem>>, vector<8x256xf32>
    %345 = vector.broadcast %343 : vector<8x1xf32> to vector<8x256xf32>
    %346 = arith.mulf %345, %344 : vector<8x256xf32>
    %347 = arith.addf %342, %346 : vector<8x256xf32>
    %c0_157 = arith.constant 0 : index
    %c21_158 = arith.constant 21 : index
    %348 = vector.load %arg7[%c0_157, %c21_158] : memref<8x49xf32, #tpu.memory_space<vmem>>, vector<8x1xf32>
    %c0_159 = arith.constant 0 : index
    %c125_160 = arith.constant 125 : index
    %349 = vector.load %arg11[%c0_159, %c125_160] : memref<8x512xf32, #tpu.memory_space<vmem>>, vector<8x256xf32>
    %350 = vector.broadcast %348 : vector<8x1xf32> to vector<8x256xf32>
    %351 = arith.mulf %350, %349 : vector<8x256xf32>
    %352 = arith.addf %347, %351 : vector<8x256xf32>
    %c0_161 = arith.constant 0 : index
    %c28_162 = arith.constant 28 : index
    %353 = vector.load %arg7[%c0_161, %c28_162] : memref<8x49xf32, #tpu.memory_space<vmem>>, vector<8x1xf32>
    %c0_163 = arith.constant 0 : index
    %c141_164 = arith.constant 141 : index
    %354 = vector.load %arg11[%c0_163, %c141_164] : memref<8x512xf32, #tpu.memory_space<vmem>>, vector<8x256xf32>
    %355 = vector.broadcast %353 : vector<8x1xf32> to vector<8x256xf32>
    %356 = arith.mulf %355, %354 : vector<8x256xf32>
    %357 = arith.addf %352, %356 : vector<8x256xf32>
    %c0_165 = arith.constant 0 : index
    %c35_166 = arith.constant 35 : index
    %358 = vector.load %arg7[%c0_165, %c35_166] : memref<8x49xf32, #tpu.memory_space<vmem>>, vector<8x1xf32>
    %c0_167 = arith.constant 0 : index
    %c157_168 = arith.constant 157 : index
    %359 = vector.load %arg11[%c0_167, %c157_168] : memref<8x512xf32, #tpu.memory_space<vmem>>, vector<8x256xf32>
    %360 = vector.broadcast %358 : vector<8x1xf32> to vector<8x256xf32>
    %361 = arith.mulf %360, %359 : vector<8x256xf32>
    %362 = arith.addf %357, %361 : vector<8x256xf32>
    %c0_169 = arith.constant 0 : index
    %c42_170 = arith.constant 42 : index
    %363 = vector.load %arg7[%c0_169, %c42_170] : memref<8x49xf32, #tpu.memory_space<vmem>>, vector<8x1xf32>
    %c0_171 = arith.constant 0 : index
    %c173_172 = arith.constant 173 : index
    %364 = vector.load %arg11[%c0_171, %c173_172] : memref<8x512xf32, #tpu.memory_space<vmem>>, vector<8x256xf32>
    %365 = vector.broadcast %363 : vector<8x1xf32> to vector<8x256xf32>
    %366 = arith.mulf %365, %364 : vector<8x256xf32>
    %367 = arith.addf %362, %366 : vector<8x256xf32>
    %c0_173 = arith.constant 0 : index
    %c0_174 = arith.constant 0 : index
    %368 = vector.load %arg3[%c0_173, %c0_174] : memref<7x256xf32, #tpu.memory_space<vmem>>, vector<1x256xf32>
    %369 = vector.broadcast %368 : vector<1x256xf32> to vector<8x256xf32>
    %370 = arith.mulf %369, %367 : vector<8x256xf32>
    %c0_175 = arith.constant 0 : index
    %c1_176 = arith.constant 1 : index
    %371 = vector.load %arg7[%c0_175, %c1_176] : memref<8x49xf32, #tpu.memory_space<vmem>>, vector<8x1xf32>
    %c0_177 = arith.constant 0 : index
    %c78_178 = arith.constant 78 : index
    %372 = vector.load %arg11[%c0_177, %c78_178] : memref<8x512xf32, #tpu.memory_space<vmem>>, vector<8x256xf32>
    %373 = vector.broadcast %371 : vector<8x1xf32> to vector<8x256xf32>
    %374 = arith.mulf %373, %372 : vector<8x256xf32>
    %c0_179 = arith.constant 0 : index
    %c8_180 = arith.constant 8 : index
    %375 = vector.load %arg7[%c0_179, %c8_180] : memref<8x49xf32, #tpu.memory_space<vmem>>, vector<8x1xf32>
    %c0_181 = arith.constant 0 : index
    %c94_182 = arith.constant 94 : index
    %376 = vector.load %arg11[%c0_181, %c94_182] : memref<8x512xf32, #tpu.memory_space<vmem>>, vector<8x256xf32>
    %377 = vector.broadcast %375 : vector<8x1xf32> to vector<8x256xf32>
    %378 = arith.mulf %377, %376 : vector<8x256xf32>
    %379 = arith.addf %374, %378 : vector<8x256xf32>
    %c0_183 = arith.constant 0 : index
    %c15_184 = arith.constant 15 : index
    %380 = vector.load %arg7[%c0_183, %c15_184] : memref<8x49xf32, #tpu.memory_space<vmem>>, vector<8x1xf32>
    %c0_185 = arith.constant 0 : index
    %c110_186 = arith.constant 110 : index
    %381 = vector.load %arg11[%c0_185, %c110_186] : memref<8x512xf32, #tpu.memory_space<vmem>>, vector<8x256xf32>
    %382 = vector.broadcast %380 : vector<8x1xf32> to vector<8x256xf32>
    %383 = arith.mulf %382, %381 : vector<8x256xf32>
    %384 = arith.addf %379, %383 : vector<8x256xf32>
    %c0_187 = arith.constant 0 : index
    %c22_188 = arith.constant 22 : index
    %385 = vector.load %arg7[%c0_187, %c22_188] : memref<8x49xf32, #tpu.memory_space<vmem>>, vector<8x1xf32>
    %c0_189 = arith.constant 0 : index
    %c126_190 = arith.constant 126 : index
    %386 = vector.load %arg11[%c0_189, %c126_190] : memref<8x512xf32, #tpu.memory_space<vmem>>, vector<8x256xf32>
    %387 = vector.broadcast %385 : vector<8x1xf32> to vector<8x256xf32>
    %388 = arith.mulf %387, %386 : vector<8x256xf32>
    %389 = arith.addf %384, %388 : vector<8x256xf32>
    %c0_191 = arith.constant 0 : index
    %c29_192 = arith.constant 29 : index
    %390 = vector.load %arg7[%c0_191, %c29_192] : memref<8x49xf32, #tpu.memory_space<vmem>>, vector<8x1xf32>
    %c0_193 = arith.constant 0 : index
    %c142_194 = arith.constant 142 : index
    %391 = vector.load %arg11[%c0_193, %c142_194] : memref<8x512xf32, #tpu.memory_space<vmem>>, vector<8x256xf32>
    %392 = vector.broadcast %390 : vector<8x1xf32> to vector<8x256xf32>
    %393 = arith.mulf %392, %391 : vector<8x256xf32>
    %394 = arith.addf %389, %393 : vector<8x256xf32>
    %c0_195 = arith.constant 0 : index
    %c36_196 = arith.constant 36 : index
    %395 = vector.load %arg7[%c0_195, %c36_196] : memref<8x49xf32, #tpu.memory_space<vmem>>, vector<8x1xf32>
    %c0_197 = arith.constant 0 : index
    %c158_198 = arith.constant 158 : index
    %396 = vector.load %arg11[%c0_197, %c158_198] : memref<8x512xf32, #tpu.memory_space<vmem>>, vector<8x256xf32>
    %397 = vector.broadcast %395 : vector<8x1xf32> to vector<8x256xf32>
    %398 = arith.mulf %397, %396 : vector<8x256xf32>
    %399 = arith.addf %394, %398 : vector<8x256xf32>
    %c0_199 = arith.constant 0 : index
    %c43_200 = arith.constant 43 : index
    %400 = vector.load %arg7[%c0_199, %c43_200] : memref<8x49xf32, #tpu.memory_space<vmem>>, vector<8x1xf32>
    %c0_201 = arith.constant 0 : index
    %c174_202 = arith.constant 174 : index
    %401 = vector.load %arg11[%c0_201, %c174_202] : memref<8x512xf32, #tpu.memory_space<vmem>>, vector<8x256xf32>
    %402 = vector.broadcast %400 : vector<8x1xf32> to vector<8x256xf32>
    %403 = arith.mulf %402, %401 : vector<8x256xf32>
    %404 = arith.addf %399, %403 : vector<8x256xf32>
    %c1_203 = arith.constant 1 : index
    %c0_204 = arith.constant 0 : index
    %405 = vector.load %arg3[%c1_203, %c0_204] : memref<7x256xf32, #tpu.memory_space<vmem>>, vector<1x256xf32>
    %406 = vector.broadcast %405 : vector<1x256xf32> to vector<8x256xf32>
    %407 = arith.mulf %406, %404 : vector<8x256xf32>
    %408 = arith.addf %370, %407 : vector<8x256xf32>
    %c0_205 = arith.constant 0 : index
    %c2_206 = arith.constant 2 : index
    %409 = vector.load %arg7[%c0_205, %c2_206] : memref<8x49xf32, #tpu.memory_space<vmem>>, vector<8x1xf32>
    %c0_207 = arith.constant 0 : index
    %c79_208 = arith.constant 79 : index
    %410 = vector.load %arg11[%c0_207, %c79_208] : memref<8x512xf32, #tpu.memory_space<vmem>>, vector<8x256xf32>
    %411 = vector.broadcast %409 : vector<8x1xf32> to vector<8x256xf32>
    %412 = arith.mulf %411, %410 : vector<8x256xf32>
    %c0_209 = arith.constant 0 : index
    %c9_210 = arith.constant 9 : index
    %413 = vector.load %arg7[%c0_209, %c9_210] : memref<8x49xf32, #tpu.memory_space<vmem>>, vector<8x1xf32>
    %c0_211 = arith.constant 0 : index
    %c95_212 = arith.constant 95 : index
    %414 = vector.load %arg11[%c0_211, %c95_212] : memref<8x512xf32, #tpu.memory_space<vmem>>, vector<8x256xf32>
    %415 = vector.broadcast %413 : vector<8x1xf32> to vector<8x256xf32>
    %416 = arith.mulf %415, %414 : vector<8x256xf32>
    %417 = arith.addf %412, %416 : vector<8x256xf32>
    %c0_213 = arith.constant 0 : index
    %c16_214 = arith.constant 16 : index
    %418 = vector.load %arg7[%c0_213, %c16_214] : memref<8x49xf32, #tpu.memory_space<vmem>>, vector<8x1xf32>
    %c0_215 = arith.constant 0 : index
    %c111_216 = arith.constant 111 : index
    %419 = vector.load %arg11[%c0_215, %c111_216] : memref<8x512xf32, #tpu.memory_space<vmem>>, vector<8x256xf32>
    %420 = vector.broadcast %418 : vector<8x1xf32> to vector<8x256xf32>
    %421 = arith.mulf %420, %419 : vector<8x256xf32>
    %422 = arith.addf %417, %421 : vector<8x256xf32>
    %c0_217 = arith.constant 0 : index
    %c23_218 = arith.constant 23 : index
    %423 = vector.load %arg7[%c0_217, %c23_218] : memref<8x49xf32, #tpu.memory_space<vmem>>, vector<8x1xf32>
    %c0_219 = arith.constant 0 : index
    %c127_220 = arith.constant 127 : index
    %424 = vector.load %arg11[%c0_219, %c127_220] : memref<8x512xf32, #tpu.memory_space<vmem>>, vector<8x256xf32>
    %425 = vector.broadcast %423 : vector<8x1xf32> to vector<8x256xf32>
    %426 = arith.mulf %425, %424 : vector<8x256xf32>
    %427 = arith.addf %422, %426 : vector<8x256xf32>
    %c0_221 = arith.constant 0 : index
    %c30_222 = arith.constant 30 : index
    %428 = vector.load %arg7[%c0_221, %c30_222] : memref<8x49xf32, #tpu.memory_space<vmem>>, vector<8x1xf32>
    %c0_223 = arith.constant 0 : index
    %c143_224 = arith.constant 143 : index
    %429 = vector.load %arg11[%c0_223, %c143_224] : memref<8x512xf32, #tpu.memory_space<vmem>>, vector<8x256xf32>
    %430 = vector.broadcast %428 : vector<8x1xf32> to vector<8x256xf32>
    %431 = arith.mulf %430, %429 : vector<8x256xf32>
    %432 = arith.addf %427, %431 : vector<8x256xf32>
    %c0_225 = arith.constant 0 : index
    %c37_226 = arith.constant 37 : index
    %433 = vector.load %arg7[%c0_225, %c37_226] : memref<8x49xf32, #tpu.memory_space<vmem>>, vector<8x1xf32>
    %c0_227 = arith.constant 0 : index
    %c159_228 = arith.constant 159 : index
    %434 = vector.load %arg11[%c0_227, %c159_228] : memref<8x512xf32, #tpu.memory_space<vmem>>, vector<8x256xf32>
    %435 = vector.broadcast %433 : vector<8x1xf32> to vector<8x256xf32>
    %436 = arith.mulf %435, %434 : vector<8x256xf32>
    %437 = arith.addf %432, %436 : vector<8x256xf32>
    %c0_229 = arith.constant 0 : index
    %c44_230 = arith.constant 44 : index
    %438 = vector.load %arg7[%c0_229, %c44_230] : memref<8x49xf32, #tpu.memory_space<vmem>>, vector<8x1xf32>
    %c0_231 = arith.constant 0 : index
    %c175_232 = arith.constant 175 : index
    %439 = vector.load %arg11[%c0_231, %c175_232] : memref<8x512xf32, #tpu.memory_space<vmem>>, vector<8x256xf32>
    %440 = vector.broadcast %438 : vector<8x1xf32> to vector<8x256xf32>
    %441 = arith.mulf %440, %439 : vector<8x256xf32>
    %442 = arith.addf %437, %441 : vector<8x256xf32>
    %c2_233 = arith.constant 2 : index
    %c0_234 = arith.constant 0 : index
    %443 = vector.load %arg3[%c2_233, %c0_234] : memref<7x256xf32, #tpu.memory_space<vmem>>, vector<1x256xf32>
    %444 = vector.broadcast %443 : vector<1x256xf32> to vector<8x256xf32>
    %445 = arith.mulf %444, %442 : vector<8x256xf32>
    %446 = arith.addf %408, %445 : vector<8x256xf32>
    %c0_235 = arith.constant 0 : index
    %c3_236 = arith.constant 3 : index
    %447 = vector.load %arg7[%c0_235, %c3_236] : memref<8x49xf32, #tpu.memory_space<vmem>>, vector<8x1xf32>
    %c0_237 = arith.constant 0 : index
    %c80_238 = arith.constant 80 : index
    %448 = vector.load %arg11[%c0_237, %c80_238] : memref<8x512xf32, #tpu.memory_space<vmem>>, vector<8x256xf32>
    %449 = vector.broadcast %447 : vector<8x1xf32> to vector<8x256xf32>
    %450 = arith.mulf %449, %448 : vector<8x256xf32>
    %c0_239 = arith.constant 0 : index
    %c10_240 = arith.constant 10 : index
    %451 = vector.load %arg7[%c0_239, %c10_240] : memref<8x49xf32, #tpu.memory_space<vmem>>, vector<8x1xf32>
    %c0_241 = arith.constant 0 : index
    %c96_242 = arith.constant 96 : index
    %452 = vector.load %arg11[%c0_241, %c96_242] : memref<8x512xf32, #tpu.memory_space<vmem>>, vector<8x256xf32>
    %453 = vector.broadcast %451 : vector<8x1xf32> to vector<8x256xf32>
    %454 = arith.mulf %453, %452 : vector<8x256xf32>
    %455 = arith.addf %450, %454 : vector<8x256xf32>
    %c0_243 = arith.constant 0 : index
    %c17_244 = arith.constant 17 : index
    %456 = vector.load %arg7[%c0_243, %c17_244] : memref<8x49xf32, #tpu.memory_space<vmem>>, vector<8x1xf32>
    %c0_245 = arith.constant 0 : index
    %c112_246 = arith.constant 112 : index
    %457 = vector.load %arg11[%c0_245, %c112_246] : memref<8x512xf32, #tpu.memory_space<vmem>>, vector<8x256xf32>
    %458 = vector.broadcast %456 : vector<8x1xf32> to vector<8x256xf32>
    %459 = arith.mulf %458, %457 : vector<8x256xf32>
    %460 = arith.addf %455, %459 : vector<8x256xf32>
    %c0_247 = arith.constant 0 : index
    %c24_248 = arith.constant 24 : index
    %461 = vector.load %arg7[%c0_247, %c24_248] : memref<8x49xf32, #tpu.memory_space<vmem>>, vector<8x1xf32>
    %c0_249 = arith.constant 0 : index
    %c128_250 = arith.constant 128 : index
    %462 = vector.load %arg11[%c0_249, %c128_250] : memref<8x512xf32, #tpu.memory_space<vmem>>, vector<8x256xf32>
    %463 = vector.broadcast %461 : vector<8x1xf32> to vector<8x256xf32>
    %464 = arith.mulf %463, %462 : vector<8x256xf32>
    %465 = arith.addf %460, %464 : vector<8x256xf32>
    %c0_251 = arith.constant 0 : index
    %c31_252 = arith.constant 31 : index
    %466 = vector.load %arg7[%c0_251, %c31_252] : memref<8x49xf32, #tpu.memory_space<vmem>>, vector<8x1xf32>
    %c0_253 = arith.constant 0 : index
    %c144_254 = arith.constant 144 : index
    %467 = vector.load %arg11[%c0_253, %c144_254] : memref<8x512xf32, #tpu.memory_space<vmem>>, vector<8x256xf32>
    %468 = vector.broadcast %466 : vector<8x1xf32> to vector<8x256xf32>
    %469 = arith.mulf %468, %467 : vector<8x256xf32>
    %470 = arith.addf %465, %469 : vector<8x256xf32>
    %c0_255 = arith.constant 0 : index
    %c38_256 = arith.constant 38 : index
    %471 = vector.load %arg7[%c0_255, %c38_256] : memref<8x49xf32, #tpu.memory_space<vmem>>, vector<8x1xf32>
    %c0_257 = arith.constant 0 : index
    %c160_258 = arith.constant 160 : index
    %472 = vector.load %arg11[%c0_257, %c160_258] : memref<8x512xf32, #tpu.memory_space<vmem>>, vector<8x256xf32>
    %473 = vector.broadcast %471 : vector<8x1xf32> to vector<8x256xf32>
    %474 = arith.mulf %473, %472 : vector<8x256xf32>
    %475 = arith.addf %470, %474 : vector<8x256xf32>
    %c0_259 = arith.constant 0 : index
    %c45_260 = arith.constant 45 : index
    %476 = vector.load %arg7[%c0_259, %c45_260] : memref<8x49xf32, #tpu.memory_space<vmem>>, vector<8x1xf32>
    %c0_261 = arith.constant 0 : index
    %c176_262 = arith.constant 176 : index
    %477 = vector.load %arg11[%c0_261, %c176_262] : memref<8x512xf32, #tpu.memory_space<vmem>>, vector<8x256xf32>
    %478 = vector.broadcast %476 : vector<8x1xf32> to vector<8x256xf32>
    %479 = arith.mulf %478, %477 : vector<8x256xf32>
    %480 = arith.addf %475, %479 : vector<8x256xf32>
    %481 = arith.addf %446, %480 : vector<8x256xf32>
    %c0_263 = arith.constant 0 : index
    %c4_264 = arith.constant 4 : index
    %482 = vector.load %arg7[%c0_263, %c4_264] : memref<8x49xf32, #tpu.memory_space<vmem>>, vector<8x1xf32>
    %c0_265 = arith.constant 0 : index
    %c81_266 = arith.constant 81 : index
    %483 = vector.load %arg11[%c0_265, %c81_266] : memref<8x512xf32, #tpu.memory_space<vmem>>, vector<8x256xf32>
    %484 = vector.broadcast %482 : vector<8x1xf32> to vector<8x256xf32>
    %485 = arith.mulf %484, %483 : vector<8x256xf32>
    %c0_267 = arith.constant 0 : index
    %c11_268 = arith.constant 11 : index
    %486 = vector.load %arg7[%c0_267, %c11_268] : memref<8x49xf32, #tpu.memory_space<vmem>>, vector<8x1xf32>
    %c0_269 = arith.constant 0 : index
    %c97_270 = arith.constant 97 : index
    %487 = vector.load %arg11[%c0_269, %c97_270] : memref<8x512xf32, #tpu.memory_space<vmem>>, vector<8x256xf32>
    %488 = vector.broadcast %486 : vector<8x1xf32> to vector<8x256xf32>
    %489 = arith.mulf %488, %487 : vector<8x256xf32>
    %490 = arith.addf %485, %489 : vector<8x256xf32>
    %c0_271 = arith.constant 0 : index
    %c18_272 = arith.constant 18 : index
    %491 = vector.load %arg7[%c0_271, %c18_272] : memref<8x49xf32, #tpu.memory_space<vmem>>, vector<8x1xf32>
    %c0_273 = arith.constant 0 : index
    %c113_274 = arith.constant 113 : index
    %492 = vector.load %arg11[%c0_273, %c113_274] : memref<8x512xf32, #tpu.memory_space<vmem>>, vector<8x256xf32>
    %493 = vector.broadcast %491 : vector<8x1xf32> to vector<8x256xf32>
    %494 = arith.mulf %493, %492 : vector<8x256xf32>
    %495 = arith.addf %490, %494 : vector<8x256xf32>
    %c0_275 = arith.constant 0 : index
    %c25_276 = arith.constant 25 : index
    %496 = vector.load %arg7[%c0_275, %c25_276] : memref<8x49xf32, #tpu.memory_space<vmem>>, vector<8x1xf32>
    %c0_277 = arith.constant 0 : index
    %c129_278 = arith.constant 129 : index
    %497 = vector.load %arg11[%c0_277, %c129_278] : memref<8x512xf32, #tpu.memory_space<vmem>>, vector<8x256xf32>
    %498 = vector.broadcast %496 : vector<8x1xf32> to vector<8x256xf32>
    %499 = arith.mulf %498, %497 : vector<8x256xf32>
    %500 = arith.addf %495, %499 : vector<8x256xf32>
    %c0_279 = arith.constant 0 : index
    %c32_280 = arith.constant 32 : index
    %501 = vector.load %arg7[%c0_279, %c32_280] : memref<8x49xf32, #tpu.memory_space<vmem>>, vector<8x1xf32>
    %c0_281 = arith.constant 0 : index
    %c145_282 = arith.constant 145 : index
    %502 = vector.load %arg11[%c0_281, %c145_282] : memref<8x512xf32, #tpu.memory_space<vmem>>, vector<8x256xf32>
    %503 = vector.broadcast %501 : vector<8x1xf32> to vector<8x256xf32>
    %504 = arith.mulf %503, %502 : vector<8x256xf32>
    %505 = arith.addf %500, %504 : vector<8x256xf32>
    %c0_283 = arith.constant 0 : index
    %c39_284 = arith.constant 39 : index
    %506 = vector.load %arg7[%c0_283, %c39_284] : memref<8x49xf32, #tpu.memory_space<vmem>>, vector<8x1xf32>
    %c0_285 = arith.constant 0 : index
    %c161_286 = arith.constant 161 : index
    %507 = vector.load %arg11[%c0_285, %c161_286] : memref<8x512xf32, #tpu.memory_space<vmem>>, vector<8x256xf32>
    %508 = vector.broadcast %506 : vector<8x1xf32> to vector<8x256xf32>
    %509 = arith.mulf %508, %507 : vector<8x256xf32>
    %510 = arith.addf %505, %509 : vector<8x256xf32>
    %c0_287 = arith.constant 0 : index
    %c46_288 = arith.constant 46 : index
    %511 = vector.load %arg7[%c0_287, %c46_288] : memref<8x49xf32, #tpu.memory_space<vmem>>, vector<8x1xf32>
    %c0_289 = arith.constant 0 : index
    %c177_290 = arith.constant 177 : index
    %512 = vector.load %arg11[%c0_289, %c177_290] : memref<8x512xf32, #tpu.memory_space<vmem>>, vector<8x256xf32>
    %513 = vector.broadcast %511 : vector<8x1xf32> to vector<8x256xf32>
    %514 = arith.mulf %513, %512 : vector<8x256xf32>
    %515 = arith.addf %510, %514 : vector<8x256xf32>
    %c4_291 = arith.constant 4 : index
    %c0_292 = arith.constant 0 : index
    %516 = vector.load %arg3[%c4_291, %c0_292] : memref<7x256xf32, #tpu.memory_space<vmem>>, vector<1x256xf32>
    %517 = vector.broadcast %516 : vector<1x256xf32> to vector<8x256xf32>
    %518 = arith.mulf %517, %515 : vector<8x256xf32>
    %519 = arith.addf %481, %518 : vector<8x256xf32>
    %c0_293 = arith.constant 0 : index
    %c5_294 = arith.constant 5 : index
    %520 = vector.load %arg7[%c0_293, %c5_294] : memref<8x49xf32, #tpu.memory_space<vmem>>, vector<8x1xf32>
    %c0_295 = arith.constant 0 : index
    %c82_296 = arith.constant 82 : index
    %521 = vector.load %arg11[%c0_295, %c82_296] : memref<8x512xf32, #tpu.memory_space<vmem>>, vector<8x256xf32>
    %522 = vector.broadcast %520 : vector<8x1xf32> to vector<8x256xf32>
    %523 = arith.mulf %522, %521 : vector<8x256xf32>
    %c0_297 = arith.constant 0 : index
    %c12_298 = arith.constant 12 : index
    %524 = vector.load %arg7[%c0_297, %c12_298] : memref<8x49xf32, #tpu.memory_space<vmem>>, vector<8x1xf32>
    %c0_299 = arith.constant 0 : index
    %c98_300 = arith.constant 98 : index
    %525 = vector.load %arg11[%c0_299, %c98_300] : memref<8x512xf32, #tpu.memory_space<vmem>>, vector<8x256xf32>
    %526 = vector.broadcast %524 : vector<8x1xf32> to vector<8x256xf32>
    %527 = arith.mulf %526, %525 : vector<8x256xf32>
    %528 = arith.addf %523, %527 : vector<8x256xf32>
    %c0_301 = arith.constant 0 : index
    %c19_302 = arith.constant 19 : index
    %529 = vector.load %arg7[%c0_301, %c19_302] : memref<8x49xf32, #tpu.memory_space<vmem>>, vector<8x1xf32>
    %c0_303 = arith.constant 0 : index
    %c114_304 = arith.constant 114 : index
    %530 = vector.load %arg11[%c0_303, %c114_304] : memref<8x512xf32, #tpu.memory_space<vmem>>, vector<8x256xf32>
    %531 = vector.broadcast %529 : vector<8x1xf32> to vector<8x256xf32>
    %532 = arith.mulf %531, %530 : vector<8x256xf32>
    %533 = arith.addf %528, %532 : vector<8x256xf32>
    %c0_305 = arith.constant 0 : index
    %c26_306 = arith.constant 26 : index
    %534 = vector.load %arg7[%c0_305, %c26_306] : memref<8x49xf32, #tpu.memory_space<vmem>>, vector<8x1xf32>
    %c0_307 = arith.constant 0 : index
    %c130_308 = arith.constant 130 : index
    %535 = vector.load %arg11[%c0_307, %c130_308] : memref<8x512xf32, #tpu.memory_space<vmem>>, vector<8x256xf32>
    %536 = vector.broadcast %534 : vector<8x1xf32> to vector<8x256xf32>
    %537 = arith.mulf %536, %535 : vector<8x256xf32>
    %538 = arith.addf %533, %537 : vector<8x256xf32>
    %c0_309 = arith.constant 0 : index
    %c33_310 = arith.constant 33 : index
    %539 = vector.load %arg7[%c0_309, %c33_310] : memref<8x49xf32, #tpu.memory_space<vmem>>, vector<8x1xf32>
    %c0_311 = arith.constant 0 : index
    %c146_312 = arith.constant 146 : index
    %540 = vector.load %arg11[%c0_311, %c146_312] : memref<8x512xf32, #tpu.memory_space<vmem>>, vector<8x256xf32>
    %541 = vector.broadcast %539 : vector<8x1xf32> to vector<8x256xf32>
    %542 = arith.mulf %541, %540 : vector<8x256xf32>
    %543 = arith.addf %538, %542 : vector<8x256xf32>
    %c0_313 = arith.constant 0 : index
    %c40_314 = arith.constant 40 : index
    %544 = vector.load %arg7[%c0_313, %c40_314] : memref<8x49xf32, #tpu.memory_space<vmem>>, vector<8x1xf32>
    %c0_315 = arith.constant 0 : index
    %c162_316 = arith.constant 162 : index
    %545 = vector.load %arg11[%c0_315, %c162_316] : memref<8x512xf32, #tpu.memory_space<vmem>>, vector<8x256xf32>
    %546 = vector.broadcast %544 : vector<8x1xf32> to vector<8x256xf32>
    %547 = arith.mulf %546, %545 : vector<8x256xf32>
    %548 = arith.addf %543, %547 : vector<8x256xf32>
    %c0_317 = arith.constant 0 : index
    %c47_318 = arith.constant 47 : index
    %549 = vector.load %arg7[%c0_317, %c47_318] : memref<8x49xf32, #tpu.memory_space<vmem>>, vector<8x1xf32>
    %c0_319 = arith.constant 0 : index
    %c178_320 = arith.constant 178 : index
    %550 = vector.load %arg11[%c0_319, %c178_320] : memref<8x512xf32, #tpu.memory_space<vmem>>, vector<8x256xf32>
    %551 = vector.broadcast %549 : vector<8x1xf32> to vector<8x256xf32>
    %552 = arith.mulf %551, %550 : vector<8x256xf32>
    %553 = arith.addf %548, %552 : vector<8x256xf32>
    %c5_321 = arith.constant 5 : index
    %c0_322 = arith.constant 0 : index
    %554 = vector.load %arg3[%c5_321, %c0_322] : memref<7x256xf32, #tpu.memory_space<vmem>>, vector<1x256xf32>
    %555 = vector.broadcast %554 : vector<1x256xf32> to vector<8x256xf32>
    %556 = arith.mulf %555, %553 : vector<8x256xf32>
    %557 = arith.addf %519, %556 : vector<8x256xf32>
    %c0_323 = arith.constant 0 : index
    %c6_324 = arith.constant 6 : index
    %558 = vector.load %arg7[%c0_323, %c6_324] : memref<8x49xf32, #tpu.memory_space<vmem>>, vector<8x1xf32>
    %c0_325 = arith.constant 0 : index
    %c83_326 = arith.constant 83 : index
    %559 = vector.load %arg11[%c0_325, %c83_326] : memref<8x512xf32, #tpu.memory_space<vmem>>, vector<8x256xf32>
    %560 = vector.broadcast %558 : vector<8x1xf32> to vector<8x256xf32>
    %561 = arith.mulf %560, %559 : vector<8x256xf32>
    %c0_327 = arith.constant 0 : index
    %c13_328 = arith.constant 13 : index
    %562 = vector.load %arg7[%c0_327, %c13_328] : memref<8x49xf32, #tpu.memory_space<vmem>>, vector<8x1xf32>
    %c0_329 = arith.constant 0 : index
    %c99_330 = arith.constant 99 : index
    %563 = vector.load %arg11[%c0_329, %c99_330] : memref<8x512xf32, #tpu.memory_space<vmem>>, vector<8x256xf32>
    %564 = vector.broadcast %562 : vector<8x1xf32> to vector<8x256xf32>
    %565 = arith.mulf %564, %563 : vector<8x256xf32>
    %566 = arith.addf %561, %565 : vector<8x256xf32>
    %c0_331 = arith.constant 0 : index
    %c20_332 = arith.constant 20 : index
    %567 = vector.load %arg7[%c0_331, %c20_332] : memref<8x49xf32, #tpu.memory_space<vmem>>, vector<8x1xf32>
    %c0_333 = arith.constant 0 : index
    %c115_334 = arith.constant 115 : index
    %568 = vector.load %arg11[%c0_333, %c115_334] : memref<8x512xf32, #tpu.memory_space<vmem>>, vector<8x256xf32>
    %569 = vector.broadcast %567 : vector<8x1xf32> to vector<8x256xf32>
    %570 = arith.mulf %569, %568 : vector<8x256xf32>
    %571 = arith.addf %566, %570 : vector<8x256xf32>
    %c0_335 = arith.constant 0 : index
    %c27_336 = arith.constant 27 : index
    %572 = vector.load %arg7[%c0_335, %c27_336] : memref<8x49xf32, #tpu.memory_space<vmem>>, vector<8x1xf32>
    %c0_337 = arith.constant 0 : index
    %c131_338 = arith.constant 131 : index
    %573 = vector.load %arg11[%c0_337, %c131_338] : memref<8x512xf32, #tpu.memory_space<vmem>>, vector<8x256xf32>
    %574 = vector.broadcast %572 : vector<8x1xf32> to vector<8x256xf32>
    %575 = arith.mulf %574, %573 : vector<8x256xf32>
    %576 = arith.addf %571, %575 : vector<8x256xf32>
    %c0_339 = arith.constant 0 : index
    %c34_340 = arith.constant 34 : index
    %577 = vector.load %arg7[%c0_339, %c34_340] : memref<8x49xf32, #tpu.memory_space<vmem>>, vector<8x1xf32>
    %c0_341 = arith.constant 0 : index
    %c147_342 = arith.constant 147 : index
    %578 = vector.load %arg11[%c0_341, %c147_342] : memref<8x512xf32, #tpu.memory_space<vmem>>, vector<8x256xf32>
    %579 = vector.broadcast %577 : vector<8x1xf32> to vector<8x256xf32>
    %580 = arith.mulf %579, %578 : vector<8x256xf32>
    %581 = arith.addf %576, %580 : vector<8x256xf32>
    %c0_343 = arith.constant 0 : index
    %c41_344 = arith.constant 41 : index
    %582 = vector.load %arg7[%c0_343, %c41_344] : memref<8x49xf32, #tpu.memory_space<vmem>>, vector<8x1xf32>
    %c0_345 = arith.constant 0 : index
    %c163_346 = arith.constant 163 : index
    %583 = vector.load %arg11[%c0_345, %c163_346] : memref<8x512xf32, #tpu.memory_space<vmem>>, vector<8x256xf32>
    %584 = vector.broadcast %582 : vector<8x1xf32> to vector<8x256xf32>
    %585 = arith.mulf %584, %583 : vector<8x256xf32>
    %586 = arith.addf %581, %585 : vector<8x256xf32>
    %c0_347 = arith.constant 0 : index
    %c48_348 = arith.constant 48 : index
    %587 = vector.load %arg7[%c0_347, %c48_348] : memref<8x49xf32, #tpu.memory_space<vmem>>, vector<8x1xf32>
    %c0_349 = arith.constant 0 : index
    %c179_350 = arith.constant 179 : index
    %588 = vector.load %arg11[%c0_349, %c179_350] : memref<8x512xf32, #tpu.memory_space<vmem>>, vector<8x256xf32>
    %589 = vector.broadcast %587 : vector<8x1xf32> to vector<8x256xf32>
    %590 = arith.mulf %589, %588 : vector<8x256xf32>
    %591 = arith.addf %586, %590 : vector<8x256xf32>
    %c6_351 = arith.constant 6 : index
    %c0_352 = arith.constant 0 : index
    %592 = vector.load %arg3[%c6_351, %c0_352] : memref<7x256xf32, #tpu.memory_space<vmem>>, vector<1x256xf32>
    %593 = vector.broadcast %592 : vector<1x256xf32> to vector<8x256xf32>
    %594 = arith.mulf %593, %591 : vector<8x256xf32>
    %595 = arith.addf %557, %594 : vector<8x256xf32>
    %cst_353 = arith.constant dense<0.000000e+00> : vector<256xf32>
    %596 = vector.multi_reduction <add>, %595, %cst_353 [0] : vector<8x256xf32> to vector<256xf32>
    %597 = vector.shape_cast %596 : vector<256xf32> to vector<1x256xf32>
    %c0_354 = arith.constant 0 : index
    %c0_355 = arith.constant 0 : index
    %598 = vector.load %arg8[%c0_354, %c0_355] : memref<1x256xf32, #tpu.memory_space<vmem>>, vector<1x256xf32>
    %c0_356 = arith.constant 0 : index
    %599 = memref.load %arg9[%c0_356] : memref<2xf32, #tpu.memory_space<smem>>
    %600 = vector.broadcast %599 : f32 to vector<1x256xf32>
    %601 = arith.mulf %600, %309 : vector<1x256xf32>
    %602 = arith.addf %598, %601 : vector<1x256xf32>
    %c1_357 = arith.constant 1 : index
    %603 = memref.load %arg9[%c1_357] : memref<2xf32, #tpu.memory_space<smem>>
    %604 = vector.broadcast %603 : f32 to vector<1x256xf32>
    %605 = arith.mulf %604, %313 : vector<1x256xf32>
    %606 = arith.addf %602, %605 : vector<1x256xf32>
    %607 = arith.addf %606, %597 : vector<1x256xf32>
    %608 = arith.addf %305, %607 : vector<1x256xf32>
    %609 = arith.negf %608 : vector<1x256xf32>
    %610 = math.exp %609 : vector<1x256xf32>
    %cst_358 = arith.constant 1.000000e+00 : f32
    %611 = vector.broadcast %cst_358 : f32 to vector<1x256xf32>
    %612 = arith.addf %611, %610 : vector<1x256xf32>
    %613 = arith.divf %611, %612 : vector<1x256xf32>
    %c0_359 = arith.constant 0 : index
    %c0_360 = arith.constant 0 : index
    %c0_361 = arith.constant 0 : index
    %614 = vector.load %arg1[%c0_359, %c0_360, %c0_361] : memref<1x8x256xf32, #tpu.memory_space<vmem>>, vector<1x8x256xf32>
    %615 = vector.shape_cast %614 : vector<1x8x256xf32> to vector<8x256xf32>
    %616 = vector.broadcast %613 : vector<1x256xf32> to vector<8x256xf32>
    %617 = arith.mulf %615, %616 : vector<8x256xf32>
    %c0_362 = arith.constant 0 : index
    %c0_363 = arith.constant 0 : index
    %c0_364 = arith.constant 0 : index
    %618 = vector.load %arg10[%c0_362, %c0_363, %c0_364] : memref<1x8x256xf32, #tpu.memory_space<vmem>>, vector<1x8x256xf32>
    %619 = vector.shape_cast %618 : vector<1x8x256xf32> to vector<8x256xf32>
    %620 = vector.shape_cast %617 : vector<8x256xf32> to vector<1x8x256xf32>
    tpu.vector_store %arg10[%c0_362, %c0_363, %c0_364], %620 {strides = array<i32>} : memref<1x8x256xf32, #tpu.memory_space<vmem>>, vector<1x8x256xf32>,
    return
  }
  func.func @transform_0(%arg0: i32) -> (i32, i32, i32) {
    %c0_i32 = arith.constant 0 : i32
    %c0_i32_0 = arith.constant 0 : i32
    %c0_i32_1 = arith.constant 0 : i32
    return %arg0, %c0_i32, %c0_i32_0 : i32, i32, i32
  }
  func.func @transform_1(%arg0: i32) -> (i32, i32, i32) {
    %c0_i32 = arith.constant 0 : i32
    %c0_i32_0 = arith.constant 0 : i32
    %c0_i32_1 = arith.constant 0 : i32
    return %arg0, %c0_i32, %c0_i32_0 : i32, i32, i32
  }
  func.func @transform_2(%arg0: i32) -> (i32, i32) {
    %c0_i32 = arith.constant 0 : i32
    %c0_i32_0 = arith.constant 0 : i32
    %c0_i32_1 = arith.constant 0 : i32
    return %c0_i32, %c0_i32_0 : i32, i32
  }
  func.func @transform_3(%arg0: i32) -> (i32, i32) {
    %c0_i32 = arith.constant 0 : i32
    %c0_i32_0 = arith.constant 0 : i32
    %c0_i32_1 = arith.constant 0 : i32
    return %c0_i32, %c0_i32_0 : i32, i32
  }
  func.func @transform_4(%arg0: i32) -> (i32, i32) {
    %c0_i32 = arith.constant 0 : i32
    %c0_i32_0 = arith.constant 0 : i32
    %c0_i32_1 = arith.constant 0 : i32
    return %c0_i32, %c0_i32_0 : i32, i32
  }
  func.func @transform_5(%arg0: i32) -> i32 {
    %c0_i32 = arith.constant 0 : i32
    %c0_i32_0 = arith.constant 0 : i32
    return %c0_i32 : i32
  }
  func.func @transform_6(%arg0: i32) -> (i32, i32) {
    %c0_i32 = arith.constant 0 : i32
    %c0_i32_0 = arith.constant 0 : i32
    %c0_i32_1 = arith.constant 0 : i32
    return %c0_i32, %c0_i32_0 : i32, i32
  }
  func.func @transform_7(%arg0: i32) -> (i32, i32) {
    %c0_i32 = arith.constant 0 : i32
    %c0_i32_0 = arith.constant 0 : i32
    %c0_i32_1 = arith.constant 0 : i32
    return %c0_i32, %c0_i32_0 : i32, i32
  }
  func.func @transform_8(%arg0: i32) -> i32 {
    %c0_i32 = arith.constant 0 : i32
    %c0_i32_0 = arith.constant 0 : i32
    return %c0_i32 : i32
  }
  func.func @transform_9(%arg0: i32) -> (i32, i32, i32) {
    %c0_i32 = arith.constant 0 : i32
    %c0_i32_0 = arith.constant 0 : i32
    %c0_i32_1 = arith.constant 0 : i32
    return %arg0, %c0_i32, %c0_i32_0 : i32, i32, i32
  }
}

</mosaic_0001>

<bundles_post_ra>
// kernel: tpu_custom_call.1
= control target key start
LH: loop header
LB: loop body
LE: loop exit
PB: predicated region body
PF: predicated region fallthrough
CT: control target
= control target key end

     0   :  { %s6477_s0 = inlined_call_operand.hbm [shape: f32[2,8,256], index: 0, kind: input, shape index: {}]   ;;  %s6478_s1 = inlined_call_operand.hbm [shape: f32[2,8,256], index: 1, kind: input, shape index: {}]   ;;  %s6479_s2 = inlined_call_operand.hbm [shape: f32[7,256], index: 2, kind: input, shape index: {}]   ;;  %s6480_s3 = inlined_call_operand.hbm [shape: f32[8,49], index: 3, kind: input, shape index: {}]   ;;  %s6481_s4 = inlined_call_operand.hbm [shape: f32[1,256], index: 4, kind: input, shape index: {}]   ;;  %s6482_s5 = inlined_call_operand.hbm [shape: f32[2], index: 5, kind: input, shape index: {}]   ;;  %s6483_s6 = inlined_call_operand.hbm [shape: f32[8,49], index: 6, kind: input, shape index: {}]   ;;  %s6484_s7 = inlined_call_operand.hbm [shape: f32[1,256], index: 7, kind: input, shape index: {}]   ;;  %s6485_s8 = inlined_call_operand.hbm [shape: f32[2], index: 8, kind: input, shape index: {}]   ;;  %s6486_s9 = inlined_call_operand.hbm [shape: f32[2,8,256], index: 9, kind: output, shape index: {}]  }
   0x1   :  { %6622 = sst [smem:[#allocation112_spill]] %s6479_s2 }
   0x2   :  { %6623 = sst [smem:[#allocation113_spill]] %s6480_s3 }
   0x3   :  { %6624 = sst [smem:[#allocation114_spill]] %s6481_s4 }
   0x4   :  { %6625 = sst [smem:[#allocation115_spill]] %s6482_s5 }
   0x5   :  { %6626 = sst [smem:[#allocation116_spill]] %s6483_s6 }
   0x6   :  { %6627 = sst [smem:[#allocation117_spill]] %s6484_s7 }
   0x7   :  { %14 = vsyncpa [#allocation4], 0 }
   0x8   :  { %16 = vsyncpa [#allocation4 + $0x1], 0 }
   0x9   :  { %17 = vsyncpa [#allocation8], 0 }
   0xa   :  { %19 = vsyncpa [#allocation8 + $0x1], 0 }
   0xb   :  { %20 = vsyncpa [#allocation11], 0 }
   0xc   :  { %21 = vsyncpa [#allocation6], 0 }
   0xd   :  { %22 = vsyncpa [#allocation15], 0 }
   0xe   :  { %23 = vsyncpa [#allocation18], 0 }
   0xf   :  { %24 = vsyncpa [#allocation5], 0 }
  0x10   :  { %26 = vsyncpa [#allocation5 + $0x1], 0  ;;  %s4269_s30 = smov 0   ;;  %s4271_s10 = smov 0  }
  0x11   :  { %s4273_s11 = smov 0   ;;  %s4275_s12 = smov 0  }
  0x12 LB: > { %s4147_s13 = smov [#allocation9]   ;;  %s4290_s15 = sadd.s32 4294967295, %s4145_s12   ;;  %s4145_s12 = sphi %s4275_s12, %s6932_s12   ;;  %s4141_s11 = sphi %s4273_s11, %s6931_s11   ;;  %s4137_s10 = sphi %s4271_s10, %s6930_s10   ;;  %s4133_s30 = sphi %s4269_s30, %s6929_s30  }
  0x13   : > { %s275_s14 = sshll.u32 %s4147_s13, 4  ;;  %p3484_p0 = scmp.ge.s32.totalorder %s4145_s12, 1  ;;  %s4295_s14 = int_to_ptr.vmem [resolvable:$true] %s275_s14 }
  0x14   : > { %p6487_p1 = scmp.eq.s32.totalorder %s4290_s15, 0  ;;  %p262_p2 = scmp.lt.s32.totalorder %s4145_s12, 3 }
  0x15   : > { %s4148_s17 = smov [#allocation10]   ;;  %s4149_s19 = smov [#allocation14]  }
  0x16   : > { %p4297_p3 = pnand %p3484_p0, %p262_p2  ;;  %s286_s18 = sshll.u32 %s4148_s17, 4  ;;  %s4304_s18 = int_to_ptr.vmem [resolvable:$true] %s286_s18 }
  0x17   : > { %s317_s20 = sshll.u32 %s4149_s19, 4  ;;  %s4150_s22 = smov [#allocation12]   ;;  %s4312_s20 = int_to_ptr.vmem [resolvable:$true] %s317_s20 }
  0x18   : > { %s6628_s16 = scalar_select %p4297_p3, 1, 0 }
  0x19   : > { %p3567_p5 = pneg %p4297_p3  ;;  %s4314_s23 = sshll.u32 %s4150_s22, 4  ;;  %s298_s23 = int_to_ptr.vmem [resolvable:$true] %s4314_s23 }
  0x1a   : > { %s6630_s2 = sld [smem:[#allocation112_spill]] }
  0x1b   : > { %p4308_p6 = pnand %p3567_p5, %p6487_p1 }
  0x1d   : > { %p4324_p8 = pneg %p4308_p6 }
  0x20   : > { %s3829_s26 = scalar_lea.hbm %s6630_s2, 256 }
  0x21   : > { %p3830_p7 = scmp.ne.s32.totalorder %s6630_s2, %s3829_s26  ;;  %p3836_p11 = scmp.lt.u32.totalorder %s3829_s26, %s6630_s2 }
  0x23   : > { %p3832_p9 = pnand %p4324_p8, %p3830_p7 }
  0x25   : > { %p3833_p10 = pneg %p3832_p9 }
  0x27   : > { %p3838_p12 = pnand %p3836_p11, %p3833_p10 }
  0x29   : > { %3841 = shalt.err (!%p3838_p12)
}
  0x2a   : > { %s3842_s19 = scalar_lea.vmem %s4295_s14, 256  ;;  %p3850_p5 = scmp.lt.s32.totalorder %s4295_s14, %s4295_s14 }
  0x2b   : > { %p3843_p13 = scmp.ne.s32.totalorder %s4295_s14, %s3842_s19  ;;  %p3851_p4 = scmp.lt.s32.totalorder %s3842_s19, %s3842_s19 }
  0x2d   : > { %p3845_p0 = pnand %p3843_p13, %p4324_p8  ;;  %p3852_p7 = por %p3851_p4, %p3850_p5 }
  0x2f   : > { %p3846_p2 = pneg %p3845_p0 }
  0x31   : > { %p3853_p9 = pnand %p3852_p7, %p3846_p2 }
  0x33   : > { %3856 = shalt.err (!%p3853_p9)
}
  0x34   : > { %3570 = dma.hbm_to_vmem [thread:$0]  (!%p4308_p6), %s6630_s2, 256, %s4295_s14, [#allocation8]  }
  0x35   : > { %s6632_s3 = sld [smem:[#allocation113_spill]] }
  0x3b   : > { %s3857_s27 = scalar_lea.hbm %s6632_s3, 128 }
  0x3c   : > { %p3858_p10 = scmp.ne.s32.totalorder %s6632_s3, %s3857_s27  ;;  %p3864_p12 = scmp.lt.u32.totalorder %s3857_s27, %s6632_s3 }
  0x3e   : > { %p3860_p4 = pnand %p3858_p10, %p4324_p8 }
  0x40   : > { %p3861_p11 = pneg %p3860_p4 }
  0x42   : > { %p3866_p13 = pnand %p3864_p12, %p3861_p11 }
  0x44   : > { %3869 = shalt.err (!%p3866_p13)
}
  0x45   : > { %s3870_s14 = scalar_lea.vmem %s4304_s18, 128  ;;  %p3878_p7 = scmp.lt.s32.totalorder %s4304_s18, %s4304_s18 }
  0x46   : > { %p3871_p0 = scmp.ne.s32.totalorder %s4304_s18, %s3870_s14  ;;  %p3879_p9 = scmp.lt.s32.totalorder %s3870_s14, %s3870_s14 }
  0x48   : > { %p3873_p2 = pnand %p3871_p0, %p4324_p8  ;;  %p3880_p10 = por %p3879_p9, %p3878_p7 }
  0x4a   : > { %p3874_p5 = pneg %p3873_p2 }
  0x4c   : > { %p3881_p4 = pnand %p3880_p10, %p3874_p5 }
  0x4e   : > { %3884 = shalt.err (!%p3881_p4)
}
  0x4f   : > { %3573 = dma.hbm_to_vmem [thread:$0]  (!%p4308_p6), %s6632_s3, 128, %s4304_s18, [#allocation11]  }
  0x50   : > { %s6633_s6 = sld [smem:[#allocation116_spill]] }
  0x56   : > { %s3885_s27 = scalar_lea.hbm %s6633_s6, 128 }
  0x57   : > { %p3886_p11 = scmp.ne.s32.totalorder %s6633_s6, %s3885_s27  ;;  %p3892_p0 = scmp.lt.u32.totalorder %s3885_s27, %s6633_s6 }
  0x59   : > { %p3888_p12 = pnand %p3886_p11, %p4324_p8 }
  0x5b   : > { %p3889_p13 = pneg %p3888_p12 }
  0x5d   : > { %p3894_p2 = pnand %p3892_p0, %p3889_p13 }
  0x5f   : > { %3897 = shalt.err (!%p3894_p2)
}
  0x60   : > { %s3898_s18 = scalar_lea.vmem %s4312_s20, 128  ;;  %p3906_p10 = scmp.lt.s32.totalorder %s4312_s20, %s4312_s20 }
  0x61   : > { %p3899_p5 = scmp.ne.s32.totalorder %s4312_s20, %s3898_s18  ;;  %p3907_p4 = scmp.lt.s32.totalorder %s3898_s18, %s3898_s18 }
  0x63   : > { %p3901_p7 = pnand %p3899_p5, %p4324_p8  ;;  %p3908_p11 = por %p3907_p4, %p3906_p10 }
  0x65   : > { %p3902_p9 = pneg %p3901_p7 }
  0x67   : > { %p3909_p12 = pnand %p3908_p11, %p3902_p9 }
  0x69   : > { %3912 = shalt.err (!%p3909_p12)
}
  0x6a   : > { %3582 = dma.hbm_to_vmem [thread:$0]  (!%p4308_p6), %s6633_s6, 128, %s4312_s20, [#allocation15]  }
  0x6b   : > { %s6634_s4 = sld [smem:[#allocation114_spill]] }
  0x71   : > { %s3913_s26 = scalar_lea.hbm %s6634_s4, 32 }
  0x72   : > { %p3914_p13 = scmp.ne.s32.totalorder %s6634_s4, %s3913_s26  ;;  %p3920_p5 = scmp.lt.u32.totalorder %s3913_s26, %s6634_s4 }
  0x74   : > { %p3916_p0 = pnand %p3914_p13, %p4324_p8 }
  0x76   : > { %p3917_p2 = pneg %p3916_p0 }
  0x78   : > { %p3922_p7 = pnand %p3920_p5, %p3917_p2 }
  0x7a   : > { %3925 = shalt.err (!%p3922_p7)
}
  0x7b   : > { %s3926_s19 = scalar_lea.vmem %s298_s23, 32  ;;  %p3934_p11 = scmp.lt.s32.totalorder %s298_s23, %s298_s23 }
  0x7c   : > { %p3927_p9 = scmp.ne.s32.totalorder %s298_s23, %s3926_s19  ;;  %p3935_p12 = scmp.lt.s32.totalorder %s3926_s19, %s3926_s19 }
  0x7e   : > { %p3929_p10 = pnand %p3927_p9, %p4324_p8  ;;  %p3936_p1 = por %p3935_p12, %p3934_p11 }
  0x80   : > { %p3930_p4 = pneg %p3929_p10 }
  0x82   : > { %p3937_p3 = pnand %p3936_p1, %p3930_p4 }
  0x84   : > { %3940 = shalt.err (!%p3937_p3)
}
  0x85   : > { %3576 = dma.hbm_to_vmem [thread:$0]  (!%p4308_p6), %s6634_s4, 32, %s298_s23, [#allocation11]  }
  0x86   : > { %s6635_s5 = sld [smem:[#allocation115_spill]] }
  0x8c   : > { %s3941_s24 = scalar_lea.hbm %s6635_s5, 16 }
  0x8d   : > { %p3942_p13 = scmp.ne.s32.totalorder %s6635_s5, %s3941_s24  ;;  %p3948_p1 = scmp.lt.u32.totalorder %s3941_s24, %s6635_s5 }
  0x8f   : > { %p3944_p0 = pnand %p3942_p13, %p4324_p8 }
  0x91   : > { %p3945_p2 = pneg %p3944_p0 }
  0x93   : > { %p3950_p3 = pnand %p3948_p1, %p3945_p2 }
  0x95   : > { %3953 = shalt.err (!%p3950_p3)
}
  0x96   : > { %s4151_s13 = smov [#allocation13]   ;;  %s4152_s19 = smov [#allocation16]  }
  0x97   : > { %3579 = dma.hbm_to_smem (!%p4308_p6), %s6635_s5, 16, %s4151_s13, [#allocation6]  }
  0x98   : > { %s328_s20 = sshll.u32 %s4152_s19, 4  ;;  %s6636_s7 = sld [smem:[#allocation117_spill]]  ;;  %s329_s20 = int_to_ptr.vmem [resolvable:$true] %s328_s20 }
  0x9e   : > { %s3954_s22 = scalar_lea.hbm %s6636_s7, 32 }
  0x9f   : > { %p3955_p5 = scmp.ne.s32.totalorder %s6636_s7, %s3954_s22  ;;  %p3961_p10 = scmp.lt.u32.totalorder %s3954_s22, %s6636_s7 }
  0xa1   : > { %p3957_p7 = pnand %p3955_p5, %p4324_p8 }
  0xa3   : > { %p3958_p9 = pneg %p3957_p7 }
  0xa5   : > { %p3963_p4 = pnand %p3961_p10, %p3958_p9 }
  0xa7   : > { %3966 = shalt.err (!%p3963_p4)
}
  0xa8   : > { %s3967_s28 = scalar_lea.vmem %s329_s20, 32  ;;  %p3975_p0 = scmp.lt.s32.totalorder %s329_s20, %s329_s20 }
  0xa9   : > { %p3968_p11 = scmp.ne.s32.totalorder %s329_s20, %s3967_s28  ;;  %p3976_p2 = scmp.lt.s32.totalorder %s3967_s28, %s3967_s28 }
  0xab   : > { %p3970_p12 = pnand %p3968_p11, %p4324_p8  ;;  %p3977_p1 = por %p3976_p2, %p3975_p0 }
  0xad   : > { %p3971_p13 = pneg %p3970_p12 }
  0xaf   : > { %p3978_p3 = pnand %p3977_p1, %p3971_p13 }
  0xb1   : > { %3981 = shalt.err (!%p3978_p3)
}
  0xb2   : > { %3585 = dma.hbm_to_vmem [thread:$0]  (!%p4308_p6), %s6636_s7, 32, %s329_s20, [#allocation15]  }
  0xb3   : > { %s3982_s18 = scalar_lea.hbm %s6485_s8, 16 }
  0xb4   : > { %p3983_p5 = scmp.ne.s32.totalorder %s6485_s8, %s3982_s18  ;;  %p3989_p10 = scmp.lt.u32.totalorder %s3982_s18, %s6485_s8 }
  0xb6   : > { %p3985_p7 = pnand %p3983_p5, %p4324_p8 }
  0xb8   : > { %p3986_p9 = pneg %p3985_p7 }
  0xba   : > { %p3991_p4 = pnand %p3989_p10, %p3986_p9 }
  0xbc   : > { %3994 = shalt.err (!%p3991_p4)
}
  0xbd   : > { %s4153_s24 = smov [#allocation17]   ;;  %s3483_s29 = sadd.s32 4294967294, %s4145_s12  }
  0xbe   : > { %3588 = dma.hbm_to_smem (!%p4308_p6), %s6485_s8, 16, %s4153_s24, [#allocation18]  }
  0xbf   : > { %s4462_s21 = sadd.s32 1, %s4145_s12   ;;  %s39_s28 = sadd.s32 1, %s4141_s11 }
  0xc0   : > { %s36_s13 = ssub.s32 %s4145_s12, %s4462_s21  ;;  %p46_p8 = scmp.ne.s32.totalorder %s4141_s11, %s4137_s10 }
  0xc1   : > { %p37_p11 = scmp.eq.s32.totalorder %s36_s13, 0  ;;  %p47_p12 = scmp.eq.s32.totalorder %s4145_s12, 0 }
  0xc2   : > { %p52_p13 = scmp.ne.s32.totalorder %s4137_s10, %s4133_s30  ;;  %p249_p0 = scmp.eq.s32.totalorder %s4290_s15, 1 }
  0xc3   : > { %s4474_s23 = scalar_select %p37_p11, %s4141_s11, %s39_s28  }
  0xc4   : > { %p48_p2 = por %p47_p12, %p46_p8  ;;  %p6637_p1 = scmp.eq.s32.totalorder %s4290_s15, 0 }
  0xc5   : > { %p4482_p6 = por %p249_p0, %p46_p8  ;;  %p255_p5 = scmp.eq.s32.totalorder %s3483_s29, 1 }
  0xc6   : > { %p4478_p3 = por %p6637_p1, %p52_p13  ;;  %p3607_p7 = scmp.lt.s32.totalorder %s4145_s12, 2 }
  0xc7   : > { %s6639_s19 = scalar_select %p4482_p6, 1, 0 }
  0xc8   : > { %s6638_s17 = scalar_select %p4478_p3, 1, 0 }
  0xc9   : > { %s348_s18 = sand.u32 1, %s4141_s11   ;;  %p4488_p9 = por %p255_p5, %p52_p13 }
  0xca   : > { %s4492_s22 = sshll.u32 %s348_s18, 4  ;;  %s3518_s25 = sshll.u32 %s4145_s12, 8 }
  0xcb   : > { %s6640_s14 = scalar_select %p4488_p9, 1, 0 }
  0xcc   : > { %s4498_s20 = scalar_lea.hbm %s6477_s0, %s3518_s25  ;;  %s352_s27 = scalar_lea.vmem [#allocation3], %s4492_s22 }
  0xcd   : > { %s360_s29 = sshll.u32 %s352_s27, 4  ;;  %p4501_p10 = pnand %p3607_p7, %p48_p2  ;;  %s4505_s29 = int_to_ptr.vmem [resolvable:$true] %s360_s29 }
  0xce   : > { %s4510_s26 = scalar_lea.hbm %s6478_s1, %s3518_s25  ;;  %s349_s24 = scalar_lea.sflag [#allocation4], %s348_s18 }
  0xcf   : > { %s3995_s3 = scalar_lea.hbm %s4498_s20, 256  ;;  %p3997_p8 = pneg %p4501_p10 }
  0xd0   : > { %p3996_p4 = scmp.ne.s32.totalorder %s4498_s20, %s3995_s3  ;;  %s4000_s5 = scalar_lea.hbm %s6477_s0, 512 }
  0xd1   : > { %p4001_p13 = scmp.lt.u32.totalorder %s4498_s20, %s6477_s0  ;;  %p4002_p0 = scmp.lt.u32.totalorder %s4000_s5, %s3995_s3 }
  0xd2   : > { %p3998_p11 = pnand %p3997_p8, %p3996_p4  ;;  %p4004_p1 = scmp.lt.u32.totalorder %s3995_s3, %s4498_s20 }
  0xd3   : > { %p4003_p2 = por %p4002_p0, %p4001_p13 }
  0xd4   : > { %p3999_p12 = pneg %p3998_p11 }
  0xd5   : > { %p4005_p5 = por %p4004_p1, %p4003_p2 }
  0xd7   : > { %p4006_p7 = pnand %p4005_p5, %p3999_p12 }
  0xd9   : > { %4009 = shalt.err (!%p4006_p7)
}
  0xda   : > { %s4010_s2 = scalar_lea.vmem %s4505_s29, 256  ;;  %s4154_s4 = smov [#allocation3]  }
  0xdb   : > { %p4011_p4 = scmp.ne.s32.totalorder %s4505_s29, %s4010_s2  ;;  %s4015_s18 = sshll.u32 %s4154_s4, 4  ;;  %s4016_s18 = int_to_ptr.vmem [resolvable:$false] %s4015_s18 }
  0xdc   : > { %s4017_s6 = scalar_lea.vmem %s4016_s18, 512  ;;  %p4018_p6 = scmp.lt.s32.totalorder %s4505_s29, %s4016_s18 }
  0xdd   : > { %p4013_p11 = pnand %p4011_p4, %p3997_p8  ;;  %p4019_p13 = scmp.lt.s32.totalorder %s4017_s6, %s4010_s2 }
  0xdf   : > { %p4014_p9 = pneg %p4013_p11  ;;  %p4020_p0 = por %p4019_p13, %p4018_p6 }
  0xe1   : > { %p4021_p2 = pnand %p4020_p0, %p4014_p9 }
  0xe3   : > { %4024 = shalt.err (!%p4021_p2)
}
  0xe4   : > { %3592 = dma.hbm_to_vmem [thread:$0]  (!%p4501_p10), %s4498_s20, 256, %s4505_s29, %s349_s24  }
  0xe5   : > { %s367_s3 = sand.u32 1, %s4145_s12   ;;  %s371_s5 = scalar_lea.vmem [#allocation7], %s4492_s22 }
  0xe6   : > { %s379_s7 = sshll.u32 %s371_s5, 4  ;;  %s368_s25 = scalar_lea.sflag [#allocation8], %s367_s3  ;;  %s380_s7 = int_to_ptr.vmem [resolvable:$true] %s379_s7 }
  0xe7   : > { %s4025_s13 = scalar_lea.hbm %s4510_s26, 256  ;;  %s4030_s4 = scalar_lea.hbm %s6478_s1, 512 }
  0xe8   : > { %p4026_p6 = scmp.ne.s32.totalorder %s4510_s26, %s4025_s13  ;;  %p4031_p1 = scmp.lt.u32.totalorder %s4510_s26, %s6478_s1 }
  0xe9   : > { %p4032_p5 = scmp.lt.u32.totalorder %s4030_s4, %s4025_s13  ;;  %p4034_p4 = scmp.lt.u32.totalorder %s4025_s13, %s4510_s26 }
  0xea   : > { %p4028_p9 = pnand %p4026_p6, %p3997_p8 }
  0xeb   : > { %p4033_p7 = por %p4032_p5, %p4031_p1 }
  0xec   : > { %p4029_p12 = pneg %p4028_p9 }
  0xed   : > { %p4035_p11 = por %p4034_p4, %p4033_p7 }
  0xef   : > { %p4036_p13 = pnand %p4035_p11, %p4029_p12 }
  0xf1   : > { %4039 = shalt.err (!%p4036_p13)
}
  0xf2   : > { %s4040_s22 = scalar_lea.vmem %s380_s7, 256  ;;  %s4155_s20 = smov [#allocation7]  }
  0xf3   : > { %p4041_p0 = scmp.ne.s32.totalorder %s380_s7, %s4040_s22  ;;  %s4045_s29 = sshll.u32 %s4155_s20, 4  ;;  %s4046_s29 = int_to_ptr.vmem [resolvable:$false] %s4045_s29 }
  0xf4   : > { %s4047_s24 = scalar_lea.vmem %s4046_s29, 512  ;;  %p4048_p9 = scmp.lt.s32.totalorder %s380_s7, %s4046_s29 }
  0xf5   : > { %p4043_p2 = pnand %p4041_p0, %p3997_p8  ;;  %p4049_p3 = scmp.lt.s32.totalorder %s4047_s24, %s4040_s22 }
  0xf7   : > { %p4044_p6 = pneg %p4043_p2  ;;  %p4050_p1 = por %p4049_p3, %p4048_p9 }
  0xf9   : > { %p4051_p5 = pnand %p4050_p1, %p4044_p6 }
  0xfb   : > { %4054 = shalt.err (!%p4051_p5)
}
  0xfc   : > { %3595 = dma.hbm_to_vmem [thread:$0]  (!%p4501_p10), %s4510_s26, 256, %s380_s7, %s368_s25  }
  0xfd   : > { %p6642_p12 = scmp.ne.s32.totalorder %s6628_s16, 0 }
  0xff   : > { %388 = sbr.rel (%p6642_p12) target bundleno = 6474 (0x194a), region = 56 }
 0x106   : > { %s4561_s3 = sand.u32 1, %s4137_s10   ;;  %p6643_p3 = scmp.ne.s32.totalorder %s6638_s17, 0 }
 0x107   : > { %s4564_s5 = sshll.u32 %s4561_s3, 4  ;;  %s391_s13 = scalar_lea.sflag [#allocation4], %s4561_s3 }
 0x108   : > { %s4568_s27 = scalar_lea.vmem [#allocation3], %s4564_s5 }
 0x109   : > { %4100 = dma.done.wait (%p6643_p3), %s391_s13, 256  }
 0x10a   : > { %4102 = vsyncadd (%p6643_p3), %s391_s13, 4294967040  ;;  %s399_s16 = sand.u32 1, %s4290_s15   ;;  %s4576_s26 = scalar_lea.vmem [#allocation7], %s4564_s5 }
 0x10b   : > { %s400_s28 = scalar_lea.sflag [#allocation8], %s399_s16 }
 0x10c   : > { %4104 = dma.done.wait (%p6643_p3), %s400_s28, 256  }
 0x10d   : > { %4106 = vsyncadd (%p6643_p3), %s400_s28, 4294967040  ;;  %p6644_p10 = scmp.eq.s32.totalorder %s4290_s15, 0 }
 0x10f   : > { %4108 = dma.done.wait (%p6644_p10), [#allocation8], 256   ;;  %p6645_p8 = pmov %p6644_p10 }
 0x111   : > { %4110 = vsyncadd (%p6645_p8), [#allocation8], 4294967040  ;;  %p6646_p7 = pmov %p6645_p8 }
 0x113   : > { %4112 = dma.done.wait (%p6646_p7), [#allocation11], 160   ;;  %p6647_p4 = pmov %p6646_p7 }
 0x115   : > { %4114 = vsyncadd (%p6647_p4), [#allocation11], 4294967136  ;;  %p6648_p11 = pmov %p6647_p4 }
 0x116   : > { %p6649_p13 = pmov %p6647_p4 }
 0x117   : > { %4116 = dma.done.wait (%p6648_p11), [#allocation6], 16  }
 0x118   : > { %4118 = vsyncadd (%p6649_p13), [#allocation6], 4294967280  ;;  %p6650_p0 = pmov %p6647_p4 }
 0x11a   : > { %4120 = dma.done.wait (%p6650_p0), [#allocation15], 160   ;;  %p6651_p2 = pmov %p6650_p0 }
 0x11b   : > { %p6652_p6 = pmov %p6650_p0 }
 0x11c   : > { %4122 = vsyncadd (%p6651_p2), [#allocation15], 4294967136 }
 0x11d   : > { %4124 = dma.done.wait (%p6652_p6), [#allocation18], 16   ;;  %p6653_p9 = pmov %p6650_p0 }
 0x11f   : > { %4126 = vsyncadd (%p6653_p9), [#allocation18], 4294967280 }
 0x120   : > { %436 = sfence }
 0x121   : > { %v4602_v0 = vld [vmem:[#allocation10] sm:$0xff]  ;;  %v4608_v2 = vld [vmem:[%s4568_s27 + $0x8] sm:$0xff]  ;;  %v6523_v3 = vmov 0   ;;  %v6519_v8 = vmov 21   ;;  %v6522_v9 = vmov 7   ;;  %v6521_v10 = vmov 14  }
 0x122   : > { %v4605_v1 = vld [vmem:[%s4568_s27] sm:$0xff]  ;;  %3717 = vset.pattern.permute.xlu1 %v6523_v3  ;;  %v514_v6 = vmul.f32 %v4608_v2, %v4608_v2  ;;  %3720 = vset.pattern.permute.xlu0 %v6519_v8  ;;  %v6517_v11 = vmov 28   ;;  %v6515_v12 = vmov 35   ;;  %v6514_v13 = vmov 42   ;;  %s4183_s17 = smov 112   ;;  %s4184_s7 = smov 96  }
 0x123   : > { %v503_v4 = vadd.f32 %v4608_v2, %v4605_v1  ;;  %551 = vperm.xlu1 %3717, %v4602_v0   ;;  %v513_v5 = vmul.f32 %v4605_v1, %v4605_v1  ;;  %v6513_v14 = vmov 8   ;;  %v6516_v15 = vmov 1   ;;  %s4185_s25 = smov 64   ;;  %s4186_s2 = smov 48  }
 0x124   : > { %v6511_v16 = vmov 22   ;;  %v6512_v17 = vmov 15   ;;  %v6509_v18 = vmov 29   ;;  %v6510_v19 = vmov 2   ;;  %s4187_s4 = smov 32   ;;  %s4188_s18 = smov 80  }
 0x125   : > { %504 = vadd.xlane.f32.xlu0 %v503_v4  ;;  %v515_v7 = vadd.f32 %v514_v6, %v513_v5  ;;  %v6508_v20 = vmov 36   ;;  %v6505_v21 = vmov 16   ;;  %v6507_v22 = vmov 43   ;;  %p6926_p5 = scmp.ne.s32.totalorder %s6639_s19, 0 }
 0x126   : > { %v6503_v23 = vmov 3   ;;  %v6506_v24 = vmov 9   ;;  %v6498_v25 = vmov 17   ;;  %v6504_v26 = vmov 23  }
 0x127   : > { %3718 = vset.pattern.permute.xlu1 %v6522_v9  ;;  %v6502_v27 = vmov 30   ;;  %v6501_v28 = vmov 37   ;;  %v6500_v29 = vmov 44   ;;  %v6499_v30 = vmov 10  }
 0x128   : > { %558 = vperm.xlu1 %3718, %v4602_v0   ;;  %v6495_v31 = vmov 31   ;;  %v6493_v32 = vmov 24   ;;  %v6492_v33 = vmov 38   ;;  %vm651_vm0 = vcmask 523264  }
 0x129   : > { %516 = vadd.xlane.f32.xlu0 %v515_v7  ;;  %vm676_vm1 = vcmask 392192   ;;  %vm701_vm2 = vcmask 261120   ;;  %vm623_vm3 = vcmask 654336   ;;  %vm573_vm4 = vcmask 916480  }
 0x12a   : > { %vm598_vm5 = vcmask 785408   ;;  %vm911_vm6 = vcmask 408576   ;;  %vm731_vm7 = vcmask 416768   ;;  %vm1093_vm8 = vcmask 400384  }
 0x12b   : > { %vm1436_vm9 = vcmask 384000   ;;  %vm1618_vm10 = vcmask 375808   ;;  %vm1800_vm11 = vcmask 367616  }
 0x12c   : > { %3719 = vset.pattern.permute.xlu1 %v6521_v10  ;;  %v6524_v10 = vmov 39  }
 0x12d   : > { %583 = vperm.xlu1 %3719, %v4602_v0  }
 0x131   : > { %3721 = vset.pattern.permute.xlu1 %v6517_v11 }
 0x132   : > { %636 = vperm.xlu1 %3721, %v4602_v0  }
 0x136   : > { %3722 = vset.pattern.permute.xlu1 %v6515_v12 }
 0x137   : > { %661 = vperm.xlu1 %3722, %v4602_v0  }
 0x13b   : > { %3723 = vset.pattern.permute.xlu1 %v6514_v13 }
 0x13c   : > { %686 = vperm.xlu1 %3723, %v4602_v0  }
 0x13f   : > { %608 = vperm.xlu0 %3720, %v4602_v0  }
 0x140   : > { %3725 = vset.pattern.permute.xlu1 %v6513_v14  ;;  %v6518_v14 = vmov 18  }
 0x141   : > { %746 = vperm.xlu1 %3725, %v4602_v0  }
 0x143   : > { %3724 = vset.pattern.permute.xlu0 %v6516_v15 }
 0x144   : > { %739 = vperm.xlu0 %3724, %v4602_v0  }
 0x145   : > { %3727 = vset.pattern.permute.xlu1 %v6511_v16 }
 0x146   : > { %794 = vperm.xlu1 %3727, %v4602_v0  }
 0x148   : > { %3726 = vset.pattern.permute.xlu0 %v6512_v17 }
 0x149   : > { %770 = vperm.xlu0 %3726, %v4602_v0  }
 0x14a   : > { %3728 = vset.pattern.permute.xlu1 %v6509_v18 }
 0x14b   : > { %818 = vperm.xlu1 %3728, %v4602_v0  }
 0x14d   : > { %3731 = vset.pattern.permute.xlu0 %v6510_v19 }
 0x14e   : > { %921 = vperm.xlu0 %3731, %v4602_v0  }
 0x14f   : > { %3729 = vset.pattern.permute.xlu1 %v6508_v20 }
 0x150   : > { %842 = vperm.xlu1 %3729, %v4602_v0  }
 0x152   : > { %3733 = vset.pattern.permute.xlu0 %v6505_v21 }
 0x153   : > { %952 = vperm.xlu0 %3733, %v4602_v0  }
 0x154   : > { %3730 = vset.pattern.permute.xlu1 %v6507_v22 }
 0x155   : > { %866 = vperm.xlu1 %3730, %v4602_v0  }
 0x157   : > { %3738 = vset.pattern.permute.xlu0 %v6503_v23 }
 0x158   : > { %1103 = vperm.xlu0 %3738, %v4602_v0  }
 0x159   : > { %3732 = vset.pattern.permute.xlu1 %v6506_v24 }
 0x15a   : > { %928 = vperm.xlu1 %3732, %v4602_v0  }
 0x15c   : > { %3740 = vset.pattern.permute.xlu0 %v6498_v25 }
 0x15d   : > { %1134 = vperm.xlu0 %3740, %v4602_v0  }
 0x15e   : > { %3734 = vset.pattern.permute.xlu1 %v6504_v26 }
 0x15f   : > { %976 = vperm.xlu1 %3734, %v4602_v0  }
 0x161   : > { %3742 = vset.pattern.permute.xlu0 %v6495_v31 }
 0x163   : > { %3735 = vset.pattern.permute.xlu1 %v6502_v27 }
 0x164   : > { %1000 = vperm.xlu1 %3735, %v4602_v0  }
 0x168   : > { %3736 = vset.pattern.permute.xlu1 %v6501_v28 }
 0x169   : > { %1024 = vperm.xlu1 %3736, %v4602_v0  }
 0x16d   : > { %3737 = vset.pattern.permute.xlu1 %v6500_v29 }
 0x16e   : > { %1048 = vperm.xlu1 %3737, %v4602_v0  }
 0x172   : > { %3739 = vset.pattern.permute.xlu1 %v6499_v30 }
 0x173   : > { %1110 = vperm.xlu1 %3739, %v4602_v0  }
 0x177   : > { %3741 = vset.pattern.permute.xlu1 %v6493_v32 }
 0x178   : > { %1158 = vperm.xlu1 %3741, %v4602_v0  }
 0x17c   : > { %3743 = vset.pattern.permute.xlu1 %v6492_v33 }
 0x1a2   : > { %v4668_v34 = vpop.permute.xlu1 %551 }
 0x1a7   : > { %v4670_v35 = vpop.permute.xlu1 %558 }
 0x1a8   : > { %v561_v36 = vmul.f32 0.0, %v4670_v35 }
 0x1aa   : > { %567 = vrot.lane.b32.xlu0 %v561_v36, %s4183_s17 }
 0x1ac   : > { %v4674_v37 = vpop.permute.xlu1 %583 }
 0x1ad   : > { %v586_v38 = vmul.f32 0.0, %v4674_v37 }
 0x1af   : > { %592 = vrot.lane.b32.xlu1 %v586_v38, %s4184_s7 }
 0x1b1   : > { %v4678_v39 = vpop.permute.xlu1 %636 }
 0x1b2   : > { %v505_v40 = vpop.xlane.xlu0 %504  ;;  %v641_v42 = vmul.f32 0.0, %v4678_v39 }
 0x1b3   : > { %v506_v41 = vrot.slane %v505_v40, 4 }
 0x1b4   : > { %649 = vrot.lane.b32.xlu0 %v641_v42, %s4185_s25 }
 0x1b5   : > { %v507_v43 = vadd.f32 %v506_v41, %v505_v40 }
 0x1b6   : > { %v517_v44 = vpop.xlane.xlu0 %516  ;;  %v4682_v46 = vpop.permute.xlu1 %661 }
 0x1b7   : > { %v518_v45 = vrot.slane %v517_v44, 4  ;;  %v508_v47 = vrot.slane %v507_v43, 2  ;;  %v666_v48 = vmul.f32 0.0, %v4682_v46 }
 0x1b9   : > { %v519_v49 = vadd.f32 %v518_v45, %v517_v44  ;;  %v509_v50 = vadd.f32 %v508_v47, %v507_v43  ;;  %674 = vrot.lane.b32.xlu0 %v666_v48, %s4186_s2 }
 0x1bb   : > { %v510_v51 = vrot.slane %v509_v50, 1  ;;  %v520_v52 = vrot.slane %v519_v49, 2  ;;  %v4686_v53 = vpop.permute.xlu1 %686 }
 0x1bc   : > { %v691_v54 = vmul.f32 0.0, %v4686_v53 }
 0x1bd   : > { %v511_v55 = vadd.f32 %v510_v51, %v509_v50  ;;  %v521_v56 = vadd.f32 %v520_v52, %v519_v49 }
 0x1be   : > { %v4689_v57 = vpop.permute.xlu0 %608  ;;  %699 = vrot.lane.b32.xlu0 %v691_v54, %s4187_s4 }
 0x1bf   : > { %3521 = vpush %v511_v55  ;;  %v611_v58 = vmul.f32 0.0, %v4689_v57  ;;  %v522_v59 = vrot.slane %v521_v56, 1 }
 0x1c0   : > { %v4693_v60 = vpop.permute.xlu1 %746 }
 0x1c1   : > { %617 = vrot.lane.b32.xlu1 %v611_v58, %s4188_s18  ;;  %v523_v61 = vadd.f32 %v522_v59, %v521_v56  ;;  %v749_v62 = vmul.f32 0.0, %v4693_v60 }
 0x1c3   : > { %3523 = vpush %v523_v61  ;;  %v4697_v63 = vpop.permute.xlu0 %739 }
 0x1c5   : > { %755 = vrot.lane.b32.xlu1 %v749_v62, %s4183_s17  ;;  %v4700_v4 = vpop.permute.xlu1 %794 }
 0x1c6   : > { %v797_v5 = vmul.f32 0.0, %v4700_v4 }
 0x1c8   : > { %v4703_v6 = vpop.permute.xlu0 %770  ;;  %803 = vrot.lane.b32.xlu0 %v797_v5, %s4188_s18 }
 0x1c9   : > { %v773_v7 = vmul.f32 0.0, %v4703_v6 }
 0x1ca   : > { %v4707_v36 = vpop.permute.xlu1 %818 }
 0x1cb   : > { %779 = vrot.lane.b32.xlu1 %v773_v7, %s4184_s7  ;;  %v823_v38 = vmul.f32 0.0, %v4707_v36 }
 0x1cd   : > { %831 = vrot.lane.b32.xlu0 %v823_v38, %s4185_s25  ;;  %v4716_v42 = vpop.permute.xlu0 %921 }
 0x1cf   : > { %v4712_v40 = vpop.permute.xlu1 %842 }
 0x1d0   : > { %v847_v41 = vmul.f32 0.0, %v4712_v40 }
 0x1d2   : > { %855 = vrot.lane.b32.xlu0 %v847_v41, %s4186_s2  ;;  %v4724_v47 = vpop.permute.xlu0 %952 }
 0x1d3   : > { %v955_v49 = vmul.f32 0.0, %v4724_v47 }
 0x1d4   : > { %v4718_v43 = vpop.permute.xlu1 %866 }
 0x1d5   : > { %v871_v44 = vmul.f32 0.0, %v4718_v43 }
 0x1d7   : > { %879 = vrot.lane.b32.xlu0 %v871_v44, %s4187_s4  ;;  %v4742_v58 = vpop.permute.xlu0 %1103  ;;  %v6491_v44 = vmov 45  }
 0x1d9   : > { %v4722_v45 = vpop.permute.xlu1 %928 }
 0x1da   : > { %v931_v48 = vmul.f32 0.0, %v4722_v45 }
 0x1dc   : > { %937 = vrot.lane.b32.xlu1 %v931_v48, %s4183_s17  ;;  %v4754_v5 = vpop.permute.xlu0 %1134 }
 0x1dd   : > { %v1137_v38 = vmul.f32 0.0, %v4754_v5 }
 0x1de   : > { %v4729_v50 = vpop.permute.xlu1 %976 }
 0x1df   : > { %v979_v51 = vmul.f32 0.0, %v4729_v50 }
 0x1e0   : > { %961 = vrot.lane.b32.xlu1 %v955_v49, %s4184_s7  ;;  %v6497_v49 = vmov 11  }
 0x1e1   : > { %985 = vrot.lane.b32.xlu0 %v979_v51, %s4188_s18  ;;  %v6494_v51 = vmov 4  }
 0x1e3   : > { %v4734_v52 = vpop.permute.xlu1 %1000 }
 0x1e4   : > { %v1005_v54 = vmul.f32 0.0, %v4734_v52 }
 0x1e6   : > { %1013 = vrot.lane.b32.xlu0 %v1005_v54, %s4185_s25  ;;  %v6496_v54 = vmov 25  }
 0x1e8   : > { %v4738_v55 = vpop.permute.xlu1 %1024 }
 0x1e9   : > { %v1029_v56 = vmul.f32 0.0, %v4738_v55 }
 0x1eb   : > { %1037 = vrot.lane.b32.xlu0 %v1029_v56, %s4186_s2 }
 0x1ed   : > { %v4744_v59 = vpop.permute.xlu1 %1048 }
 0x1ee   : > { %v1053_v61 = vmul.f32 0.0, %v4744_v59 }
 0x1f0   : > { %s3522_s6 = spop %3521  ;;  %1061 = vrot.lane.b32.xlu0 %v1053_v61, %s4187_s4 }
 0x1f1   : > { %s4748_s22 = smul.f32 0.00048828125, %s3522_s6  ;;  %s6615_s6 = smov 51  }
 0x1f2   : > { %v4752_v62 = vpop.permute.xlu1 %1110 }
 0x1f3   : > { %s531_s20 = smul.f32 %s4748_s22, %s4748_s22  ;;  %v1113_v7 = vmul.f32 0.0, %v4752_v62 }
 0x1f4   : > { %s3524_s29 = spop %3523  ;;  %1177 = vperm.xlu0 %3742, %v4602_v0  }
 0x1f5   : > { %s530_s24 = smul.f32 0.00048828125, %s3524_s29  ;;  %1119 = vrot.lane.b32.xlu1 %v1113_v7, %s4183_s17  ;;  %s6609_s29 = smov 47  }
 0x1f7   : > { %s532_s13 = ssub.f32 %s530_s24, %s531_s20  ;;  %s6611_s20 = smov 49  }
 0x1f8   : > { %3745 = vset.pattern.permute.xlu0 %v6494_v51  ;;  %s6607_s24 = smov 46  }
 0x1f9   : > { %s536_s16 = sadd.f32 1e-05, %s532_s13  ;;  %1143 = vrot.lane.b32.xlu1 %v1137_v38, %s4184_s7  ;;  %s6605_s13 = smov 45  }
 0x1fb   : > { %v537_v41 = vstv %s536_s16 }
 0x1fc   : > { %3816 = vrsqrt.f32 %v537_v41 }
 0x1fd   : > { %1201 = vperm.xlu1 %3743, %v4602_v0  }
 0x201   : > { %3744 = vset.pattern.permute.xlu1 %v6491_v44  ;;  %v4781_v44 = vpop.permute.xlu1 %1158 }
 0x202   : > { %1225 = vperm.xlu1 %3744, %v4602_v0  }
 0x206   : > { %v3817_v48 = vpop.eup %3816  ;;  %3746 = vset.pattern.permute.xlu1 %v6497_v49 }
 0x207   : > { %3525 = vpush %v3817_v48  ;;  %1271 = vperm.xlu1 %3746, %v4602_v0  }
 0x20b   : > { %3748 = vset.pattern.permute.xlu1 %v6496_v54 }
 0x20c   : > { %1319 = vperm.xlu1 %3748, %v4602_v0  }
 0x21c   : > { %v4769_v56 = vpop.permute.xlu0 %567 }
 0x221   : > { %v4785_v32 = vpop.permute.xlu1 %592 }
 0x222   : > { %6655 = vst [vmem:[#allocation29_spill] sm:$0xff] %v4785_v32 }
 0x226   : > { %v4771_v61 = vpop.permute.xlu0 %649 }
 0x22b   : > { %v4773_v7 = vpop.permute.xlu0 %674 }
 0x230   : > { %v4775_v38 = vpop.permute.xlu0 %699 }
 0x233   : > { %v4789_v31 = vpop.permute.xlu1 %617 }
 0x234   : > { %6656 = vst [vmem:[#allocation30_spill] sm:$0xff] %v4789_v31 }
 0x237   : > { %v4793_v49 = vpop.permute.xlu1 %755 }
 0x238   : > { %6658 = vst [vmem:[#allocation32_spill] sm:$0xff] %v4793_v49  ;;  %s3526_s28 = spop %3525 }
 0x239   : > { %v540_v9 = vstv %s3526_s28 }
 0x23a   : > { %v4777_v41 = vpop.permute.xlu0 %803 }
 0x23b   : > { %6654 = vst [vmem:[#allocation28_spill] sm:$0xff] %v4777_v41 }
 0x23d   : > { %v4797_v30 = vpop.permute.xlu1 %779 }
 0x23e   : > { %6659 = vst [vmem:[#allocation33_spill] sm:$0xff] %v4797_v30 }
 0x23f   : > { %v4779_v48 = vpop.permute.xlu0 %831 }
 0x244   : > { %v4783_v33 = vpop.permute.xlu0 %855 }
 0x249   : > { %v4787_v51 = vpop.permute.xlu0 %879 }
 0x24e   : > { %v4801_v28 = vpop.permute.xlu1 %937 }
 0x24f   : > { %6660 = vst [vmem:[#allocation34_spill] sm:$0xff] %v4801_v28 }
 0x252   : > { %v4803_v27 = vpop.permute.xlu1 %961 }
 0x253   : > { %v4791_v54 = vpop.permute.xlu0 %985  ;;  %6661 = vst [vmem:[#allocation35_spill] sm:$0xff] %v4803_v27 }
 0x254   : > { %6657 = vst [vmem:[#allocation31_spill] sm:$0xff] %v4791_v54 }
 0x258   : > { %v4795_v25 = vpop.permute.xlu0 %1013 }
 0x25d   : > { %v4799_v29 = vpop.permute.xlu0 %1037 }
 0x262   : > { %v4805_v23 = vpop.permute.xlu0 %1061 }
 0x267   : > { %v4807_v26 = vpop.permute.xlu1 %1119 }
 0x268   : > { %6662 = vst [vmem:[#allocation36_spill] sm:$0xff] %v4807_v26 }
 0x26b   : > { %v4813_v22 = vpop.permute.xlu1 %1143 }
 0x26c   : > { %6663 = vst [vmem:[#allocation37_spill] sm:$0xff] %v4813_v22 }
 0x273   : > { %v4809_v21 = vpop.permute.xlu0 %1177 }
 0x274   : > { %v1182_v24 = vmul.f32 0.0, %v4809_v21 }
 0x276   : > { %1190 = vrot.lane.b32.xlu0 %v1182_v24, %s4185_s25 }
 0x27c   : > { %v4815_v20 = vpop.permute.xlu1 %1201 }
 0x27d   : > { %v1206_v18 = vmul.f32 0.0, %v4815_v20 }
 0x27f   : > { %1214 = vrot.lane.b32.xlu0 %v1206_v18, %s4186_s2  ;;  %v6520_v18 = vmov 32  }
 0x280   : > { %3749 = vset.pattern.permute.xlu1 %v6520_v18  ;;  %v533_v18 = vstv %s4748_s22  ;;  %s6613_s22 = smov 50  }
 0x281   : > { %v4819_v19 = vpop.permute.xlu1 %1225  ;;  %v534_v3 = vsub.f32 %v4605_v1, %v533_v18  ;;  %v535_v22 = vsub.f32 %v4608_v2, %v533_v18 }
 0x282   : > { %v1230_v16 = vmul.f32 0.0, %v4819_v19 }
 0x283   : > { %v4852_v54 = vmul.f32 %v540_v9, %v534_v3 }
 0x284   : > { %1238 = vrot.lane.b32.xlu0 %v1230_v16, %s4187_s4 }
 0x285   : > { %v562_v27 = vmul.f32 %v4670_v35, %v4852_v54  ;;  %v587_v2 = vmul.f32 %v4674_v37, %v4852_v54  ;;  %v774_v18 = vmul.f32 %v4703_v6, %v4852_v54 }
 0x286   : > { %v4823_v17 = vpop.permute.xlu1 %1271 }
 0x287   : > { %v1274_v24 = vmul.f32 0.0, %v4823_v17 }
 0x288   : > { %1264 = vperm.xlu0 %3745, %v4602_v0  }
 0x289   : > { %1280 = vrot.lane.b32.xlu1 %v1274_v24, %s4183_s17 }
 0x28b   : > { %v4837_v15 = vpop.permute.xlu1 %1319 }
 0x28c   : > { %3747 = vset.pattern.permute.xlu0 %v6518_v14  ;;  %v1324_v11 = vmul.f32 0.0, %v4837_v15 }
 0x28d   : > { %1295 = vperm.xlu0 %3747, %v4602_v0  }
 0x291   : > { %1332 = vrot.lane.b32.xlu0 %v1324_v11, %s4188_s18  ;;  %v6527_v11 = vmov 46  }
 0x2e8   : > { %v4831_v13 = vpop.permute.xlu0 %1190 }
 0x2f1   : > { %v4833_v16 = vpop.permute.xlu0 %1214 }
 0x2f6   : > { %v4835_v12 = vpop.permute.xlu0 %1238 }
 0x307   : > { %v4840_v24 = vpop.permute.xlu0 %1264 }
 0x308   : > { %6664 = vst [vmem:[#allocation38_spill] sm:$0xff] %v4840_v24 }
 0x30c   : > { %v4843_v14 = vpop.permute.xlu0 %1295 }
 0x30d   : > { %v1298_v8 = vmul.f32 0.0, %v4843_v14 }
 0x30f   : > { %1304 = vrot.lane.b32.xlu1 %v1298_v8, %s4184_s7  ;;  %v4857_v8 = vmul.f32 %v540_v9, %v535_v22  ;;  %v612_v9 = vmul.f32 %v4689_v57, %v4852_v54 }
 0x311   : > { %v563_v1 = vmul.f32 %v4670_v35, %v4857_v8  ;;  %v588_v3 = vmul.f32 %v4674_v37, %v4857_v8  ;;  %v640_v22 = vmul.f32 %v4678_v39, %v4857_v8  ;;  %v690_v35 = vmul.f32 %v4686_v53, %v4857_v8 }
 0x312   : > { %v751_v37 = vmul.f32 %v4693_v60, %v4857_v8 }
 0x313   : > { %1343 = vperm.xlu1 %3749, %v4602_v0  }
 0x317   : > { %3750 = vset.pattern.permute.xlu1 %v6524_v10  ;;  %v6526_v10 = vmov 12  }
 0x318   : > { %1367 = vperm.xlu1 %3750, %v4602_v0  }
 0x31c   : > { %3751 = vset.pattern.permute.xlu1 %v6527_v11 }
 0x31d   : > { %1391 = vperm.xlu1 %3751, %v4602_v0  }
 0x321   : > { %569 = vrot.lane.b32.xlu1 %v562_v27, %s4183_s17  ;;  %v665_v27 = vmul.f32 %v4682_v46, %v4857_v8 }
 0x322   : > { %3753 = vset.pattern.permute.xlu1 %v6526_v10  ;;  %v639_v10 = vmul.f32 %v4678_v39, %v4852_v54  ;;  %v750_v39 = vmul.f32 %v4693_v60, %v4852_v54  ;;  %v821_v60 = vmul.f32 %v4707_v36, %v4852_v54 }
 0x325   : > { %571 = vrot.lane.b32.xlu1 %v563_v1, %s4183_s17  ;;  %v798_v1 = vmul.f32 %v4700_v4, %v4852_v54 }
 0x329   : > { %594 = vrot.lane.b32.xlu1 %v587_v2, %s4184_s7  ;;  %v822_v2 = vmul.f32 %v4707_v36, %v4857_v8  ;;  %v932_v36 = vmul.f32 %v4722_v45, %v4852_v54 }
 0x32d   : > { %596 = vrot.lane.b32.xlu1 %v588_v3, %s4184_s7  ;;  %v846_v3 = vmul.f32 %v4712_v40, %v4857_v8 }
 0x331   : > { %619 = vrot.lane.b32.xlu1 %v612_v9, %s4188_s18  ;;  %v870_v9 = vmul.f32 %v4718_v43, %v4857_v8 }
 0x335   : > { %647 = vrot.lane.b32.xlu1 %v640_v22, %s4185_s25  ;;  %v933_v22 = vmul.f32 %v4722_v45, %v4857_v8  ;;  %v1003_v45 = vmul.f32 %v4734_v52, %v4852_v54 }
 0x339   : > { %672 = vrot.lane.b32.xlu1 %v665_v27, %s4186_s2  ;;  %v956_v27 = vmul.f32 %v4724_v47, %v4852_v54 }
 0x33d   : > { %697 = vrot.lane.b32.xlu1 %v690_v35, %s4187_s4  ;;  %v980_v35 = vmul.f32 %v4729_v50, %v4852_v54 }
 0x341   : > { %759 = vrot.lane.b32.xlu1 %v751_v37, %s4183_s17  ;;  %v1004_v37 = vmul.f32 %v4734_v52, %v4857_v8  ;;  %v1114_v52 = vmul.f32 %v4752_v62, %v4852_v54 }
 0x345   : > { %781 = vrot.lane.b32.xlu1 %v774_v18, %s4184_s7  ;;  %v1028_v18 = vmul.f32 %v4738_v55, %v4857_v8 }
 0x349   : > { %805 = vrot.lane.b32.xlu1 %v798_v1, %s4188_s18  ;;  %v1052_v1 = vmul.f32 %v4744_v59, %v4857_v8 }
 0x34d   : > { %829 = vrot.lane.b32.xlu1 %v822_v2, %s4185_s25  ;;  %v1115_v2 = vmul.f32 %v4752_v62, %v4857_v8 }
 0x351   : > { %853 = vrot.lane.b32.xlu1 %v846_v3, %s4186_s2  ;;  %v1138_v3 = vmul.f32 %v4754_v5, %v4852_v54 }
 0x355   : > { %877 = vrot.lane.b32.xlu1 %v870_v9, %s4187_s4  ;;  %v1162_v9 = vmul.f32 %v4781_v44, %v4857_v8 }
 0x359   : > { %941 = vrot.lane.b32.xlu1 %v933_v22, %s4183_s17  ;;  %v1180_v22 = vmul.f32 %v4809_v21, %v4852_v54 }
 0x35d   : > { %963 = vrot.lane.b32.xlu1 %v956_v27, %s4184_s7  ;;  %v1181_v27 = vmul.f32 %v4809_v21, %v4857_v8 }
 0x361   : > { %987 = vrot.lane.b32.xlu1 %v980_v35, %s4188_s18  ;;  %v1205_v35 = vmul.f32 %v4815_v20, %v4857_v8 }
 0x365   : > { %1011 = vrot.lane.b32.xlu1 %v1004_v37, %s4185_s25  ;;  %v1229_v37 = vmul.f32 %v4819_v19, %v4857_v8 }
 0x369   : > { %1035 = vrot.lane.b32.xlu1 %v1028_v18, %s4186_s2  ;;  %v4940_v18 = vpop.permute.xlu1 %1280 }
 0x36a   : > { %6665 = vst [vmem:[#allocation39_spill] sm:$0xff] %v4940_v18  ;;  %v6534_v18 = vmov 19  }
 0x36d   : > { %1059 = vrot.lane.b32.xlu1 %v1052_v1, %s4187_s4  ;;  %v1276_v1 = vmul.f32 %v4823_v17, %v4857_v8 }
 0x371   : > { %1123 = vrot.lane.b32.xlu1 %v1115_v2, %s4183_s17  ;;  %v6525_v2 = vmov 5  }
 0x372   : > { %3752 = vset.pattern.permute.xlu0 %v6525_v2 }
 0x375   : > { %1145 = vrot.lane.b32.xlu1 %v1138_v3, %s4184_s7  ;;  %v1299_v3 = vmul.f32 %v4843_v14, %v4852_v54 }
 0x379   : > { %1167 = vrot.lane.b32.xlu1 %v1162_v9, %s4188_s18 }
 0x37d   : > { %1186 = vrot.lane.b32.xlu1 %v1180_v22, %s4185_s25  ;;  %v1323_v22 = vmul.f32 %v4837_v15, %v4857_v8 }
 0x381   : > { %1188 = vrot.lane.b32.xlu1 %v1181_v27, %s4185_s25  ;;  %v4946_v21 = vpop.permute.xlu1 %1304 }
 0x382   : > { %6666 = vst [vmem:[#allocation40_spill] sm:$0xff] %v4946_v21 }
 0x385   : > { %1212 = vrot.lane.b32.xlu1 %v1205_v35, %s4186_s2 }
 0x389   : > { %1236 = vrot.lane.b32.xlu1 %v1229_v37, %s4187_s4 }
 0x38d   : > { %1284 = vrot.lane.b32.xlu1 %v1276_v1, %s4183_s17 }
 0x391   : > { %1306 = vrot.lane.b32.xlu1 %v1299_v3, %s4184_s7 }
 0x392   : > { %v4952_v9 = vpop.permute.xlu1 %1343 }
 0x393   : > { %v1348_v27 = vmul.f32 0.0, %v4952_v9  ;;  %v1347_v35 = vmul.f32 %v4952_v9, %v4857_v8 }
 0x395   : > { %1356 = vrot.lane.b32.xlu0 %v1348_v27, %s4185_s25  ;;  %1330 = vrot.lane.b32.xlu1 %v1323_v22, %s4188_s18  ;;  %v613_v27 = vmul.f32 %v4689_v57, %v4857_v8 }
 0x397   : > { %v4961_v37 = vpop.permute.xlu1 %1367 }
 0x398   : > { %v1372_v1 = vmul.f32 0.0, %v4961_v37  ;;  %v1371_v3 = vmul.f32 %v4961_v37, %v4857_v8 }
 0x399   : > { %1354 = vrot.lane.b32.xlu1 %v1347_v35, %s4185_s25 }
 0x39a   : > { %1380 = vrot.lane.b32.xlu0 %v1372_v1, %s4186_s2  ;;  %v664_v1 = vmul.f32 %v4682_v46, %v4852_v54  ;;  %v775_v46 = vmul.f32 %v4703_v6, %v4857_v8  ;;  %v845_v6 = vmul.f32 %v4712_v40, %v4852_v54  ;;  %v957_v40 = vmul.f32 %v4724_v47, %v4857_v8 }
 0x39b   : > { %v1027_v47 = vmul.f32 %v4738_v55, %v4852_v54  ;;  %v1139_v55 = vmul.f32 %v4754_v5, %v4857_v8 }
 0x39c   : > { %v4968_v2 = vpop.permute.xlu1 %1391 }
 0x39d   : > { %1378 = vrot.lane.b32.xlu1 %v1371_v3, %s4186_s2  ;;  %v689_v3 = vmul.f32 %v4686_v53, %v4852_v54  ;;  %v799_v53 = vmul.f32 %v4700_v4, %v4857_v8  ;;  %v869_v4 = vmul.f32 %v4718_v43, %v4852_v54  ;;  %v981_v43 = vmul.f32 %v4729_v50, %v4857_v8 }
 0x39e   : > { %621 = vrot.lane.b32.xlu0 %v613_v27, %s4188_s18  ;;  %v1051_v50 = vmul.f32 %v4744_v59, %v4852_v54 }
 0x3a0   : > { %v4974_v22 = vpop.permute.xlu1 %569 }
 0x3a1   : > { %1453 = vperm.xlu1 %3753, %v4602_v0  }
 0x3a2   : > { %645 = vrot.lane.b32.xlu0 %v639_v10, %s4185_s25 }
 0x3a4   : > { %v4980_v35 = vpop.permute.xlu1 %571 }
 0x3a5   : > { %6667 = vst [vmem:[#allocation41_spill] sm:$0xff] %v4980_v35 }
 0x3a6   : > { %670 = vrot.lane.b32.xlu0 %v664_v1, %s4186_s2 }
 0x3a8   : > { %v4985_v57 = vpop.permute.xlu1 %594 }
 0x3a9   : > { %6668 = vst [vmem:[#allocation42_spill] sm:$0xff] %v4985_v57 }
 0x3aa   : > { %695 = vrot.lane.b32.xlu0 %v689_v3, %s4187_s4 }
 0x3ac   : > { %v4990_v27 = vpop.permute.xlu1 %596 }
 0x3ad   : > { %6669 = vst [vmem:[#allocation43_spill] sm:$0xff] %v4990_v27 }
 0x3ae   : > { %757 = vrot.lane.b32.xlu0 %v750_v39, %s4183_s17 }
 0x3b0   : > { %v4995_v10 = vpop.permute.xlu1 %619 }
 0x3b1   : > { %6670 = vst [vmem:[#allocation44_spill] sm:$0xff] %v4995_v10 }
 0x3b2   : > { %783 = vrot.lane.b32.xlu0 %v775_v46, %s4184_s7 }
 0x3b4   : > { %v5000_v1 = vpop.permute.xlu1 %647 }
 0x3b6   : > { %807 = vrot.lane.b32.xlu0 %v799_v53, %s4188_s18 }
 0x3b8   : > { %v5005_v3 = vpop.permute.xlu1 %672 }
 0x3ba   : > { %827 = vrot.lane.b32.xlu0 %v821_v60, %s4185_s25 }
 0x3bc   : > { %v5010_v39 = vpop.permute.xlu1 %697 }
 0x3be   : > { %851 = vrot.lane.b32.xlu0 %v845_v6, %s4186_s2 }
 0x3c0   : > { %v5015_v46 = vpop.permute.xlu1 %759 }
 0x3c1   : > { %6671 = vst [vmem:[#allocation45_spill] sm:$0xff] %v5015_v46 }
 0x3c2   : > { %875 = vrot.lane.b32.xlu0 %v869_v4, %s4187_s4 }
 0x3c4   : > { %v5020_v53 = vpop.permute.xlu1 %781 }
 0x3c5   : > { %6672 = vst [vmem:[#allocation46_spill] sm:$0xff] %v5020_v53 }
 0x3c6   : > { %939 = vrot.lane.b32.xlu0 %v932_v36, %s4183_s17 }
 0x3c8   : > { %v5025_v60 = vpop.permute.xlu1 %805 }
 0x3c9   : > { %6673 = vst [vmem:[#allocation47_spill] sm:$0xff] %v5025_v60 }
 0x3ca   : > { %965 = vrot.lane.b32.xlu0 %v957_v40, %s4184_s7 }
 0x3cc   : > { %v5030_v6 = vpop.permute.xlu1 %829 }
 0x3ce   : > { %989 = vrot.lane.b32.xlu0 %v981_v43, %s4188_s18 }
 0x3d0   : > { %v5035_v4 = vpop.permute.xlu1 %853 }
 0x3d2   : > { %1009 = vrot.lane.b32.xlu0 %v1003_v45, %s4185_s25 }
 0x3d4   : > { %v5040_v36 = vpop.permute.xlu1 %877 }
 0x3d6   : > { %1033 = vrot.lane.b32.xlu0 %v1027_v47, %s4186_s2  ;;  %v1161_v47 = vmul.f32 %v4781_v44, %v4852_v54  ;;  %v1275_v44 = vmul.f32 %v4823_v17, %v4852_v54  ;;  %v1346_v17 = vmul.f32 %v4952_v9, %v4852_v54 }
 0x3d8   : > { %v5045_v40 = vpop.permute.xlu1 %941 }
 0x3d9   : > { %6674 = vst [vmem:[#allocation48_spill] sm:$0xff] %v5045_v40 }
 0x3da   : > { %1057 = vrot.lane.b32.xlu0 %v1051_v50, %s4187_s4  ;;  %v1204_v50 = vmul.f32 %v4815_v20, %v4852_v54  ;;  %v1300_v20 = vmul.f32 %v4843_v14, %v4857_v8  ;;  %v1370_v14 = vmul.f32 %v4961_v37, %v4852_v54 }
 0x3dc   : > { %v5050_v43 = vpop.permute.xlu1 %963 }
 0x3dd   : > { %6675 = vst [vmem:[#allocation49_spill] sm:$0xff] %v5050_v43 }
 0x3de   : > { %1121 = vrot.lane.b32.xlu0 %v1114_v52, %s4183_s17  ;;  %v1228_v52 = vmul.f32 %v4819_v19, %v4852_v54  ;;  %v1322_v19 = vmul.f32 %v4837_v15, %v4852_v54  ;;  %v1394_v15 = vmul.f32 %v4968_v2, %v4852_v54 }
 0x3e0   : > { %v5055_v45 = vpop.permute.xlu1 %987 }
 0x3e1   : > { %6676 = vst [vmem:[#allocation50_spill] sm:$0xff] %v5055_v45 }
 0x3e2   : > { %1147 = vrot.lane.b32.xlu0 %v1139_v55, %s4184_s7 }
 0x3e4   : > { %v5062_v59 = vpop.permute.xlu1 %1011 }
 0x3e6   : > { %1165 = vrot.lane.b32.xlu0 %v1161_v47, %s4188_s18 }
 0x3e8   : > { %v5067_v62 = vpop.permute.xlu1 %1035 }
 0x3e9   : > { %6677 = vst [vmem:[#allocation51_spill] sm:$0xff] %v5067_v62 }
 0x3ea   : > { %1210 = vrot.lane.b32.xlu0 %v1204_v50, %s4186_s2 }
 0x3ec   : > { %v5072_v5 = vpop.permute.xlu1 %1059 }
 0x3ed   : > { %6678 = vst [vmem:[#allocation52_spill] sm:$0xff] %v5072_v5 }
 0x3ee   : > { %1234 = vrot.lane.b32.xlu0 %v1228_v52, %s4187_s4 }
 0x3f0   : > { %v5077_v55 = vpop.permute.xlu1 %1123 }
 0x3f2   : > { %1282 = vrot.lane.b32.xlu0 %v1275_v44, %s4183_s17 }
 0x3f4   : > { %v5082_v47 = vpop.permute.xlu1 %1145 }
 0x3f5   : > { %6679 = vst [vmem:[#allocation53_spill] sm:$0xff] %v5082_v47 }
 0x3f6   : > { %1308 = vrot.lane.b32.xlu0 %v1300_v20, %s4184_s7  ;;  %v5100_v20 = vpop.permute.xlu0 %1332 }
 0x3f8   : > { %v5087_v50 = vpop.permute.xlu1 %1167 }
 0x3fa   : > { %1328 = vrot.lane.b32.xlu0 %v1322_v19, %s4188_s18 }
 0x3fc   : > { %v5092_v52 = vpop.permute.xlu1 %1186 }
 0x3fd   : > { %6680 = vst [vmem:[#allocation54_spill] sm:$0xff] %v5092_v52 }
 0x3fe   : > { %1352 = vrot.lane.b32.xlu0 %v1346_v17, %s4185_s25  ;;  %v1396_v17 = vmul.f32 0.0, %v4968_v2 }
 0x400   : > { %v5097_v44 = vpop.permute.xlu1 %1188 }
 0x401   : > { %6681 = vst [vmem:[#allocation55_spill] sm:$0xff] %v5097_v44 }
 0x402   : > { %1376 = vrot.lane.b32.xlu0 %v1370_v14, %s4186_s2 }
 0x404   : > { %v5104_v19 = vpop.permute.xlu1 %1212 }
 0x405   : > { %6682 = vst [vmem:[#allocation56_spill] sm:$0xff] %v5104_v19 }
 0x406   : > { %1400 = vrot.lane.b32.xlu0 %v1394_v15, %s4187_s4 }
 0x407   : > { %v5107_v9 = vpop.permute.xlu0 %1356 }
 0x408   : > { %v5110_v11 = vpop.permute.xlu1 %1236 }
 0x409   : > { %6683 = vst [vmem:[#allocation57_spill] sm:$0xff] %v5110_v11 }
 0x40a   : > { %1404 = vrot.lane.b32.xlu0 %v1396_v17, %s4187_s4 }
 0x40c   : > { %v5113_v37 = vpop.permute.xlu0 %1380  ;;  %v5115_v14 = vpop.permute.xlu1 %1284 }
 0x40d   : > { %6684 = vst [vmem:[#allocation58_spill] sm:$0xff] %v5113_v37  ;;  %6685 = vst [vmem:[#allocation59_spill] sm:$0xff] %v5115_v14 }
 0x40e   : > { %1446 = vperm.xlu0 %3752, %v4602_v0  }
 0x410   : > { %v5118_v21 = vpop.permute.xlu0 %621  ;;  %v5120_v52 = vpop.permute.xlu1 %1306 }
 0x411   : > { %6686 = vst [vmem:[#allocation60_spill] sm:$0xff] %v5120_v52 }
 0x412   : > { %3754 = vset.pattern.permute.xlu0 %v6534_v18 }
 0x414   : > { %v5123_v15 = vpop.permute.xlu0 %645  ;;  %v5125_v45 = vpop.permute.xlu1 %1330 }
 0x415   : > { %6687 = vst [vmem:[#allocation61_spill] sm:$0xff] %v5123_v15  ;;  %6688 = vst [vmem:[#allocation62_spill] sm:$0xff] %v5125_v45 }
 0x418   : > { %v5127_v47 = vpop.permute.xlu0 %670  ;;  %v5129_v17 = vpop.permute.xlu1 %1354 }
 0x419   : > { %6689 = vst [vmem:[#allocation63_spill] sm:$0xff] %v5127_v47  ;;  %6690 = vst [vmem:[#allocation64_spill] sm:$0xff] %v5129_v17  ;;  %v1395_v47 = vmul.f32 %v4968_v2, %v4857_v8 }
 0x41c   : > { %v5131_v43 = vpop.permute.xlu0 %695  ;;  %v5133_v41 = vpop.permute.xlu1 %1378 }
 0x41d   : > { %6691 = vst [vmem:[#allocation65_spill] sm:$0xff] %v5131_v43  ;;  %6692 = vst [vmem:[#allocation66_spill] sm:$0xff] %v5133_v41 }
 0x420   : > { %v5135_v60 = vpop.permute.xlu0 %757  ;;  %v1454_v26 = vpop.permute.xlu1 %1453 }
 0x421   : > { %6693 = vst [vmem:[#allocation67_spill] sm:$0xff] %v5135_v60  ;;  %v1456_v30 = vmul.f32 0.0, %v1454_v26  ;;  %v1457_v52 = vmul.f32 %v1454_v26, %v4852_v54  ;;  %v1458_v15 = vmul.f32 %v1454_v26, %v4857_v8 }
 0x423   : > { %1462 = vrot.lane.b32.xlu1 %v1456_v30, %s4183_s17  ;;  %1464 = vrot.lane.b32.xlu0 %v1457_v52, %s4183_s17  ;;  %v6542_v30 = vmov 26  }
 0x424   : > { %v5140_v18 = vpop.permute.xlu0 %783  ;;  %3755 = vset.pattern.permute.xlu1 %v6542_v30 }
 0x425   : > { %6694 = vst [vmem:[#allocation68_spill] sm:$0xff] %v5140_v18 }
 0x427   : > { %1402 = vrot.lane.b32.xlu1 %v1395_v47, %s4187_s4  ;;  %1477 = vperm.xlu0 %3754, %v4602_v0  }
 0x428   : > { %v5146_v43 = vpop.permute.xlu0 %807 }
 0x42b   : > { %1466 = vrot.lane.b32.xlu1 %v1458_v15, %s4183_s17 }
 0x42c   : > { %v5150_v53 = vpop.permute.xlu0 %827 }
 0x42d   : > { %6695 = vst [vmem:[#allocation69_spill] sm:$0xff] %v5150_v53 }
 0x430   : > { %v5153_v52 = vpop.permute.xlu0 %851 }
 0x431   : > { %6696 = vst [vmem:[#allocation70_spill] sm:$0xff] %v5153_v52 }
 0x434   : > { %v5155_v28 = vpop.permute.xlu0 %875 }
 0x435   : > { %6697 = vst [vmem:[#allocation71_spill] sm:$0xff] %v5155_v28 }
 0x438   : > { %v5157_v2 = vpop.permute.xlu0 %939 }
 0x439   : > { %6698 = vst [vmem:[#allocation72_spill] sm:$0xff] %v5157_v2 }
 0x43c   : > { %v5159_v47 = vpop.permute.xlu0 %965 }
 0x440   : > { %v5161_v31 = vpop.permute.xlu0 %989 }
 0x444   : > { %v5163_v10 = vpop.permute.xlu0 %1009 }
 0x445   : > { %6699 = vst [vmem:[#allocation73_spill] sm:$0xff] %v5163_v10 }
 0x448   : > { %v5165_v26 = vpop.permute.xlu0 %1033 }
 0x449   : > { %6700 = vst [vmem:[#allocation74_spill] sm:$0xff] %v5165_v26 }
 0x44c   : > { %v5167_v15 = vpop.permute.xlu0 %1057 }
 0x44d   : > { %6701 = vst [vmem:[#allocation75_spill] sm:$0xff] %v5167_v15 }
 0x450   : > { %v5169_v53 = vpop.permute.xlu0 %1121 }
 0x451   : > { %6702 = vst [vmem:[#allocation76_spill] sm:$0xff] %v5169_v53 }
 0x454   : > { %v5171_v41 = vpop.permute.xlu0 %1147 }
 0x458   : > { %v5173_v30 = vpop.permute.xlu0 %1165 }
 0x459   : > { %6703 = vst [vmem:[#allocation77_spill] sm:$0xff] %v5173_v30 }
 0x45c   : > { %v5175_v52 = vpop.permute.xlu0 %1210 }
 0x45d   : > { %6704 = vst [vmem:[#allocation78_spill] sm:$0xff] %v5175_v52 }
 0x460   : > { %v5177_v28 = vpop.permute.xlu0 %1234 }
 0x461   : > { %6705 = vst [vmem:[#allocation79_spill] sm:$0xff] %v5177_v28 }
 0x464   : > { %v5179_v2 = vpop.permute.xlu0 %1282 }
 0x465   : > { %6706 = vst [vmem:[#allocation80_spill] sm:$0xff] %v5179_v2 }
 0x468   : > { %v5181_v37 = vpop.permute.xlu0 %1308 }
 0x469   : > { %6707 = vst [vmem:[#allocation81_spill] sm:$0xff] %v5181_v37 }
 0x46c   : > { %v5183_v32 = vpop.permute.xlu0 %1328 }
 0x46d   : > { %6708 = vst [vmem:[#allocation82_spill] sm:$0xff] %v5183_v32 }
 0x470   : > { %v5185_v10 = vpop.permute.xlu0 %1352 }
 0x471   : > { %6709 = vst [vmem:[#allocation83_spill] sm:$0xff] %v5185_v10 }
 0x474   : > { %v5187_v26 = vpop.permute.xlu0 %1376 }
 0x475   : > { %6710 = vst [vmem:[#allocation84_spill] sm:$0xff] %v5187_v26 }
 0x478   : > { %v5189_v15 = vpop.permute.xlu0 %1400 }
 0x479   : > { %6711 = vst [vmem:[#allocation85_spill] sm:$0xff] %v5189_v15  ;;  %v6560_v15 = vmov 33  }
 0x47c   : > { %v5191_v53 = vpop.permute.xlu0 %1404 }
 0x47d   : > { %6712 = vst [vmem:[#allocation86_spill] sm:$0xff] %v5191_v53 }
 0x48d   : > { %v5193_v57 = vpop.permute.xlu0 %1446 }
 0x48e   : > { %6713 = vst [vmem:[#allocation87_spill] sm:$0xff] %v5193_v57 }
 0x495   : > { %v5195_v30 = vpop.permute.xlu0 %1464  ;;  %v5204_v26 = vpop.permute.xlu1 %1462 }
 0x496   : > { %6714 = vst [vmem:[#allocation88_spill] sm:$0xff] %v5195_v30  ;;  %6715 = vst [vmem:[#allocation89_spill] sm:$0xff] %v5204_v26  ;;  %v6563_v26 = vmov 40  }
 0x499   : > { %v5206_v32 = vpop.permute.xlu1 %1402 }
 0x49a   : > { %6716 = vst [vmem:[#allocation90_spill] sm:$0xff] %v5206_v32 }
 0x49d   : > { %v5208_v30 = vpop.permute.xlu1 %1466 }
 0x49e   : > { %6717 = vst [vmem:[#allocation91_spill] sm:$0xff] %v5208_v30 }
 0x4a6   : > { %v1478_v52 = vpop.permute.xlu0 %1477 }
 0x4a7   : > { %v1480_v28 = vmul.f32 0.0, %v1478_v52  ;;  %v1482_v2 = vmul.f32 %v1478_v52, %v4857_v8  ;;  %v1481_v10 = vmul.f32 %v1478_v52, %v4852_v54 }
 0x4a9   : > { %1486 = vrot.lane.b32.xlu1 %v1480_v28, %s4184_s7  ;;  %1490 = vrot.lane.b32.xlu0 %v1482_v2, %s4184_s7 }
 0x4ad   : > { %1488 = vrot.lane.b32.xlu1 %v1481_v10, %s4184_s7 }
 0x4b1   : > { %1501 = vperm.xlu1 %3755, %v4602_v0  }
 0x4b5   : > { %3756 = vset.pattern.permute.xlu1 %v6560_v15 }
 0x51b   : > { %v5210_v53 = vpop.permute.xlu1 %1486 }
 0x51c   : > { %6718 = vst [vmem:[#allocation92_spill] sm:$0xff] %v5210_v53 }
 0x51f   : > { %v5212_v28 = vpop.permute.xlu1 %1488 }
 0x520   : > { %6719 = vst [vmem:[#allocation93_spill] sm:$0xff] %v5212_v28 }
 0x530   : > { %v1502_v2 = vpop.permute.xlu1 %1501 }
 0x531   : > { %v1504_v52 = vmul.f32 %v1502_v2, %v4852_v54  ;;  %v1505_v10 = vmul.f32 %v1502_v2, %v4857_v8  ;;  %v1506_v15 = vmul.f32 0.0, %v1502_v2 }
 0x533   : > { %1512 = vrot.lane.b32.xlu1 %v1505_v10, %s4188_s18  ;;  %1510 = vrot.lane.b32.xlu0 %v1504_v52, %s4188_s18 }
 0x537   : > { %1525 = vperm.xlu1 %3756, %v4602_v0   ;;  %1514 = vrot.lane.b32.xlu0 %v1506_v15, %s4188_s18  ;;  %v6565_v15 = vmov 47  }
 0x53b   : > { %3757 = vset.pattern.permute.xlu1 %v6563_v26 }
 0x5a5   : > { %v5221_v53 = vpop.permute.xlu1 %1512 }
 0x5a6   : > { %6720 = vst [vmem:[#allocation94_spill] sm:$0xff] %v5221_v53 }
 0x5b6   : > { %v1526_v28 = vpop.permute.xlu1 %1525 }
 0x5b7   : > { %v1528_v32 = vmul.f32 %v1526_v28, %v4852_v54  ;;  %v1529_v49 = vmul.f32 %v1526_v28, %v4857_v8  ;;  %v1530_v52 = vmul.f32 0.0, %v1526_v28  ;;  %v6566_v28 = vmov 6  }
 0x5b8   : > { %3759 = vset.pattern.permute.xlu0 %v6566_v28 }
 0x5b9   : > { %1536 = vrot.lane.b32.xlu1 %v1529_v49, %s4185_s25  ;;  %1534 = vrot.lane.b32.xlu0 %v1528_v32, %s4185_s25  ;;  %v5236_v49 = vld [vmem:[#allocation10] sm:$0xff] }
 0x5bd   : > { %1549 = vperm.xlu1 %3757, %v4602_v0   ;;  %1538 = vrot.lane.b32.xlu0 %v1530_v52, %s4185_s25  ;;  %v6567_v0 = vmov 13  }
 0x5c1   : > { %3758 = vset.pattern.permute.xlu1 %v6565_v15 }
 0x62b   : > { %v5230_v2 = vpop.permute.xlu1 %1536 }
 0x62c   : > { %6721 = vst [vmem:[#allocation95_spill] sm:$0xff] %v5230_v2 }
 0x63c   : > { %v1550_v10 = vpop.permute.xlu1 %1549 }
 0x63d   : > { %v1552_v26 = vmul.f32 %v1550_v10, %v4852_v54  ;;  %v1553_v53 = vmul.f32 %v1550_v10, %v4857_v8  ;;  %v1554_v32 = vmul.f32 0.0, %v1550_v10 }
 0x63f   : > { %1560 = vrot.lane.b32.xlu1 %v1553_v53, %s4186_s2  ;;  %1558 = vrot.lane.b32.xlu0 %v1552_v26, %s4186_s2 }
 0x643   : > { %1573 = vperm.xlu1 %3758, %v5236_v49   ;;  %1562 = vrot.lane.b32.xlu0 %v1554_v32, %s4186_s2  ;;  %v6570_v32 = vmov 20  }
 0x647   : > { %3760 = vset.pattern.permute.xlu1 %v6567_v0 }
 0x6b1   : > { %v5242_v52 = vpop.permute.xlu1 %1560 }
 0x6b2   : > { %6722 = vst [vmem:[#allocation96_spill] sm:$0xff] %v5242_v52 }
 0x6c2   : > { %v1574_v15 = vpop.permute.xlu1 %1573 }
 0x6c3   : > { %v1576_v53 = vmul.f32 %v1574_v15, %v4852_v54  ;;  %v1577_v26 = vmul.f32 %v1574_v15, %v4857_v8  ;;  %v1578_v10 = vmul.f32 0.0, %v1574_v15 }
 0x6c5   : > { %1584 = vrot.lane.b32.xlu1 %v1577_v26, %s4187_s4  ;;  %1582 = vrot.lane.b32.xlu0 %v1576_v53, %s4187_s4  ;;  %v6724_v53 = vmov 0   ;;  %v6574_v26 = vmov 27  }
 0x6c9   : > { %1635 = vperm.xlu1 %3760, %v5236_v49   ;;  %1586 = vrot.lane.b32.xlu0 %v1578_v10, %s4187_s4  ;;  %v5262_v10 = vpop.permute.xlu0 %1490 }
 0x6ca   : > { %6725 = vst [vmem:[#allocation98_spill] sm:$0xff] %v5262_v10 }
 0x6cd   : > { %1628 = vperm.xlu0 %3759, %v5236_v49   ;;  %3762 = vset.pattern.permute.xlu1 %v6574_v26 }
 0x6d1   : > { %3761 = vset.pattern.permute.xlu0 %v6570_v32  ;;  %v5264_v32 = vpop.permute.xlu0 %1510 }
 0x6d2   : > { %6726 = vst [vmem:[#allocation99_spill] sm:$0xff] %v5264_v32 }
 0x737   : > { %v5252_v28 = vpop.permute.xlu1 %1584 }
 0x738   : > { %6723 = vst [vmem:[#allocation97_spill] sm:$0xff] %v5252_v28  ;;  %v5266_v28 = vpop.permute.xlu0 %1514 }
 0x739   : > { %6727 = vst [vmem:[#allocation100_spill] sm:$0xff] %v5266_v28 }
 0x748   : > { %v1636_v0 = vpop.permute.xlu1 %1635 }
 0x749   : > { %v1638_v52 = vmul.f32 0.0, %v1636_v0  ;;  %v1639_v2 = vmul.f32 %v1636_v0, %v4852_v54  ;;  %v1640_v15 = vmul.f32 %v1636_v0, %v4857_v8 }
 0x74b   : > { %1644 = vrot.lane.b32.xlu1 %v1638_v52, %s4183_s17  ;;  %1646 = vrot.lane.b32.xlu0 %v1639_v2, %s4183_s17  ;;  %v5268_v52 = vpop.permute.xlu0 %1534 }
 0x74c   : > { %6728 = vst [vmem:[#allocation101_spill] sm:$0xff] %v5268_v52 }
 0x74f   : > { %1648 = vrot.lane.b32.xlu1 %v1640_v15, %s4183_s17  ;;  %1659 = vperm.xlu0 %3761, %v5236_v49   ;;  %v5270_v2 = vpop.permute.xlu0 %1538 }
 0x753   : > { %3766 = vset.pattern.permute.xlu0 %v6724_v53  ;;  %v5272_v0 = vpop.permute.xlu0 %1558 }
 0x754   : > { %6729 = vst [vmem:[#allocation102_spill] sm:$0xff] %v5272_v0 }
 0x757   : > { %v5274_v15 = vpop.permute.xlu0 %1562 }
 0x75b   : > { %v5276_v60 = vpop.permute.xlu0 %1582 }
 0x75c   : > { %6730 = vst [vmem:[#allocation103_spill] sm:$0xff] %v5276_v60  ;;  %v6582_v60 = vmov 34  }
 0x75f   : > { %v5278_v53 = vpop.permute.xlu0 %1586 }
 0x760   : > { %6731 = vst [vmem:[#allocation104_spill] sm:$0xff] %v5278_v53 }
 0x763   : > { %v5280_v11 = vpop.permute.xlu0 %1628 }
 0x764   : > { %6732 = vst [vmem:[#allocation105_spill] sm:$0xff] %v5280_v11 }
 0x7bd   : > { %v5282_v26 = vpop.permute.xlu0 %1646  ;;  %v5291_v11 = vpop.permute.xlu1 %1644 }
 0x7be   : > { %6733 = vst [vmem:[#allocation106_spill] sm:$0xff] %v5282_v26  ;;  %6734 = vst [vmem:[#allocation107_spill] sm:$0xff] %v5291_v11  ;;  %v926_v11 = vmul.f32 %v4716_v42, %v4857_v8 }
 0x7c1   : > { %v5293_v26 = vpop.permute.xlu1 %1648 }
 0x7c2   : > { %6735 = vst [vmem:[#allocation108_spill] sm:$0xff] %v5293_v26 }
 0x7ce   : > { %v1660_v10 = vpop.permute.xlu0 %1659 }
 0x7cf   : > { %v1662_v32 = vmul.f32 0.0, %v1660_v10  ;;  %v1664_v28 = vmul.f32 %v1660_v10, %v4857_v8  ;;  %v1663_v0 = vmul.f32 %v1660_v10, %v4852_v54 }
 0x7d1   : > { %1668 = vrot.lane.b32.xlu1 %v1662_v32, %s4184_s7  ;;  %1672 = vrot.lane.b32.xlu0 %v1664_v28, %s4184_s7 }
 0x7d5   : > { %1670 = vrot.lane.b32.xlu1 %v1663_v0, %s4184_s7 }
 0x7d9   : > { %1683 = vperm.xlu1 %3762, %v5236_v49  }
 0x7dd   : > { %3763 = vset.pattern.permute.xlu1 %v6582_v60  ;;  %v6585_v60 = vmov 41  }
 0x843   : > { %v5295_v52 = vpop.permute.xlu1 %1668 }
 0x844   : > { %6736 = vst [vmem:[#allocation109_spill] sm:$0xff] %v5295_v52  ;;  %v556_v52 = vmul.f32 %v4668_v34, %v4857_v8 }
 0x847   : > { %v5297_v53 = vpop.permute.xlu1 %1670 }
 0x848   : > { %6737 = vst [vmem:[#allocation110_spill] sm:$0xff] %v5297_v53  ;;  %v581_v53 = vadd.f32 %v4980_v35, %v556_v52 }
 0x84a   : > { %v606_v26 = vadd.f32 %v4990_v27, %v581_v53  ;;  %v1108_v53 = vmul.f32 %v4742_v58, %v4857_v8 }
 0x858   : > { %v1684_v32 = vpop.permute.xlu1 %1683 }
 0x859   : > { %v1686_v28 = vmul.f32 %v1684_v32, %v4852_v54  ;;  %v1687_v10 = vmul.f32 %v1684_v32, %v4857_v8  ;;  %v1688_v0 = vmul.f32 0.0, %v1684_v32  ;;  %v631_v32 = vadd.f32 %v5118_v21, %v606_v26 }
 0x85a   : > { %v950_v26 = vadd.f32 %v5045_v40, %v926_v11  ;;  %v834_v11 = vsel %vm651_vm0, %v5030_v6, %v4779_v48  ;;  %v858_v48 = vsel %vm676_vm1, %v5035_v4, %v4783_v33  ;;  %v882_v33 = vsel %vm701_vm2, %v5040_v36, %v4787_v51 }
 0x85b   : > { %1694 = vrot.lane.b32.xlu1 %v1687_v10, %s4188_s18  ;;  %1692 = vrot.lane.b32.xlu0 %v1686_v28, %s4188_s18  ;;  %v744_v10 = vmul.f32 %v4697_v63, %v4857_v8 }
 0x85f   : > { %1707 = vperm.xlu1 %3763, %v5236_v49   ;;  %1696 = vrot.lane.b32.xlu0 %v1688_v0, %s4188_s18  ;;  %v768_v0 = vadd.f32 %v5015_v46, %v744_v10 }
 0x861   : > { %v792_v52 = vadd.f32 %v5140_v18, %v768_v0  ;;  %v1132_v0 = vadd.f32 %v5077_v55, %v1108_v53  ;;  %v974_v18 = vadd.f32 %v5159_v47, %v950_v26  ;;  %v1269_v53 = vmul.f32 %v4840_v24, %v4857_v8 }
 0x863   : > { %3764 = vset.pattern.permute.xlu1 %v6585_v60  ;;  %v653_v60 = vsel %vm651_vm0, %v5000_v1, %v4771_v61  ;;  %v678_v61 = vsel %vm676_vm1, %v5005_v3, %v4773_v7  ;;  %v1156_v40 = vadd.f32 %v5171_v41, %v1132_v0  ;;  %v6592_v0 = vmov 48  }
 0x864   : > { %v659_v27 = vadd.f32 %v653_v60, %v631_v32 }
 0x865   : > { %v1175_v26 = vadd.f32 %v5087_v50, %v1156_v40 }
 0x866   : > { %v684_v60 = vadd.f32 %v678_v61, %v659_v27 }
 0x8cd   : > { %v5313_v28 = vpop.permute.xlu1 %1694 }
 0x8ce   : > { %6738 = vst [vmem:[#allocation111_spill] sm:$0xff] %v5313_v28  ;;  %v816_v28 = vadd.f32 %v5146_v43, %v792_v52  ;;  %v998_v52 = vadd.f32 %v5161_v31, %v974_v18  ;;  %v1016_v18 = vsel %vm651_vm0, %v5062_v59, %v4795_v25  ;;  %v1040_v25 = vsel %vm676_vm1, %v5067_v62, %v4799_v29 }
 0x8cf   : > { %v1064_v29 = vsel %vm701_vm2, %v5072_v5, %v4805_v23  ;;  %v574_v23 = vsel %vm573_vm4, %v4769_v56, %v4974_v22  ;;  %v6745_v56 = vld [vmem:[#allocation42_spill] sm:$0xff] }
 0x8d0   : > { %v840_v32 = vadd.f32 %v834_v11, %v816_v28  ;;  %v1022_v28 = vadd.f32 %v1016_v18, %v998_v52  ;;  %v1451_v52 = vmul.f32 %v5193_v57, %v4857_v8 }
 0x8d2   : > { %v864_v27 = vadd.f32 %v858_v48, %v840_v32  ;;  %v1046_v40 = vadd.f32 %v1040_v25, %v1022_v28  ;;  %v1335_v32 = vsel %vm623_vm3, %v5125_v45, %v5100_v20  ;;  %v1359_v20 = vsel %vm651_vm0, %v5129_v17, %v5107_v9  ;;  %v6742_v9 = vld [vmem:[#allocation100_spill] sm:$0xff]  ;;  %v6744_v25 = vld [vmem:[#allocation98_spill] sm:$0xff] }
 0x8d3   : > { %v1475_v48 = vadd.f32 %v5208_v30, %v1451_v52  ;;  %v6767_v30 = vld [vmem:[#allocation35_spill] sm:$0xff] }
 0x8de   : > { %v1708_v35 = vpop.permute.xlu1 %1707 }
 0x8df   : > { %v1710_v10 = vmul.f32 %v1708_v35, %v4852_v54  ;;  %v1711_v46 = vmul.f32 %v1708_v35, %v4857_v8  ;;  %v1712_v7 = vmul.f32 0.0, %v1708_v35  ;;  %v1293_v35 = vadd.f32 %v5115_v14, %v1269_v53  ;;  %v6792_v14 = vld [vmem:[#allocation79_spill] sm:$0xff] }
 0x8e1   : > { %1718 = vrot.lane.b32.xlu1 %v1711_v46, %s4185_s25  ;;  %1716 = vrot.lane.b32.xlu0 %v1710_v10, %s4185_s25  ;;  %v703_v46 = vsel %vm701_vm2, %v5010_v39, %v4775_v38  ;;  %v1317_v61 = vadd.f32 %v5181_v37, %v1293_v35  ;;  %v1193_v38 = vsel %vm651_vm0, %v5097_v44, %v4831_v13  ;;  %v6740_v35 = vld [vmem:[#allocation67_spill] sm:$0xff]  ;;  %v6782_v37 = vld [vmem:[#allocation54_spill] sm:$0xff]  ;;  %v6783_v44 = vld [vmem:[#allocation60_spill] sm:$0xff] }
 0x8e2   : > { %v709_v10 = vadd.f32 %v703_v46, %v684_v60  ;;  %v1199_v11 = vadd.f32 %v1193_v38, %v1175_v26  ;;  %v888_v60 = vadd.f32 %v882_v33, %v864_v27  ;;  %v1217_v13 = vsel %vm676_vm1, %v5104_v19, %v4833_v16  ;;  %v6739_v16 = vld [vmem:[#allocation57_spill] sm:$0xff]  ;;  %v6741_v27 = vld [vmem:[#allocation32_spill] sm:$0xff]  ;;  %v6743_v26 = vld [vmem:[#allocation94_spill] sm:$0xff] }
 0x8e3   : > { %v1341_v51 = vadd.f32 %v1335_v32, %v1317_v61  ;;  %v1241_v18 = vsel %vm701_vm2, %v6739_v16, %v4835_v12  ;;  %v761_v28 = vsel %vm573_vm4, %v6741_v27, %v6740_v35  ;;  %v554_v61 = vmul.f32 0.0, %v4668_v34  ;;  %v6747_v12 = vld [vmem:[#allocation58_spill] sm:$0xff] }
 0x8e4   : > { %v1223_v53 = vadd.f32 %v1217_v13, %v1199_v11  ;;  %v742_v33 = vmul.f32 0.0, %v4697_v63  ;;  %v1499_v38 = vadd.f32 %v6744_v25, %v1475_v48  ;;  %v6746_v11 = vld [vmem:[#allocation29_spill] sm:$0xff]  ;;  %v6748_v32 = vld [vmem:[#allocation66_spill] sm:$0xff] }
 0x8e5   : > { %1731 = vperm.xlu1 %3764, %v5236_v49   ;;  %1720 = vrot.lane.b32.xlu0 %v1712_v7, %s4185_s25  ;;  %v1070_v7 = vadd.f32 %v1064_v29, %v1046_v40  ;;  %v1365_v46 = vadd.f32 %v1359_v20, %v1341_v51  ;;  %v1383_v51 = vsel %vm676_vm1, %v6748_v32, %v6747_v12  ;;  %v6749_v29 = vld [vmem:[#allocation86_spill] sm:$0xff] }
 0x8e6   : > { %v1247_v40 = vadd.f32 %v1241_v18, %v1223_v53  ;;  %v6750_v13 = vld [vmem:[#allocation90_spill] sm:$0xff]  ;;  %v579_v27 = vadd.f32 %v574_v23, %v554_v61  ;;  %v6752_v18 = vld [vmem:[#allocation44_spill] sm:$0xff] }
 0x8e7   : > { %v1407_v52 = vsel %vm701_vm2, %v6750_v13, %v6749_v29  ;;  %v1389_v48 = vadd.f32 %v1383_v51, %v1365_v46  ;;  %v6755_v12 = vld [vmem:[#allocation34_spill] sm:$0xff]  ;;  %v6756_v29 = vld [vmem:[#allocation96_spill] sm:$0xff] }
 0x8e8   : > { %v1565_v13 = vsel %vm676_vm1, %v6756_v29, %v5274_v15  ;;  %v6757_v61 = vld [vmem:[#allocation46_spill] sm:$0xff]  ;;  %v6760_v51 = vld [vmem:[#allocation36_spill] sm:$0xff] }
 0x8e9   : > { %729 = vrot.lane.b32.xlu1 %v709_v10, %s6615_s6  ;;  %v1517_v10 = vsel %vm623_vm3, %v6743_v26, %v6742_v9  ;;  %v766_v9 = vadd.f32 %v761_v28, %v742_v33  ;;  %v6754_v26 = vld [vmem:[#allocation72_spill] sm:$0xff]  ;;  %v1413_v28 = vadd.f32 %v1407_v52, %v1389_v48  ;;  %v6758_v33 = vld [vmem:[#allocation33_spill] sm:$0xff]  ;;  %v6781_v19 = vld [vmem:[#allocation74_spill] sm:$0xff] }
 0x8ea   : > { %3765 = vset.pattern.permute.xlu1 %v6592_v0  ;;  %v1523_v53 = vadd.f32 %v1517_v10, %v1499_v38  ;;  %v943_v32 = vsel %vm573_vm4, %v6755_v12, %v6754_v26  ;;  %v1106_v10 = vmul.f32 0.0, %v4742_v58  ;;  %v785_v38 = vsel %vm598_vm5, %v6758_v33, %v6757_v61  ;;  %v6761_v12 = vld [vmem:[#allocation104_spill] sm:$0xff]  ;;  %v6763_v52 = vld [vmem:[#allocation61_spill] sm:$0xff] }
 0x8eb   : > { %v790_v29 = vadd.f32 %v785_v38, %v766_v9  ;;  %v6765_v33 = vld [vmem:[#allocation28_spill] sm:$0xff] }
 0x8ed   : > { %909 = vrot.lane.b32.xlu1 %v888_v60, %s6613_s22  ;;  %v599_v60 = vsel %vm598_vm5, %v6746_v11, %v6745_v56  ;;  %v6753_v11 = vld [vmem:[#allocation30_spill] sm:$0xff] }
 0x8ee   : > { %v624_v0 = vsel %vm623_vm3, %v6753_v11, %v6752_v18  ;;  %v604_v23 = vadd.f32 %v599_v60, %v579_v27 }
 0x8f0   : > { %v629_v15 = vadd.f32 %v624_v0, %v604_v23 }
 0x8f1   : > { %1091 = vrot.lane.b32.xlu1 %v1070_v7, %s6611_s20  ;;  %v6751_v7 = vld [vmem:[#allocation95_spill] sm:$0xff] }
 0x8f2   : > { %v1541_v20 = vsel %vm651_vm0, %v6751_v7, %v5270_v2  ;;  %v924_v2 = vmul.f32 0.0, %v4716_v42  ;;  %v6762_v7 = vld [vmem:[#allocation97_spill] sm:$0xff] }
 0x8f3   : > { %v1547_v46 = vadd.f32 %v1541_v20, %v1523_v53  ;;  %v1589_v25 = vsel %vm701_vm2, %v6762_v7, %v6761_v12  ;;  %v657_v20 = vadd.f32 %v6763_v52, %v629_v15  ;;  %v6764_v53 = vld [vmem:[#allocation47_spill] sm:$0xff] }
 0x8f4   : > { %v948_v17 = vadd.f32 %v943_v32, %v924_v2  ;;  %v809_v16 = vsel %vm623_vm3, %v6765_v33, %v6764_v53  ;;  %v6768_v12 = vld [vmem:[#allocation63_spill] sm:$0xff]  ;;  %v6770_v2 = vld [vmem:[#allocation37_spill] sm:$0xff] }
 0x8f5   : > { %1255 = vrot.lane.b32.xlu1 %v1247_v40, %s4186_s2  ;;  %v6759_v40 = vld [vmem:[#allocation76_spill] sm:$0xff]  ;;  %v1571_v60 = vadd.f32 %v1565_v13, %v1547_v46  ;;  %v682_v0 = vadd.f32 %v6768_v12, %v657_v20  ;;  %v814_v9 = vadd.f32 %v809_v16, %v790_v29  ;;  %v6769_v13 = vld [vmem:[#allocation53_spill] sm:$0xff]  ;;  %v6774_v15 = vld [vmem:[#allocation31_spill] sm:$0xff] }
 0x8f6   : > { %v1125_v11 = vsel %vm573_vm4, %v6760_v51, %v6759_v40  ;;  %v6766_v51 = vld [vmem:[#allocation49_spill] sm:$0xff]  ;;  %v1149_v23 = vsel %vm598_vm5, %v6770_v2, %v6769_v13  ;;  %v6776_v20 = vld [vmem:[#allocation39_spill] sm:$0xff]  ;;  %v6777_v16 = vld [vmem:[#allocation70_spill] sm:$0xff] }
 0x8f7   : > { %v1130_v27 = vadd.f32 %v1125_v11, %v1106_v10  ;;  %v1595_v48 = vadd.f32 %v1589_v25, %v1571_v60  ;;  %v967_v45 = vsel %vm598_vm5, %v6767_v30, %v6766_v51  ;;  %v6771_v25 = vld [vmem:[#allocation65_spill] sm:$0xff]  ;;  %v6773_v11 = vld [vmem:[#allocation50_spill] sm:$0xff]  ;;  %v6775_v60 = vld [vmem:[#allocation80_spill] sm:$0xff] }
 0x8f8   : > { %v972_v32 = vadd.f32 %v967_v45, %v948_v17  ;;  %v6772_v46 = vld [vmem:[#allocation69_spill] sm:$0xff]  ;;  %v991_v30 = vsel %vm623_vm3, %v6774_v15, %v6773_v11  ;;  %v1286_v45 = vsel %vm573_vm4, %v6776_v20, %v6775_v60  ;;  %v1267_v17 = vmul.f32 0.0, %v4840_v24 }
 0x8f9   : > { %1434 = vrot.lane.b32.xlu1 %v1413_v28, %s6609_s29  ;;  %v707_v28 = vadd.f32 %v6771_v25, %v682_v0  ;;  %v838_v10 = vadd.f32 %v6772_v46, %v814_v9  ;;  %v1154_v38 = vadd.f32 %v1149_v23, %v1130_v27  ;;  %v6778_v33 = vld [vmem:[#allocation77_spill] sm:$0xff]  ;;  %v6779_v0 = vld [vmem:[#allocation71_spill] sm:$0xff]  ;;  %v1449_v20 = vmul.f32 0.0, %v5193_v57  ;;  %v6791_v57 = vld [vmem:[#allocation82_spill] sm:$0xff] }
 0x8fa   : > { %v6780_v27 = vld [vmem:[#allocation73_spill] sm:$0xff]  ;;  %v1291_v7 = vadd.f32 %v1286_v45, %v1267_v17  ;;  %v6789_v17 = vld [vmem:[#allocation92_spill] sm:$0xff] }
 0x8fb   : > { %v862_v29 = vadd.f32 %v6777_v16, %v838_v10  ;;  %v1173_v2 = vadd.f32 %v6778_v33, %v1154_v38  ;;  %v6784_v10 = vld [vmem:[#allocation40_spill] sm:$0xff]  ;;  %v6788_v45 = vld [vmem:[#allocation93_spill] sm:$0xff] }
 0x8fc   : > { %v6785_v38 = vld [vmem:[#allocation88_spill] sm:$0xff] }
 0x8fd   : > { %1616 = vrot.lane.b32.xlu1 %v1595_v48, %s6607_s24  ;;  %v996_v48 = vadd.f32 %v991_v30, %v972_v32  ;;  %v886_v9 = vadd.f32 %v6779_v0, %v862_v29  ;;  %v1197_v5 = vadd.f32 %v6782_v37, %v1173_v2  ;;  %v1310_v32 = vsel %vm598_vm5, %v6784_v10, %v6783_v44  ;;  %v6786_v30 = vld [vmem:[#allocation89_spill] sm:$0xff]  ;;  %v6787_v29 = vld [vmem:[#allocation75_spill] sm:$0xff]  ;;  %v6790_v2 = vld [vmem:[#allocation78_spill] sm:$0xff] }
 0x8fe   : > { %v6793_v44 = vld [vmem:[#allocation83_spill] sm:$0xff] }
 0x8ff   : > { %v1020_v23 = vadd.f32 %v6780_v27, %v996_v48  ;;  %v1315_v48 = vadd.f32 %v1310_v32, %v1291_v7  ;;  %v1221_v37 = vadd.f32 %v6790_v2, %v1197_v5  ;;  %v6796_v32 = vld [vmem:[#allocation85_spill] sm:$0xff]  ;;  %v6798_v2 = vld [vmem:[#allocation102_spill] sm:$0xff] }
 0x901   : > { %725 = vrot.lane.b32.xlu1 %v707_v28, %s6615_s6  ;;  %v1044_v15 = vadd.f32 %v6781_v19, %v1020_v23  ;;  %v1468_v28 = vsel %vm573_vm4, %v6786_v30, %v6785_v38  ;;  %v1492_v23 = vsel %vm598_vm5, %v6789_v17, %v6788_v45  ;;  %v1339_v60 = vadd.f32 %v6791_v57, %v1315_v48  ;;  %v6794_v30 = vld [vmem:[#allocation84_spill] sm:$0xff]  ;;  %v6797_v45 = vld [vmem:[#allocation101_spill] sm:$0xff] }
 0x902   : > { %v1245_v10 = vadd.f32 %v6792_v14, %v1221_v37  ;;  %v6800_v37 = vld [vmem:[#allocation41_spill] sm:$0xff] }
 0x903   : > { %v1068_v24 = vadd.f32 %v6787_v29, %v1044_v15  ;;  %v1363_v19 = vadd.f32 %v6793_v44, %v1339_v60  ;;  %v6795_v15 = vld [vmem:[#allocation99_spill] sm:$0xff] }
 0x904   : > { %v6801_v60 = vld [vmem:[#allocation43_spill] sm:$0xff] }
 0x905   : > { %905 = vrot.lane.b32.xlu1 %v886_v9, %s6613_s22  ;;  %v1473_v9 = vadd.f32 %v1468_v28, %v1449_v20  ;;  %v1387_v38 = vadd.f32 %v6794_v30, %v1363_v19  ;;  %v575_v19 = vsel %vm573_vm4, %v4974_v22, %v6800_v37 }
 0x907   : > { %v1497_v62 = vadd.f32 %v1492_v23, %v1473_v9  ;;  %v1411_v17 = vadd.f32 %v6796_v32, %v1387_v38  ;;  %v600_v38 = vsel %vm598_vm5, %v6745_v56, %v6801_v60  ;;  %v625_v23 = vsel %vm623_vm3, %v6752_v18, %v5118_v21  ;;  %v6803_v21 = vld [vmem:[#allocation68_spill] sm:$0xff] }
 0x908   : > { %v786_v18 = vsel %vm598_vm5, %v6757_v61, %v6803_v21  ;;  %v1126_v61 = vsel %vm573_vm4, %v6759_v40, %v5077_v55  ;;  %v968_v55 = vsel %vm598_vm5, %v6766_v51, %v5159_v47  ;;  %v1150_v40 = vsel %vm598_vm5, %v6769_v13, %v5171_v41 }
 0x909   : > { %1087 = vrot.lane.b32.xlu1 %v1068_v24, %s6611_s20  ;;  %v1521_v7 = vadd.f32 %v6795_v15, %v1497_v62  ;;  %v6799_v24 = vld [vmem:[#allocation103_spill] sm:$0xff]  ;;  %v555_v62 = vmul.f32 %v4668_v34, %v4852_v54  ;;  %v743_v34 = vmul.f32 %v4697_v63, %v4852_v54  ;;  %v810_v63 = vsel %vm623_vm3, %v6764_v53, %v5146_v43 }
 0x90a   : > { %v702_v43 = vsel %vm701_vm2, %v6771_v25, %v5010_v39  ;;  %v857_v39 = vsel %vm676_vm1, %v6777_v16, %v5035_v4  ;;  %v1169_v47 = vsel %vm623_vm3, %v6778_v33, %v5087_v50  ;;  %v1015_v4 = vsel %vm651_vm0, %v6780_v27, %v5062_v59  ;;  %v6806_v50 = vld [vmem:[#allocation74_spill] sm:$0xff]  ;;  %v6807_v33 = vld [vmem:[#allocation59_spill] sm:$0xff] }
 0x90b   : > { %v1545_v5 = vadd.f32 %v6797_v45, %v1521_v7  ;;  %v580_v28 = vadd.f32 %v575_v19, %v555_v62  ;;  %v6802_v7 = vld [vmem:[#allocation45_spill] sm:$0xff]  ;;  %v6810_v27 = vld [vmem:[#allocation55_spill] sm:$0xff] }
 0x90c   : > { %v762_v22 = vsel %vm573_vm4, %v6740_v35, %v6802_v7  ;;  %v1107_v35 = vmul.f32 %v4742_v58, %v4852_v54  ;;  %v6811_v7 = vld [vmem:[#allocation54_spill] sm:$0xff] }
 0x90d   : > { %1251 = vrot.lane.b32.xlu1 %v1245_v10, %s4186_s2  ;;  %v1569_v48 = vadd.f32 %v6798_v2, %v1545_v5  ;;  %v605_v9 = vadd.f32 %v600_v38, %v580_v28  ;;  %v652_v10 = vsel %vm651_vm0, %v6763_v52, %v5000_v1  ;;  %v677_v5 = vsel %vm676_vm1, %v6768_v12, %v5005_v3 }
 0x90e   : > { %v925_v1 = vmul.f32 %v4716_v42, %v4852_v54  ;;  %v1131_v60 = vadd.f32 %v1126_v61, %v1107_v35  ;;  %v6816_v35 = vld [vmem:[#allocation56_spill] sm:$0xff] }
 0x90f   : > { %v1593_v20 = vadd.f32 %v6799_v24, %v1569_v48  ;;  %v630_v56 = vadd.f32 %v625_v23, %v605_v9  ;;  %v767_v48 = vadd.f32 %v762_v22, %v743_v34  ;;  %v6808_v23 = vld [vmem:[#allocation80_spill] sm:$0xff]  ;;  %v1192_v22 = vsel %vm651_vm0, %v6811_v7, %v6810_v27 }
 0x910   : > { %v1155_v25 = vadd.f32 %v1150_v40, %v1131_v60  ;;  %v1287_v9 = vsel %vm573_vm4, %v6808_v23, %v6807_v33  ;;  %v6824_v60 = vld [vmem:[#allocation98_spill] sm:$0xff] }
 0x911   : > { %1430 = vrot.lane.b32.xlu1 %v1411_v17, %s6609_s29  ;;  %v658_v52 = vadd.f32 %v652_v10, %v630_v56  ;;  %v791_v37 = vadd.f32 %v786_v18, %v767_v48  ;;  %v6813_v56 = vld [vmem:[#allocation81_spill] sm:$0xff]  ;;  %v6815_v48 = vmov 7  }
 0x912   : > { %v1174_v28 = vadd.f32 %v1169_v47, %v1155_v25  ;;  %v6827_v25 = vld [vmem:[#allocation94_spill] sm:$0xff] }
 0x913   : > { %v683_v42 = vadd.f32 %v677_v5, %v658_v52  ;;  %v815_v53 = vadd.f32 %v810_v63, %v791_v37  ;;  %v6814_v5 = vld [vmem:[#allocation60_spill] sm:$0xff]  ;;  %v6817_v63 = vld [vmem:[#allocation78_spill] sm:$0xff] }
 0x914   : > { %v1311_v21 = vsel %vm598_vm5, %v6814_v5, %v6813_v56 }
 0x915   : > { %1612 = vrot.lane.b32.xlu1 %v1593_v20, %s6607_s24  ;;  %v6804_v20 = vld [vmem:[#allocation48_spill] sm:$0xff]  ;;  %v708_v41 = vadd.f32 %v702_v43, %v683_v42  ;;  %v6821_v43 = vld [vmem:[#allocation87_spill] sm:$0xff] }
 0x916   : > { %v944_v3 = vsel %vm573_vm4, %v6754_v26, %v6804_v20  ;;  %v833_v26 = vsel %vm651_vm0, %v6772_v46, %v5030_v6  ;;  %v992_v6 = vsel %vm623_vm3, %v6773_v11, %v5161_v31  ;;  %v881_v46 = vsel %vm701_vm2, %v6779_v0, %v5040_v36  ;;  %v6805_v31 = vld [vmem:[#allocation51_spill] sm:$0xff]  ;;  %v6809_v36 = vld [vmem:[#allocation38_spill] sm:$0xff]  ;;  %v6820_v42 = vld [vmem:[#allocation88_spill] sm:$0xff] }
 0x917   : > { %v949_v62 = vadd.f32 %v944_v3, %v925_v1  ;;  %v839_v51 = vadd.f32 %v833_v26, %v815_v53  ;;  %v1039_v11 = vsel %vm676_vm1, %v6806_v50, %v6805_v31  ;;  %v1268_v0 = vmul.f32 %v6809_v36, %v4852_v54  ;;  %v6818_v3 = vld [vmem:[#allocation62_spill] sm:$0xff]  ;;  %v6823_v53 = vld [vmem:[#allocation64_spill] sm:$0xff] }
 0x918   : > { %v1198_v1 = vadd.f32 %v1192_v22, %v1174_v28  ;;  %v1216_v20 = vsel %vm676_vm1, %v6817_v63, %v6816_v35  ;;  %v1334_v61 = vsel %vm623_vm3, %v6791_v57, %v6818_v3  ;;  %v1450_v26 = vmul.f32 %v6821_v43, %v4852_v54  ;;  %v6829_v28 = vld [vmem:[#allocation95_spill] sm:$0xff]  ;;  %v1673_v35 = vpop.permute.xlu0 %1672 }
 0x919   : > { %v973_v13 = vadd.f32 %v968_v55, %v949_v62  ;;  %v863_v16 = vadd.f32 %v857_v39, %v839_v51  ;;  %v1292_v52 = vadd.f32 %v1287_v9, %v1268_v0  ;;  %v6822_v55 = vld [vmem:[#allocation57_spill] sm:$0xff]  ;;  %v1358_v62 = vsel %vm651_vm0, %v6793_v44, %v6823_v53  ;;  %v6826_v51 = vld [vmem:[#allocation66_spill] sm:$0xff]  ;;  %v6838_v53 = vld [vmem:[#allocation107_spill] sm:$0xff] }
 0x91a   : > { %v1240_v40 = vsel %vm701_vm2, %v6792_v14, %v6822_v55  ;;  %v6825_v39 = vld [vmem:[#allocation93_spill] sm:$0xff]  ;;  %v1516_v14 = vsel %vm623_vm3, %v6795_v15, %v6827_v25  ;;  %v1540_v31 = vsel %vm651_vm0, %v6797_v45, %v6829_v28 }
 0x91b   : > { %v997_v38 = vadd.f32 %v992_v6, %v973_v13  ;;  %v887_v10 = vadd.f32 %v881_v46, %v863_v16  ;;  %v1493_v57 = vsel %vm598_vm5, %v6825_v39, %v6824_v60  ;;  %v1222_v6 = vadd.f32 %v1216_v20, %v1198_v1  ;;  %v6828_v16 = vld [vmem:[#allocation90_spill] sm:$0xff]  ;;  %v6831_v9 = vld [vmem:[#allocation97_spill] sm:$0xff]  ;;  %v6839_v60 = vld [vmem:[#allocation108_spill] sm:$0xff] }
 0x91c   : > { %v1382_v13 = vsel %vm676_vm1, %v6794_v30, %v6826_v51  ;;  %v6830_v30 = vld [vmem:[#allocation96_spill] sm:$0xff]  ;;  %v1588_v36 = vsel %vm701_vm2, %v6799_v24, %v6831_v9  ;;  %v1693_v63 = vpop.permute.xlu0 %1692 }
 0x91d   : > { %v1021_v59 = vadd.f32 %v1015_v4, %v997_v38  ;;  %v1246_v46 = vadd.f32 %v1240_v40, %v1222_v6  ;;  %v1406_v38 = vsel %vm701_vm2, %v6796_v32, %v6828_v16  ;;  %v1564_v33 = vsel %vm676_vm1, %v6798_v2, %v6830_v30  ;;  %v6837_v40 = vld [vmem:[#allocation106_spill] sm:$0xff] }
 0x91e   : > { %v1651_v39 = vsel %vm573_vm4, %v6837_v40, %v6839_v60  ;;  %v6840_v6 = vld [vmem:[#allocation110_spill] sm:$0xff] }
 0x91f   : > { %v1045_v18 = vadd.f32 %v1039_v11, %v1021_v59  ;;  %v1675_v25 = vsel %vm598_vm5, %v6840_v6, %v1673_v35 }
 0x920   : > { %v1697_v20 = vpop.permute.xlu0 %1696 }
 0x953   : > { %v5504_v17 = vpop.permute.xlu1 %1718  ;;  %v1717_v3 = vpop.permute.xlu0 %1716 }
 0x954   : > { %v1722_v28 = vsel %vm651_vm0, %v1717_v3, %v5504_v17 }
 0x964   : > { %v5527_v12 = vpop.permute.xlu1 %1731 }
 0x965   : > { %v1734_v19 = vmul.f32 %v5527_v12, %v4852_v54  ;;  %v1735_v58 = vmul.f32 %v5527_v12, %v4857_v8  ;;  %v1736_v45 = vmul.f32 0.0, %v5527_v12 }
 0x967   : > { %1742 = vrot.lane.b32.xlu1 %v1735_v58, %s4186_s2  ;;  %1740 = vrot.lane.b32.xlu0 %v1734_v19, %s4186_s2  ;;  %v1316_v58 = vadd.f32 %v1311_v21, %v1292_v52 }
 0x969   : > { %v1340_v47 = vadd.f32 %v1334_v61, %v1316_v58  ;;  %v1721_v61 = vpop.permute.xlu0 %1720 }
 0x96b   : > { %1755 = vperm.xlu1 %3765, %v5236_v49   ;;  %727 = vrot.lane.b32.xlu0 %v708_v41, %s6615_s6  ;;  %v6812_v49 = vld [vmem:[#allocation52_spill] sm:$0xff]  ;;  %v1364_v4 = vadd.f32 %v1358_v62, %v1340_v47  ;;  %v1650_v62 = vsel %vm573_vm4, %v6838_v53, %v6837_v40  ;;  %v6841_v47 = vld [vmem:[#allocation109_spill] sm:$0xff] }
 0x96c   : > { %v1063_v34 = vsel %vm701_vm2, %v6787_v29, %v6812_v49  ;;  %v6819_v29 = vld [vmem:[#allocation91_spill] sm:$0xff] }
 0x96d   : > { %v1469_v37 = vsel %vm573_vm4, %v6820_v42, %v6819_v29  ;;  %v1069_v19 = vadd.f32 %v1063_v34, %v1045_v18  ;;  %v1388_v50 = vadd.f32 %v1382_v13, %v1364_v4  ;;  %v6843_v4 = vld [vmem:[#allocation111_spill] sm:$0xff] }
 0x96e   : > { %v1474_v41 = vadd.f32 %v1469_v37, %v1450_v26  ;;  %v6836_v26 = vld [vmem:[#allocation105_spill] sm:$0xff]  ;;  %v1699_v30 = vsel %vm623_vm3, %v6843_v4, %v1697_v20 }
 0x96f   : > { %907 = vrot.lane.b32.xlu0 %v887_v10, %s6613_s22  ;;  %3767 = vset.pattern.permute.xlu1 %v6815_v48  ;;  %v1412_v15 = vadd.f32 %v1406_v38, %v1388_v50  ;;  %v5627_v10 = vpop.permute.xlu1 %729  ;;  %v1631_v55 = vmul.f32 0.0, %v6836_v26  ;;  %v1633_v16 = vmul.f32 %v6836_v26, %v4857_v8 }
 0x970   : > { %v1498_v44 = vadd.f32 %v1493_v57, %v1474_v41  ;;  %v1632_v57 = vmul.f32 %v6836_v26, %v4852_v54  ;;  %v1674_v41 = vsel %vm598_vm5, %v6841_v47, %v6840_v6  ;;  %v1888_v26 = vld [vmem:[%s4576_s26 + $0x8] sm:$0xff] }
 0x971   : > { %v1655_v13 = vadd.f32 %v1650_v62, %v1631_v55  ;;  %v1926_v40 = vmul.f32 %v1888_v26, %v1888_v26  ;;  %v5702_v62 = vld [vmem:[#allocation14] sm:$0xff] }
 0x972   : > { %v1522_v11 = vadd.f32 %v1516_v14, %v1498_v44  ;;  %v1656_v14 = vadd.f32 %v1651_v39, %v1632_v57  ;;  %v1698_v44 = vsel %vm623_vm3, %v1693_v63, %v6843_v4  ;;  %v6845_v39 = vmov 21  }
 0x973   : > { %1089 = vrot.lane.b32.xlu0 %v1069_v19, %s6611_s20  ;;  %v5629_v59 = vpop.permute.xlu1 %909 }
 0x974   : > { %v1546_v23 = vadd.f32 %v1540_v31, %v1522_v11  ;;  %v1680_v38 = vadd.f32 %v1675_v25, %v1656_v14  ;;  %v1657_v31 = vadd.f32 %v6839_v60, %v1633_v16  ;;  %v6844_v60 = vmov 14  }
 0x976   : > { %v1570_v0 = vadd.f32 %v1564_v33, %v1546_v23  ;;  %v1704_v50 = vadd.f32 %v1698_v44, %v1680_v38  ;;  %v1681_v23 = vadd.f32 %v1673_v35, %v1657_v31 }
 0x977   : > { %1253 = vrot.lane.b32.xlu0 %v1246_v46, %s4186_s2  ;;  %v5631_v2 = vpop.permute.xlu1 %1091  ;;  %v1679_v46 = vadd.f32 %v1674_v41, %v1655_v13 }
 0x978   : > { %v1594_v32 = vadd.f32 %v1588_v36, %v1570_v0  ;;  %v1728_v9 = vadd.f32 %v1722_v28, %v1704_v50  ;;  %v1705_v0 = vadd.f32 %v1699_v30, %v1681_v23 }
 0x97b   : > { %1432 = vrot.lane.b32.xlu0 %v1412_v15, %s6609_s29  ;;  %v5633_v27 = vpop.permute.xlu1 %1255 }
 0x97f   : > { %1614 = vrot.lane.b32.xlu0 %v1594_v32, %s6607_s24  ;;  %v5635_v7 = vpop.permute.xlu1 %1434 }
 0x983   : > { %1744 = vrot.lane.b32.xlu0 %v1736_v45, %s4186_s2  ;;  %v5637_v24 = vpop.permute.xlu1 %1616 }
 0x984   : > { %6832 = vst [vmem:[#allocation67_spill] sm:$0xff] %v5637_v24 }
 0x987   : > { %v5639_v22 = vpop.permute.xlu1 %725 }
 0x98b   : > { %v5641_v49 = vpop.permute.xlu1 %905 }
 0x98f   : > { %v5643_v34 = vpop.permute.xlu1 %1087 }
 0x993   : > { %v5645_v12 = vpop.permute.xlu1 %1251 }
 0x994   : > { %6833 = vst [vmem:[#allocation32_spill] sm:$0xff] %v5645_v12 }
 0x997   : > { %v5647_v56 = vpop.permute.xlu1 %1430 }
 0x998   : > { %6834 = vst [vmem:[#allocation100_spill] sm:$0xff] %v5647_v56 }
 0x99b   : > { %v5649_v5 = vpop.permute.xlu1 %1612 }
 0x99c   : > { %6835 = vst [vmem:[#allocation42_spill] sm:$0xff] %v5649_v5 }
 0x9d9   : > { %v1743_v21 = vpop.permute.xlu1 %1742  ;;  %v1741_v29 = vpop.permute.xlu0 %1740 }
 0x9da   : > { %v1746_v15 = vsel %vm676_vm1, %v1741_v29, %v1743_v21 }
 0x9db   : > { %v1752_v32 = vadd.f32 %v1746_v15, %v1728_v9 }
 0x9dd   : > { %v5656_v42 = vpop.permute.xlu0 %727 }
 0x9e1   : > { %v5658_v37 = vpop.permute.xlu0 %907 }
 0x9e5   : > { %v5660_v19 = vpop.permute.xlu0 %1089 }
 0x9e9   : > { %v5662_v58 = vpop.permute.xlu0 %1253 }
 0x9ea   : > { %v1756_v18 = vpop.permute.xlu1 %1755 }
 0x9eb   : > { %v1758_v1 = vmul.f32 %v1756_v18, %v4852_v54  ;;  %v1759_v52 = vmul.f32 %v1756_v18, %v4857_v8  ;;  %v1760_v48 = vmul.f32 0.0, %v1756_v18  ;;  %v1703_v54 = vadd.f32 %v1693_v63, %v1679_v46 }
 0x9ec   : > { %v1723_v8 = vsel %vm651_vm0, %v5504_v17, %v1721_v61 }
 0x9ed   : > { %1766 = vrot.lane.b32.xlu1 %v1759_v52, %s4187_s4  ;;  %1764 = vrot.lane.b32.xlu0 %v1758_v1, %s4187_s4  ;;  %v5664_v43 = vpop.permute.xlu0 %1432  ;;  %v1727_v33 = vadd.f32 %v1717_v3, %v1703_v54  ;;  %v1729_v63 = vadd.f32 %v1723_v8, %v1705_v0 }
 0x9ef   : > { %v1751_v36 = vadd.f32 %v1741_v29, %v1727_v33  ;;  %v1887_v29 = vld [vmem:[%s4576_s26] sm:$0xff] }
 0x9f0   : > { %v1925_v55 = vmul.f32 %v1887_v29, %v1887_v29 }
 0x9f1   : > { %1768 = vrot.lane.b32.xlu0 %v1760_v48, %s4187_s4  ;;  %v5678_v51 = vpop.permute.xlu0 %1614 }
 0x9f2   : > { %6842 = vst [vmem:[#allocation29_spill] sm:$0xff] %v5678_v51  ;;  %v1927_v53 = vadd.f32 %v1926_v40, %v1925_v55 }
 0x9f5   : > { %v1745_v11 = vpop.permute.xlu0 %1744 }
 0x9f6   : > { %v1747_v1 = vsel %vm676_vm1, %v1743_v21, %v1745_v11  ;;  %v1915_v21 = vadd.f32 %v1888_v26, %v1887_v29 }
 0x9f7   : > { %v1753_v35 = vadd.f32 %v1747_v1, %v1729_v63 }
 0xa5f   : > { %v1767_v45 = vpop.permute.xlu1 %1766  ;;  %v1765_v18 = vpop.permute.xlu0 %1764 }
 0xa60   : > { %v1770_v52 = vsel %vm701_vm2, %v1765_v18, %v1767_v45  ;;  %v1775_v48 = vadd.f32 %v1765_v18, %v1751_v36 }
 0xa61   : > { %v1776_v20 = vadd.f32 %v1770_v52, %v1752_v32  ;;  %v6849_v52 = vmov 28  }
 0xa62   : > { %1794 = vrot.lane.b32.xlu1 %v1775_v48, %s6605_s13 }
 0xa63   : > { %1796 = vrot.lane.b32.xlu0 %v1776_v20, %s6605_s13  ;;  %v1769_v17 = vpop.permute.xlu0 %1768 }
 0xa64   : > { %v1771_v3 = vsel %vm701_vm2, %v1767_v45, %v1769_v17 }
 0xa65   : > { %v1777_v61 = vadd.f32 %v1771_v3, %v1753_v35 }
 0xa67   : > { %1798 = vrot.lane.b32.xlu1 %v1777_v61, %s6605_s13 }
 0xa82   : > { %1916 = vadd.xlane.f32.xlu0 %v1915_v21 }
 0xa8b   : > { %1928 = vadd.xlane.f32.xlu1 %v1927_v53 }
 0xa98   : > { %1963 = vperm.xlu0 %3766, %v5702_v62  }
 0xa9c   : > { %1970 = vperm.xlu1 %3767, %v5702_v62   ;;  %3769 = vset.pattern.permute.xlu0 %v6845_v39  ;;  %v6851_v39 = vmov 35  }
 0xaa0   : > { %3768 = vset.pattern.permute.xlu1 %v6844_v60 }
 0xad4   : > { %v5710_v6 = vpop.permute.xlu1 %1794 }
 0xad5   : > { %v5708_v57 = vpop.permute.xlu0 %1796  ;;  %6847 = vst [vmem:[#allocation86_spill] sm:$0xff] %v5710_v6 }
 0xad6   : > { %6846 = vst [vmem:[#allocation58_spill] sm:$0xff] %v5708_v57 }
 0xad9   : > { %v5712_v25 = vpop.permute.xlu1 %1798 }
 0xada   : > { %6848 = vst [vmem:[#allocation44_spill] sm:$0xff] %v5712_v25 }
 0xb0f   : > { %v1917_v47 = vpop.xlane.xlu0 %1916 }
 0xb10   : > { %v1918_v41 = vrot.slane %v1917_v47, 4 }
 0xb12   : > { %v1919_v13 = vadd.f32 %v1918_v41, %v1917_v47 }
 0xb14   : > { %v1920_v14 = vrot.slane %v1919_v13, 2 }
 0xb16   : > { %v1921_v46 = vadd.f32 %v1920_v14, %v1919_v13 }
 0xb18   : > { %v1929_v4 = vpop.xlane.xlu1 %1928  ;;  %v1922_v44 = vrot.slane %v1921_v46, 1 }
 0xb19   : > { %v1930_v16 = vrot.slane %v1929_v4, 4 }
 0xb1a   : > { %v1923_v38 = vadd.f32 %v1922_v44, %v1921_v46 }
 0xb1b   : > { %v1931_v54 = vadd.f32 %v1930_v16, %v1929_v4 }
 0xb1c   : > { %3527 = vpush %v1923_v38  ;;  %v1971_v28 = vpop.permute.xlu1 %1970  ;;  %v6852_v38 = vmov 42  }
 0xb1d   : > { %v1932_v31 = vrot.slane %v1931_v54, 2  ;;  %v1973_v50 = vmul.f32 0.0, %v1971_v28 }
 0xb1f   : > { %v1933_v11 = vadd.f32 %v1932_v31, %v1931_v54  ;;  %1979 = vrot.lane.b32.xlu1 %v1973_v50, %s4183_s17 }
 0xb21   : > { %v1934_v30 = vrot.slane %v1933_v11, 1 }
 0xb23   : > { %v1935_v33 = vadd.f32 %v1934_v30, %v1933_v11  ;;  %v6853_v30 = vmov 8  }
 0xb25   : > { %3529 = vpush %v1935_v33 }
 0xb4d   : > { %s3528_s16 = spop %3527 }
 0xb4e   : > { %s1939_s28 = smul.f32 0.00048828125, %s3528_s16 }
 0xb50   : > { %s1943_s13 = smul.f32 %s1939_s28, %s1939_s28  ;;  %v1945_v9 = vstv %s1939_s28 }
 0xb51   : > { %v1946_v8 = vsub.f32 %v1887_v29, %v1945_v9  ;;  %v1947_v0 = vsub.f32 %v1888_v26, %v1945_v9  ;;  %v6850_v29 = vmov 1   ;;  %v1964_v26 = vpop.permute.xlu0 %1963 }
 0xb56   : > { %s3530_s24 = spop %3529 }
 0xb57   : > { %s1942_s29 = smul.f32 0.00048828125, %s3530_s24  ;;  %s471_s24 = scalar_lea.vmem [#allocation19], %s4564_s5 }
 0xb59   : > { %s1944_s20 = ssub.f32 %s1942_s29, %s1943_s13  ;;  %s3520_s29 = sshll.u32 %s4290_s15, 8 }
 0xb5a   : > { %s3321_s13 = sshll.u32 %s471_s24, 4  ;;  %s3307_s15 = scalar_lea.sflag [#allocation5], %s4561_s3  ;;  %s6435_s13 = int_to_ptr.vmem [resolvable:$true] %s3321_s13 }
 0xb5b   : > { %s1948_s22 = sadd.f32 1e-05, %s1944_s20  ;;  %s6876_s20 = smov 49  }
 0xb5c   : > { %s4055_s5 = scalar_lea.vmem %s6435_s13, 256 }
 0xb5d   : > { %v1949_v15 = vstv %s1948_s22  ;;  %s6865_s22 = smov 50   ;;  %p4056_p1 = scmp.ne.s32.totalorder %s6435_s13, %s4055_s5 }
 0xb5e   : > { %3818 = vrsqrt.f32 %v1949_v15 }
 0xb5f   : > { %p4057_p12 = pnand %p4056_p1, %p6926_p5 }
 0xb61   : > { %p4058_p3 = pneg %p4057_p12 }
 0xb68   : > { %v3819_v23 = vpop.eup %3818 }
 0xb69   : > { %3531 = vpush %v3819_v23 }
 0xb91   : > { %v1980_v48 = vpop.permute.xlu1 %1979 }
 0xb9a   : > { %s3532_s6 = spop %3531 }
 0xb9b   : > { %v1952_v36 = vstv %s3532_s6  ;;  %s6854_s6 = smov 51  }
 0xb9c   : > { %v5715_v32 = vmul.f32 %v1952_v36, %v1946_v8  ;;  %v5717_v45 = vmul.f32 %v1952_v36, %v1947_v0 }
 0xb9e   : > { %v1974_v18 = vmul.f32 %v1971_v28, %v5715_v32  ;;  %v1975_v1 = vmul.f32 %v1971_v28, %v5717_v45 }
 0xba0   : > { %1981 = vrot.lane.b32.xlu1 %v1974_v18, %s4183_s17 }
 0xba4   : > { %1983 = vrot.lane.b32.xlu1 %v1975_v1, %s4183_s17  ;;  %v1966_v1 = vmul.f32 0.0, %v1964_v26 }
 0xba8   : > { %1994 = vperm.xlu1 %3768, %v5702_v62  }
 0xbac   : > { %3770 = vset.pattern.permute.xlu1 %v6849_v52 }
 0xc12   : > { %v1982_v63 = vpop.permute.xlu1 %1981 }
 0xc13   : > { %v1985_v52 = vsel %vm573_vm4, %v1980_v48, %v1982_v63 }
 0xc16   : > { %v5725_v20 = vpop.permute.xlu1 %1983 }
 0xc27   : > { %v1995_v35 = vpop.permute.xlu1 %1994 }
 0xc28   : > { %v1997_v17 = vmul.f32 0.0, %v1995_v35  ;;  %v1998_v3 = vmul.f32 %v1995_v35, %v5715_v32  ;;  %v1999_v61 = vmul.f32 %v1995_v35, %v5717_v45  ;;  %v1986_v35 = vsel %vm573_vm4, %v1982_v63, %v5725_v20 }
 0xc2a   : > { %2003 = vrot.lane.b32.xlu1 %v1997_v17, %s4184_s7  ;;  %2005 = vrot.lane.b32.xlu0 %v1998_v3, %s4184_s7  ;;  %v1967_v17 = vmul.f32 %v1964_v26, %v5715_v32 }
 0xc2e   : > { %2007 = vrot.lane.b32.xlu1 %v1999_v61, %s4184_s7  ;;  %2018 = vperm.xlu0 %3769, %v5702_v62  }
 0xc32   : > { %3773 = vset.pattern.permute.xlu0 %v6850_v29  ;;  %v1990_v29 = vadd.f32 %v1985_v52, %v1966_v1 }
 0xc9c   : > { %v2006_v21 = vpop.permute.xlu0 %2005  ;;  %v2004_v47 = vpop.permute.xlu1 %2003 }
 0xc9d   : > { %v2009_v3 = vsel %vm598_vm5, %v2004_v47, %v2006_v21 }
 0xca0   : > { %v2008_v41 = vpop.permute.xlu1 %2007 }
 0xcad   : > { %v2019_v55 = vpop.permute.xlu0 %2018 }
 0xcae   : > { %v2021_v40 = vmul.f32 0.0, %v2019_v55  ;;  %v2023_v53 = vmul.f32 %v2019_v55, %v5717_v45  ;;  %v2022_v60 = vmul.f32 %v2019_v55, %v5715_v32  ;;  %v2010_v55 = vsel %vm598_vm5, %v2006_v21, %v2008_v41 }
 0xcb0   : > { %2027 = vrot.lane.b32.xlu1 %v2021_v40, %s4188_s18  ;;  %2031 = vrot.lane.b32.xlu0 %v2023_v53, %s4188_s18  ;;  %v1991_v40 = vadd.f32 %v1986_v35, %v1967_v17 }
 0xcb2   : > { %v2015_v48 = vadd.f32 %v2010_v55, %v1991_v40 }
 0xcb4   : > { %2029 = vrot.lane.b32.xlu1 %v2022_v60, %s4188_s18  ;;  %v2014_v60 = vadd.f32 %v2009_v3, %v1990_v29  ;;  %v6859_v29 = vmov 2  }
 0xcb8   : > { %2045 = vperm.xlu1 %3770, %v5702_v62  }
 0xcbc   : > { %3771 = vset.pattern.permute.xlu1 %v6851_v39 }
 0xd22   : > { %v2028_v13 = vpop.permute.xlu1 %2027  ;;  %v2032_v36 = vpop.permute.xlu0 %2031 }
 0xd26   : > { %v2030_v14 = vpop.permute.xlu1 %2029 }
 0xd27   : > { %v2033_v53 = vsel %vm623_vm3, %v2028_v13, %v2030_v14  ;;  %v2034_v39 = vsel %vm623_vm3, %v2030_v14, %v2032_v36 }
 0xd37   : > { %v2046_v46 = vpop.permute.xlu1 %2045 }
 0xd38   : > { %v2048_v4 = vmul.f32 %v2046_v46, %v5715_v32  ;;  %v2049_v44 = vmul.f32 %v2046_v46, %v5717_v45  ;;  %v2050_v16 = vmul.f32 0.0, %v2046_v46  ;;  %v1968_v46 = vmul.f32 %v1964_v26, %v5717_v45 }
 0xd3a   : > { %2056 = vrot.lane.b32.xlu1 %v2049_v44, %s4185_s25  ;;  %2054 = vrot.lane.b32.xlu0 %v2048_v4, %s4185_s25  ;;  %v2038_v4 = vadd.f32 %v2033_v53, %v2014_v60  ;;  %v1992_v44 = vadd.f32 %v5725_v20, %v1968_v46 }
 0xd3c   : > { %v2016_v21 = vadd.f32 %v2008_v41, %v1992_v44 }
 0xd3e   : > { %2069 = vperm.xlu1 %3771, %v5702_v62   ;;  %2058 = vrot.lane.b32.xlu0 %v2050_v16, %s4185_s25  ;;  %v2039_v16 = vadd.f32 %v2034_v39, %v2015_v48 }
 0xd42   : > { %3772 = vset.pattern.permute.xlu1 %v6852_v38 }
 0xdac   : > { %v2057_v54 = vpop.permute.xlu1 %2056  ;;  %v2055_v0 = vpop.permute.xlu0 %2054 }
 0xdad   : > { %v2060_v63 = vsel %vm651_vm0, %v2055_v0, %v2057_v54  ;;  %v2065_v38 = vadd.f32 %v2055_v0, %v2038_v4  ;;  %v6861_v4 = vmov 29  }
 0xdb0   : > { %v2059_v18 = vpop.permute.xlu0 %2058 }
 0xdb1   : > { %v2061_v13 = vsel %vm651_vm0, %v2057_v54, %v2059_v18 }
 0xdbd   : > { %v2070_v28 = vpop.permute.xlu1 %2069 }
 0xdbe   : > { %v2072_v31 = vmul.f32 %v2070_v28, %v5715_v32  ;;  %v2073_v50 = vmul.f32 %v2070_v28, %v5717_v45  ;;  %v2074_v11 = vmul.f32 0.0, %v2070_v28 }
 0xdc0   : > { %2080 = vrot.lane.b32.xlu1 %v2073_v50, %s4186_s2  ;;  %2078 = vrot.lane.b32.xlu0 %v2072_v31, %s4186_s2  ;;  %v2066_v31 = vadd.f32 %v2060_v63, %v2039_v16 }
 0xdc4   : > { %2093 = vperm.xlu1 %3772, %v5702_v62   ;;  %2082 = vrot.lane.b32.xlu0 %v2074_v11, %s4186_s2  ;;  %v2040_v11 = vadd.f32 %v2032_v36, %v2016_v21  ;;  %v6856_v36 = vmov 22  }
 0xdc6   : > { %v2067_v20 = vadd.f32 %v2061_v13, %v2040_v11  ;;  %v6862_v13 = vmov 36  }
 0xdc8   : > { %3774 = vset.pattern.permute.xlu1 %v6853_v30 }
 0xe32   : > { %v2081_v33 = vpop.permute.xlu1 %2080  ;;  %v2079_v61 = vpop.permute.xlu0 %2078 }
 0xe33   : > { %v2084_v28 = vsel %vm676_vm1, %v2079_v61, %v2081_v33  ;;  %v2089_v50 = vadd.f32 %v2079_v61, %v2065_v38 }
 0xe34   : > { %v2090_v14 = vadd.f32 %v2084_v28, %v2066_v31 }
 0xe36   : > { %v2083_v47 = vpop.permute.xlu0 %2082 }
 0xe43   : > { %v2094_v15 = vpop.permute.xlu1 %2093 }
 0xe44   : > { %v2096_v23 = vmul.f32 %v2094_v15, %v5715_v32  ;;  %v2097_v9 = vmul.f32 %v2094_v15, %v5717_v45  ;;  %v2098_v8 = vmul.f32 0.0, %v2094_v15  ;;  %v2085_v15 = vsel %vm676_vm1, %v2081_v33, %v2083_v47 }
 0xe45   : > { %v2091_v0 = vadd.f32 %v2085_v15, %v2067_v20  ;;  %v6855_v33 = vmov 15   ;;  %v6863_v15 = vmov 43  }
 0xe46   : > { %2104 = vrot.lane.b32.xlu1 %v2097_v9, %s4187_s4  ;;  %2102 = vrot.lane.b32.xlu0 %v2096_v23, %s4187_s4 }
 0xe4a   : > { %2106 = vrot.lane.b32.xlu0 %v2098_v8, %s4187_s4 }
 0xeb8   : > { %v2105_v30 = vpop.permute.xlu1 %2104  ;;  %v2103_v26 = vpop.permute.xlu0 %2102 }
 0xeb9   : > { %v2108_v23 = vsel %vm701_vm2, %v2103_v26, %v2105_v30  ;;  %v2113_v9 = vadd.f32 %v2103_v26, %v2089_v50 }
 0xeba   : > { %v2114_v8 = vadd.f32 %v2108_v23, %v2090_v14 }
 0xebb   : > { %2131 = vrot.lane.b32.xlu1 %v2113_v9, %s6854_s6 }
 0xebc   : > { %2133 = vrot.lane.b32.xlu0 %v2114_v8, %s6854_s6  ;;  %v2107_v41 = vpop.permute.xlu0 %2106 }
 0xebd   : > { %v2109_v54 = vsel %vm701_vm2, %v2105_v30, %v2107_v41  ;;  %v6864_v41 = vmov 9  }
 0xebe   : > { %v2115_v18 = vadd.f32 %v2109_v54, %v2091_v0 }
 0xec0   : > { %2144 = vperm.xlu0 %3773, %v5702_v62   ;;  %2135 = vrot.lane.b32.xlu1 %v2115_v18, %s6854_s6  ;;  %s6433_s6 = scalar_lea.hbm %s6486_s9, %s3520_s29 }
 0xec4   : > { %2151 = vperm.xlu1 %3774, %v5702_v62   ;;  %3775 = vset.pattern.permute.xlu0 %v6855_v33 }
 0xec8   : > { %3776 = vset.pattern.permute.xlu1 %v6856_v36 }
 0xf2d   : > { %v5783_v1 = vpop.permute.xlu1 %2131 }
 0xf2e   : > { %6857 = vst [vmem:[#allocation30_spill] sm:$0xff] %v5783_v1  ;;  %v5794_v55 = vpop.permute.xlu0 %2133 }
 0xf2f   : > { %6860 = vst [vmem:[#allocation34_spill] sm:$0xff] %v5794_v55 }
 0xf32   : > { %v5785_v52 = vpop.permute.xlu1 %2135 }
 0xf33   : > { %6858 = vst [vmem:[#allocation72_spill] sm:$0xff] %v5785_v52 }
 0xf3f   : > { %v5796_v40 = vpop.permute.xlu0 %2144 }
 0xf43   : > { %v2152_v35 = vpop.permute.xlu1 %2151 }
 0xf44   : > { %v2154_v17 = vmul.f32 0.0, %v2152_v35  ;;  %v2155_v3 = vmul.f32 %v2152_v35, %v5715_v32  ;;  %v2156_v61 = vmul.f32 %v2152_v35, %v5717_v45 }
 0xf46   : > { %2160 = vrot.lane.b32.xlu1 %v2154_v17, %s4183_s17  ;;  %2162 = vrot.lane.b32.xlu0 %v2155_v3, %s4183_s17 }
 0xf4a   : > { %2164 = vrot.lane.b32.xlu1 %v2156_v61, %s4183_s17  ;;  %2175 = vperm.xlu0 %3775, %v5702_v62  }
 0xf4e   : > { %3780 = vset.pattern.permute.xlu0 %v6859_v29 }
 0xfb8   : > { %v2163_v53 = vpop.permute.xlu0 %2162  ;;  %v2161_v63 = vpop.permute.xlu1 %2160 }
 0xfbc   : > { %v2165_v44 = vpop.permute.xlu1 %2164 }
 0xfc9   : > { %v2176_v60 = vpop.permute.xlu0 %2175 }
 0xfca   : > { %v2178_v39 = vmul.f32 0.0, %v2176_v60  ;;  %v2180_v46 = vmul.f32 %v2176_v60, %v5717_v45  ;;  %v2179_v48 = vmul.f32 %v2176_v60, %v5715_v32 }
 0xfcc   : > { %2184 = vrot.lane.b32.xlu1 %v2178_v39, %s4184_s7  ;;  %2188 = vrot.lane.b32.xlu0 %v2180_v46, %s4184_s7  ;;  %v2147_v39 = vmul.f32 0.0, %v5796_v40  ;;  %v2166_v46 = vsel %vm573_vm4, %v2161_v63, %v2163_v53  ;;  %v2149_v63 = vmul.f32 %v5796_v40, %v5717_v45 }
 0xfd0   : > { %2186 = vrot.lane.b32.xlu1 %v2179_v48, %s4184_s7  ;;  %v2167_v48 = vsel %vm573_vm4, %v2163_v53, %v2165_v44 }
 0xfd4   : > { %2199 = vperm.xlu1 %3776, %v5702_v62  }
 0xfd8   : > { %3777 = vset.pattern.permute.xlu1 %v6861_v4  ;;  %v2148_v4 = vmul.f32 %v5796_v40, %v5715_v32 }
0x103e   : > { %v2185_v16 = vpop.permute.xlu1 %2184  ;;  %v2189_v17 = vpop.permute.xlu0 %2188 }
0x1042   : > { %v2187_v47 = vpop.permute.xlu1 %2186 }
0x1053   : > { %v2200_v38 = vpop.permute.xlu1 %2199 }
0x1054   : > { %v2202_v28 = vmul.f32 0.0, %v2200_v38  ;;  %v2203_v21 = vmul.f32 %v2200_v38, %v5715_v32  ;;  %v2204_v31 = vmul.f32 %v2200_v38, %v5717_v45  ;;  %v2190_v38 = vsel %vm598_vm5, %v2185_v16, %v2187_v47 }
0x1056   : > { %2208 = vrot.lane.b32.xlu0 %v2202_v28, %s4188_s18  ;;  %2210 = vrot.lane.b32.xlu1 %v2203_v21, %s4188_s18  ;;  %v2171_v21 = vadd.f32 %v2166_v46, %v2147_v39 }
0x105a   : > { %2212 = vrot.lane.b32.xlu0 %v2204_v31, %s4188_s18  ;;  %2223 = vperm.xlu1 %3777, %v5702_v62   ;;  %v2191_v31 = vsel %vm598_vm5, %v2187_v47, %v2189_v17 }
0x105e   : > { %3778 = vset.pattern.permute.xlu1 %v6862_v13  ;;  %v2172_v13 = vadd.f32 %v2167_v48, %v2148_v4 }
0x10c8   : > { %v2211_v50 = vpop.permute.xlu1 %2210  ;;  %v2209_v3 = vpop.permute.xlu0 %2208 }
0x10cc   : > { %v2213_v61 = vpop.permute.xlu0 %2212 }
0x10d9   : > { %v2224_v11 = vpop.permute.xlu1 %2223 }
0x10da   : > { %v2226_v14 = vmul.f32 %v2224_v11, %v5715_v32  ;;  %v2227_v30 = vmul.f32 %v2224_v11, %v5717_v45  ;;  %v2228_v26 = vmul.f32 0.0, %v2224_v11  ;;  %v2214_v11 = vsel %vm623_vm3, %v2209_v3, %v2211_v50 }
0x10dc   : > { %2234 = vrot.lane.b32.xlu1 %v2227_v30, %s4185_s25  ;;  %2232 = vrot.lane.b32.xlu0 %v2226_v14, %s4185_s25  ;;  %v2195_v14 = vadd.f32 %v2190_v38, %v2171_v21  ;;  %v2215_v30 = vsel %vm623_vm3, %v2211_v50, %v2213_v61 }
0x10de   : > { %v2219_v53 = vadd.f32 %v2214_v11, %v2195_v14  ;;  %v6870_v11 = vmov 3  }
0x10e0   : > { %2247 = vperm.xlu1 %3778, %v5702_v62   ;;  %2236 = vrot.lane.b32.xlu0 %v2228_v26, %s4185_s25  ;;  %v2196_v26 = vadd.f32 %v2191_v31, %v2172_v13 }
0x10e4   : > { %3779 = vset.pattern.permute.xlu1 %v6863_v15 }
0x114e   : > { %v2235_v23 = vpop.permute.xlu1 %2234  ;;  %v2233_v29 = vpop.permute.xlu0 %2232 }
0x114f   : > { %v2238_v15 = vsel %vm651_vm0, %v2233_v29, %v2235_v23 }
0x1152   : > { %v2237_v60 = vpop.permute.xlu0 %2236 }
0x115f   : > { %v2248_v9 = vpop.permute.xlu1 %2247 }
0x1160   : > { %v2250_v20 = vmul.f32 %v2248_v9, %v5715_v32  ;;  %v2251_v8 = vmul.f32 %v2248_v9, %v5717_v45  ;;  %v2252_v0 = vmul.f32 0.0, %v2248_v9  ;;  %v2173_v9 = vadd.f32 %v2165_v44, %v2149_v63 }
0x1162   : > { %2258 = vrot.lane.b32.xlu1 %v2251_v8, %s4186_s2  ;;  %2256 = vrot.lane.b32.xlu0 %v2250_v20, %s4186_s2  ;;  %v2220_v20 = vadd.f32 %v2215_v30, %v2196_v26  ;;  %v2243_v8 = vadd.f32 %v2233_v29, %v2219_v53  ;;  %v2197_v47 = vadd.f32 %v2189_v17, %v2173_v9 }
0x1166   : > { %2271 = vperm.xlu1 %3779, %v5702_v62   ;;  %2260 = vrot.lane.b32.xlu0 %v2252_v0, %s4186_s2 }
0x116a   : > { %3781 = vset.pattern.permute.xlu1 %v6864_v41  ;;  %v2244_v41 = vadd.f32 %v2238_v15, %v2220_v20  ;;  %v6872_v20 = vmov 30  }
0x11d4   : > { %v2259_v54 = vpop.permute.xlu1 %2258  ;;  %v2257_v28 = vpop.permute.xlu0 %2256 }
0x11d5   : > { %v2262_v0 = vsel %vm676_vm1, %v2257_v28, %v2259_v54 }
0x11d6   : > { %v2268_v50 = vadd.f32 %v2262_v0, %v2244_v41 }
0x11d8   : > { %v2261_v16 = vpop.permute.xlu0 %2260 }
0x11d9   : > { %v2263_v40 = vsel %vm676_vm1, %v2259_v54, %v2261_v16  ;;  %v6866_v54 = vmov 16  }
0x11e5   : > { %v2272_v18 = vpop.permute.xlu1 %2271 }
0x11e6   : > { %v2274_v33 = vmul.f32 %v2272_v18, %v5715_v32  ;;  %v2275_v36 = vmul.f32 %v2272_v18, %v5717_v45  ;;  %v2276_v35 = vmul.f32 0.0, %v2272_v18  ;;  %v2239_v18 = vsel %vm651_vm0, %v2235_v23, %v2237_v60 }
0x11e8   : > { %2282 = vrot.lane.b32.xlu1 %v2275_v36, %s4187_s4  ;;  %2280 = vrot.lane.b32.xlu0 %v2274_v33, %s4187_s4  ;;  %v2267_v33 = vadd.f32 %v2257_v28, %v2243_v8  ;;  %v2221_v36 = vadd.f32 %v2213_v61, %v2197_v47  ;;  %v6867_v61 = vmov 23  }
0x11ea   : > { %v2245_v44 = vadd.f32 %v2239_v18, %v2221_v36 }
0x11ec   : > { %2284 = vrot.lane.b32.xlu0 %v2276_v35, %s4187_s4  ;;  %v2269_v29 = vadd.f32 %v2263_v40, %v2245_v44  ;;  %v6874_v44 = vmov 44  }
0x125a   : > { %v2283_v35 = vpop.permute.xlu1 %2282  ;;  %v2281_v3 = vpop.permute.xlu0 %2280 }
0x125b   : > { %v2286_v39 = vsel %vm701_vm2, %v2281_v3, %v2283_v35  ;;  %v2291_v46 = vadd.f32 %v2281_v3, %v2267_v33 }
0x125c   : > { %v2292_v48 = vadd.f32 %v2286_v39, %v2268_v50  ;;  %v6873_v50 = vmov 37  }
0x125d   : > { %2309 = vrot.lane.b32.xlu1 %v2291_v46, %s6865_s22 }
0x125e   : > { %2311 = vrot.lane.b32.xlu0 %v2292_v48, %s6865_s22  ;;  %v2285_v17 = vpop.permute.xlu0 %2284 }
0x125f   : > { %v2287_v23 = vsel %vm701_vm2, %v2283_v35, %v2285_v17 }
0x1260   : > { %v2293_v60 = vadd.f32 %v2287_v23, %v2269_v29 }
0x1262   : > { %2324 = vperm.xlu0 %3780, %v5702_v62   ;;  %2313 = vrot.lane.b32.xlu1 %v2293_v60, %s6865_s22 }
0x1266   : > { %2331 = vperm.xlu1 %3781, %v5702_v62   ;;  %3782 = vset.pattern.permute.xlu0 %v6866_v54  ;;  %v6875_v54 = vmov 10  }
0x126a   : > { %3783 = vset.pattern.permute.xlu1 %v6867_v61 }
0x12cf   : > { %v5855_v4 = vpop.permute.xlu1 %2309 }
0x12d0   : > { %6868 = vst [vmem:[#allocation46_spill] sm:$0xff] %v5855_v4  ;;  %v5866_v14 = vpop.permute.xlu0 %2311 }
0x12d1   : > { %6871 = vst [vmem:[#allocation76_spill] sm:$0xff] %v5866_v14 }
0x12d4   : > { %v5857_v38 = vpop.permute.xlu1 %2313 }
0x12d5   : > { %6869 = vst [vmem:[#allocation33_spill] sm:$0xff] %v5857_v38 }
0x12e1   : > { %v5868_v30 = vpop.permute.xlu0 %2324 }
0x12e5   : > { %v2332_v28 = vpop.permute.xlu1 %2331 }
0x12e6   : > { %v2334_v21 = vmul.f32 0.0, %v2332_v28  ;;  %v2335_v31 = vmul.f32 %v2332_v28, %v5715_v32  ;;  %v2336_v13 = vmul.f32 %v2332_v28, %v5717_v45 }
0x12e8   : > { %2340 = vrot.lane.b32.xlu1 %v2334_v21, %s4183_s17  ;;  %2342 = vrot.lane.b32.xlu0 %v2335_v31, %s4183_s17 }
0x12ec   : > { %2344 = vrot.lane.b32.xlu1 %v2336_v13, %s4183_s17  ;;  %2355 = vperm.xlu0 %3782, %v5702_v62  }
0x12f0   : > { %3787 = vset.pattern.permute.xlu0 %v6870_v11 }
0x135a   : > { %v2343_v63 = vpop.permute.xlu0 %2342  ;;  %v2341_v16 = vpop.permute.xlu1 %2340 }
0x135e   : > { %v2345_v8 = vpop.permute.xlu1 %2344 }
0x136b   : > { %v2356_v26 = vpop.permute.xlu0 %2355 }
0x136c   : > { %v2358_v53 = vmul.f32 0.0, %v2356_v26  ;;  %v2360_v15 = vmul.f32 %v2356_v26, %v5717_v45  ;;  %v2359_v9 = vmul.f32 %v2356_v26, %v5715_v32 }
0x136e   : > { %2364 = vrot.lane.b32.xlu1 %v2358_v53, %s4184_s7  ;;  %2368 = vrot.lane.b32.xlu0 %v2360_v15, %s4184_s7 }
0x1372   : > { %2366 = vrot.lane.b32.xlu1 %v2359_v9, %s4184_s7 }
0x1376   : > { %2379 = vperm.xlu1 %3783, %v5702_v62  }
0x137a   : > { %3784 = vset.pattern.permute.xlu1 %v6872_v20  ;;  %v2327_v20 = vmul.f32 0.0, %v5868_v30 }
0x13e0   : > { %v2365_v0 = vpop.permute.xlu1 %2364  ;;  %v2369_v11 = vpop.permute.xlu0 %2368 }
0x13e4   : > { %v2367_v47 = vpop.permute.xlu1 %2366 }
0x13f5   : > { %v2380_v41 = vpop.permute.xlu1 %2379 }
0x13f6   : > { %v2382_v18 = vmul.f32 0.0, %v2380_v41  ;;  %v2383_v33 = vmul.f32 %v2380_v41, %v5715_v32  ;;  %v2384_v36 = vmul.f32 %v2380_v41, %v5717_v45  ;;  %v2346_v41 = vsel %vm573_vm4, %v2341_v16, %v2343_v63 }
0x13f7   : > { %v2329_v16 = vmul.f32 %v5868_v30, %v5717_v45 }
0x13f8   : > { %2388 = vrot.lane.b32.xlu0 %v2382_v18, %s4188_s18  ;;  %2390 = vrot.lane.b32.xlu1 %v2383_v33, %s4188_s18  ;;  %v2347_v18 = vsel %vm573_vm4, %v2343_v63, %v2345_v8  ;;  %v2328_v33 = vmul.f32 %v5868_v30, %v5715_v32 }
0x13fc   : > { %2392 = vrot.lane.b32.xlu0 %v2384_v36, %s4188_s18  ;;  %2403 = vperm.xlu1 %3784, %v5702_v62   ;;  %v2370_v36 = vsel %vm598_vm5, %v2365_v0, %v2367_v47 }
0x1400   : > { %3785 = vset.pattern.permute.xlu1 %v6873_v50 }
0x146a   : > { %v2391_v35 = vpop.permute.xlu1 %2390  ;;  %v2389_v26 = vpop.permute.xlu0 %2388 }
0x146e   : > { %v2393_v53 = vpop.permute.xlu0 %2392 }
0x147b   : > { %v2404_v3 = vpop.permute.xlu1 %2403 }
0x147c   : > { %v2406_v40 = vmul.f32 %v2404_v3, %v5715_v32  ;;  %v2407_v39 = vmul.f32 %v2404_v3, %v5717_v45  ;;  %v2408_v46 = vmul.f32 0.0, %v2404_v3  ;;  %v2351_v3 = vadd.f32 %v2346_v41, %v2327_v20 }
0x147e   : > { %2414 = vrot.lane.b32.xlu1 %v2407_v39, %s4185_s25  ;;  %2412 = vrot.lane.b32.xlu0 %v2406_v40, %s4185_s25  ;;  %v2371_v40 = vsel %vm598_vm5, %v2367_v47, %v2369_v11  ;;  %v2352_v39 = vadd.f32 %v2347_v18, %v2328_v33 }
0x1482   : > { %2427 = vperm.xlu1 %3785, %v5702_v62   ;;  %2416 = vrot.lane.b32.xlu0 %v2408_v46, %s4185_s25  ;;  %v2394_v46 = vsel %vm623_vm3, %v2389_v26, %v2391_v35 }
0x1486   : > { %3786 = vset.pattern.permute.xlu1 %v6874_v44  ;;  %v2375_v44 = vadd.f32 %v2370_v36, %v2351_v3 }
0x1488   : > { %v2399_v63 = vadd.f32 %v2394_v46, %v2375_v44 }
0x14f0   : > { %v2415_v48 = vpop.permute.xlu1 %2414  ;;  %v2413_v15 = vpop.permute.xlu0 %2412 }
0x14f4   : > { %v2417_v9 = vpop.permute.xlu0 %2416 }
0x1501   : > { %v2428_v29 = vpop.permute.xlu1 %2427 }
0x1502   : > { %v2430_v17 = vmul.f32 %v2428_v29, %v5715_v32  ;;  %v2431_v23 = vmul.f32 %v2428_v29, %v5717_v45  ;;  %v2432_v60 = vmul.f32 0.0, %v2428_v29  ;;  %v2395_v29 = vsel %vm623_vm3, %v2391_v35, %v2393_v53 }
0x1504   : > { %2438 = vrot.lane.b32.xlu1 %v2431_v23, %s4186_s2  ;;  %2436 = vrot.lane.b32.xlu0 %v2430_v17, %s4186_s2  ;;  %v2376_v17 = vadd.f32 %v2371_v40, %v2352_v39  ;;  %v2418_v23 = vsel %vm651_vm0, %v2413_v15, %v2415_v48 }
0x1508   : > { %2451 = vperm.xlu1 %3786, %v5702_v62   ;;  %2440 = vrot.lane.b32.xlu0 %v2432_v60, %s4186_s2  ;;  %v2353_v60 = vadd.f32 %v2345_v8, %v2329_v16  ;;  %v6881_v16 = vmov 18  }
0x150a   : > { %v2377_v47 = vadd.f32 %v2369_v11, %v2353_v60  ;;  %v6885_v60 = vmov 33  }
0x150c   : > { %3788 = vset.pattern.permute.xlu1 %v6875_v54  ;;  %v2400_v54 = vadd.f32 %v2395_v29, %v2376_v17  ;;  %v2401_v20 = vadd.f32 %v2393_v53, %v2377_v47  ;;  %v6878_v53 = vmov 11   ;;  %v6882_v17 = vmov 25  }
0x1576   : > { %v2439_v61 = vpop.permute.xlu1 %2438  ;;  %v2437_v50 = vpop.permute.xlu0 %2436 }
0x157a   : > { %v2441_v0 = vpop.permute.xlu0 %2440 }
0x157b   : > { %v2443_v30 = vsel %vm676_vm1, %v2439_v61, %v2441_v0  ;;  %v6887_v0 = vmov 47  }
0x1587   : > { %v2452_v28 = vpop.permute.xlu1 %2451 }
0x1588   : > { %v2454_v21 = vmul.f32 %v2452_v28, %v5715_v32  ;;  %v2455_v31 = vmul.f32 %v2452_v28, %v5717_v45  ;;  %v2456_v13 = vmul.f32 0.0, %v2452_v28  ;;  %v2423_v28 = vadd.f32 %v2413_v15, %v2399_v63 }
0x1589   : > { %v6883_v63 = vmov 31  }
0x158a   : > { %2462 = vrot.lane.b32.xlu1 %v2455_v31, %s4187_s4  ;;  %2460 = vrot.lane.b32.xlu0 %v2454_v21, %s4187_s4  ;;  %v2442_v21 = vsel %vm676_vm1, %v2437_v50, %v2439_v61  ;;  %v2424_v31 = vadd.f32 %v2418_v23, %v2400_v54  ;;  %v2447_v26 = vadd.f32 %v2437_v50, %v2423_v28  ;;  %v6877_v61 = vmov 17  }
0x158b   : > { %v6884_v23 = vmov 20   ;;  %v6886_v54 = vmov 46   ;;  %v6888_v28 = vmov 4  }
0x158c   : > { %v2448_v35 = vadd.f32 %v2442_v21, %v2424_v31  ;;  %v6889_v21 = vmov 48  }
0x158e   : > { %2464 = vrot.lane.b32.xlu0 %v2456_v13, %s4187_s4  ;;  %v2419_v13 = vsel %vm651_vm0, %v2415_v48, %v2417_v9 }
0x158f   : > { %v2425_v8 = vadd.f32 %v2419_v13, %v2401_v20 }
0x1591   : > { %v2449_v15 = vadd.f32 %v2443_v30, %v2425_v8  ;;  %v6894_v30 = vmov 13   ;;  %v6897_v8 = vmov 38  }
0x15fc   : > { %v2463_v41 = vpop.permute.xlu1 %2462  ;;  %v2461_v18 = vpop.permute.xlu0 %2460 }
0x15fd   : > { %v2466_v33 = vsel %vm701_vm2, %v2461_v18, %v2463_v41  ;;  %v2471_v36 = vadd.f32 %v2461_v18, %v2447_v26  ;;  %v6893_v18 = vmov 19  }
0x15fe   : > { %v2472_v3 = vadd.f32 %v2466_v33, %v2448_v35  ;;  %v6891_v35 = vmov 12   ;;  %v6895_v33 = vmov 32  }
0x15ff   : > { %2489 = vrot.lane.b32.xlu1 %v2471_v36, %s6876_s20  ;;  %v6896_v36 = vmov 26  }
0x1600   : > { %2491 = vrot.lane.b32.xlu0 %v2472_v3, %s6876_s20  ;;  %v2465_v11 = vpop.permute.xlu0 %2464  ;;  %v6898_v3 = vmov 39  }
0x1601   : > { %v2467_v48 = vsel %vm701_vm2, %v2463_v41, %v2465_v11  ;;  %v6892_v41 = vmov 24   ;;  %v6900_v11 = vmov 45  }
0x1602   : > { %v2473_v9 = vadd.f32 %v2467_v48, %v2449_v15  ;;  %v6899_v15 = vmov 27   ;;  %v6901_v48 = vmov 40  }
0x1604   : > { %2504 = vperm.xlu0 %3787, %v5702_v62   ;;  %2493 = vrot.lane.b32.xlu1 %v2473_v9, %s6876_s20  ;;  %v6902_v9 = vmov 34  }
0x1608   : > { %2511 = vperm.xlu1 %3788, %v5702_v62   ;;  %3789 = vset.pattern.permute.xlu0 %v6877_v61  ;;  %v6903_v61 = vmov 41  }
0x160c   : > { %3790 = vset.pattern.permute.xlu1 %v6878_v53  ;;  %v6904_v53 = vmov 5  }
0x1671   : > { %v5927_v50 = vpop.permute.xlu1 %2489 }
0x1672   : > { %6879 = vst [vmem:[#allocation36_spill] sm:$0xff] %v5927_v50  ;;  %v5954_v47 = vpop.permute.xlu0 %2491 }
0x1673   : > { %6890 = vst [vmem:[#allocation61_spill] sm:$0xff] %v5954_v47 }
0x1676   : > { %v5929_v40 = vpop.permute.xlu1 %2493 }
0x1677   : > { %6880 = vst [vmem:[#allocation104_spill] sm:$0xff] %v5929_v40 }
0x1683   : > { %v5956_v31 = vpop.permute.xlu0 %2504 }
0x1687   : > { %v2512_v39 = vpop.permute.xlu1 %2511 }
0x1688   : > { %v2514_v46 = vmul.f32 0.0, %v2512_v39  ;;  %v2515_v44 = vmul.f32 %v2512_v39, %v5715_v32  ;;  %v2516_v29 = vmul.f32 %v2512_v39, %v5717_v45  ;;  %v6905_v39 = vmov 6  }
0x168a   : > { %2520 = vrot.lane.b32.xlu1 %v2514_v46, %s4183_s17  ;;  %2522 = vrot.lane.b32.xlu0 %v2515_v44, %s4183_s17 }
0x168e   : > { %2524 = vrot.lane.b32.xlu1 %v2516_v29, %s4183_s17  ;;  %2535 = vperm.xlu0 %3789, %v5702_v62  }
0x1692   : > { %3791 = vset.pattern.permute.xlu0 %v6881_v16 }
0x1693   : > { %2696 = vperm.xlu0 %3791, %v5702_v62  }
0x1697   : > { %3794 = vset.pattern.permute.xlu0 %v6882_v17 }
0x1698   : > { %2720 = vperm.xlu0 %3794, %v5702_v62  }
0x169c   : > { %3797 = vset.pattern.permute.xlu0 %v6883_v63 }
0x169d   : > { %2578 = vperm.xlu0 %3797, %v5702_v62  }
0x16a1   : > { %3800 = vset.pattern.permute.xlu0 %v6884_v23 }
0x16a2   : > { %3056 = vperm.xlu0 %3800, %v5702_v62  }
0x16a6   : > { %3803 = vset.pattern.permute.xlu0 %v6885_v60 }
0x16a7   : > { %2924 = vperm.xlu0 %3803, %v5702_v62  }
0x16ab   : > { %3806 = vset.pattern.permute.xlu0 %v6886_v54 }
0x16ac   : > { %2792 = vperm.xlu0 %3806, %v5702_v62  }
0x16b0   : > { %3809 = vset.pattern.permute.xlu0 %v6887_v0 }
0x16b1   : > { %2972 = vperm.xlu0 %3809, %v5702_v62  }
0x16b5   : > { %3812 = vset.pattern.permute.xlu0 %v6888_v28 }
0x16b6   : > { %2665 = vperm.xlu0 %3812, %v5702_v62  }
0x16ba   : > { %3815 = vset.pattern.permute.xlu0 %v6889_v21 }
0x16fc   : > { %v5958_v13 = vpop.permute.xlu0 %2522  ;;  %v5994_v46 = vpop.permute.xlu1 %2520 }
0x1700   : > { %v5996_v44 = vpop.permute.xlu1 %2524 }
0x170d   : > { %v2536_v26 = vpop.permute.xlu0 %2535 }
0x170e   : > { %v2538_v20 = vmul.f32 0.0, %v2536_v26  ;;  %v2539_v23 = vmul.f32 %v2536_v26, %v5715_v32  ;;  %v2540_v0 = vmul.f32 %v2536_v26, %v5717_v45 }
0x1710   : > { %2544 = vrot.lane.b32.xlu1 %v2538_v20, %s4184_s7 }
0x1712   : > { %v2697_v54 = vpop.permute.xlu0 %2696 }
0x1713   : > { %v2701_v20 = vmul.f32 %v2697_v54, %v5717_v45 }
0x1714   : > { %2672 = vperm.xlu1 %3790, %v5702_v62  }
0x1718   : > { %3792 = vset.pattern.permute.xlu1 %v6891_v35 }
0x1719   : > { %2852 = vperm.xlu1 %3792, %v5702_v62  }
0x171d   : > { %3793 = vset.pattern.permute.xlu1 %v6892_v41 }
0x171e   : > { %2559 = vperm.xlu1 %3793, %v5702_v62  }
0x1722   : > { %3795 = vset.pattern.permute.xlu1 %v6893_v18 }
0x1723   : > { %2876 = vperm.xlu1 %3795, %v5702_v62  }
0x1727   : > { %3796 = vset.pattern.permute.xlu1 %v6894_v30 }
0x1728   : > { %3032 = vperm.xlu1 %3796, %v5702_v62  }
0x172c   : > { %3798 = vset.pattern.permute.xlu1 %v6895_v33  ;;  %v2721_v33 = vpop.permute.xlu0 %2720 }
0x172d   : > { %2744 = vperm.xlu1 %3798, %v5702_v62  }
0x1731   : > { %3799 = vset.pattern.permute.xlu1 %v6896_v36  ;;  %v2723_v36 = vmul.f32 %v2721_v33, %v5715_v32 }
0x1732   : > { %2900 = vperm.xlu1 %3799, %v5702_v62  }
0x1736   : > { %3801 = vset.pattern.permute.xlu1 %v6897_v8 }
0x1737   : > { %2602 = vperm.xlu1 %3801, %v5702_v62  }
0x173b   : > { %3802 = vset.pattern.permute.xlu1 %v6898_v3  ;;  %v2725_v3 = vmul.f32 0.0, %v2721_v33 }
0x173c   : > { %2768 = vperm.xlu1 %3802, %v5702_v62  }
0x1740   : > { %3804 = vset.pattern.permute.xlu1 %v6899_v15 }
0x1741   : > { %3080 = vperm.xlu1 %3804, %v5702_v62  }
0x1745   : > { %3805 = vset.pattern.permute.xlu1 %v6900_v11  ;;  %v2724_v11 = vmul.f32 %v2721_v33, %v5717_v45 }
0x1746   : > { %2626 = vperm.xlu1 %3805, %v5702_v62  }
0x174a   : > { %3807 = vset.pattern.permute.xlu1 %v6901_v48 }
0x174b   : > { %2948 = vperm.xlu1 %3807, %v5702_v62  }
0x174f   : > { %3808 = vset.pattern.permute.xlu1 %v6902_v9 }
0x1750   : > { %3104 = vperm.xlu1 %3808, %v5702_v62  }
0x1754   : > { %3810 = vset.pattern.permute.xlu1 %v6903_v61 }
0x1755   : > { %3128 = vperm.xlu1 %3810, %v5702_v62  }
0x1759   : > { %3811 = vset.pattern.permute.xlu1 %v6889_v21  ;;  %v2700_v21 = vmul.f32 %v2697_v54, %v5715_v32 }
0x175a   : > { %3152 = vperm.xlu1 %3811, %v5702_v62  }
0x175e   : > { %3813 = vset.pattern.permute.xlu1 %v6904_v53 }
0x175f   : > { %2845 = vperm.xlu1 %3813, %v5702_v62  }
0x1763   : > { %3814 = vset.pattern.permute.xlu1 %v6905_v39 }
0x1764   : > { %3025 = vperm.xlu1 %3814, %v5702_v62   ;;  %v2699_v62 = vmul.f32 0.0, %v2697_v54 }
0x1782   : > { %v5998_v29 = vpop.permute.xlu1 %2544 }
0x1793   : > { %v2673_v16 = vpop.permute.xlu1 %2672 }
0x1794   : > { %v2675_v17 = vmul.f32 0.0, %v2673_v16  ;;  %v2676_v63 = vmul.f32 %v2673_v16, %v5715_v32  ;;  %v2677_v60 = vmul.f32 %v2673_v16, %v5717_v45 }
0x1796   : > { %2681 = vrot.lane.b32.xlu0 %v2675_v17, %s4183_s17  ;;  %2683 = vrot.lane.b32.xlu1 %v2676_v63, %s4183_s17  ;;  %v2579_v63 = vpop.permute.xlu0 %2578 }
0x1798   : > { %v2853_v28 = vpop.permute.xlu1 %2852 }
0x1799   : > { %v2855_v35 = vmul.f32 0.0, %v2853_v28  ;;  %v2856_v41 = vmul.f32 %v2853_v28, %v5715_v32  ;;  %v2857_v26 = vmul.f32 %v2853_v28, %v5717_v45 }
0x179a   : > { %2685 = vrot.lane.b32.xlu0 %v2677_v60, %s4183_s17  ;;  %2546 = vrot.lane.b32.xlu1 %v2539_v23, %s4184_s7  ;;  %v2581_v23 = vmul.f32 %v2579_v63, %v5715_v32  ;;  %v2582_v60 = vmul.f32 %v2579_v63, %v5717_v45 }
0x179d   : > { %v2560_v18 = vpop.permute.xlu1 %2559 }
0x179e   : > { %2548 = vrot.lane.b32.xlu0 %v2540_v0, %s4184_s7  ;;  %2705 = vrot.lane.b32.xlu1 %v2699_v62, %s4184_s7  ;;  %v2562_v30 = vmul.f32 %v2560_v18, %v5715_v32  ;;  %v2563_v8 = vmul.f32 %v2560_v18, %v5717_v45  ;;  %v2583_v62 = vmul.f32 0.0, %v2579_v63  ;;  %v3057_v18 = vpop.permute.xlu0 %3056 }
0x17a2   : > { %2709 = vrot.lane.b32.xlu1 %v2701_v20, %s4184_s7  ;;  %2707 = vrot.lane.b32.xlu0 %v2700_v21, %s4184_s7  ;;  %v2877_v15 = vpop.permute.xlu1 %2876 }
0x17a3   : > { %v2879_v48 = vmul.f32 0.0, %v2877_v15  ;;  %v2880_v9 = vmul.f32 %v2877_v15, %v5715_v32  ;;  %v2881_v39 = vmul.f32 %v2877_v15, %v5717_v45 }
0x17a6   : > { %2863 = vrot.lane.b32.xlu1 %v2856_v41, %s4183_s17  ;;  %2861 = vrot.lane.b32.xlu0 %v2855_v35, %s4183_s17 }
0x17a7   : > { %v3033_v61 = vpop.permute.xlu1 %3032 }
0x17a8   : > { %v3035_v53 = vmul.f32 0.0, %v3033_v61  ;;  %v3036_v16 = vmul.f32 %v3033_v61, %v5715_v32  ;;  %v3037_v17 = vmul.f32 %v3033_v61, %v5717_v45 }
0x17aa   : > { %2566 = vrot.lane.b32.xlu1 %v2562_v30, %s4188_s18  ;;  %2865 = vrot.lane.b32.xlu0 %v2857_v26, %s4183_s17  ;;  %v3059_v26 = vmul.f32 0.0, %v3057_v18 }
0x17ac   : > { %v2745_v54 = vpop.permute.xlu1 %2744 }
0x17ad   : > { %v2747_v0 = vmul.f32 %v2745_v54, %v5715_v32  ;;  %v2749_v28 = vmul.f32 0.0, %v2745_v54  ;;  %v2748_v21 = vmul.f32 %v2745_v54, %v5717_v45 }
0x17ae   : > { %2568 = vrot.lane.b32.xlu0 %v2563_v8, %s4188_s18  ;;  %2729 = vrot.lane.b32.xlu1 %v2723_v36, %s4188_s18  ;;  %v3060_v36 = vmul.f32 %v3057_v18, %v5715_v32  ;;  %v3061_v8 = vmul.f32 %v3057_v18, %v5717_v45 }
0x17b1   : > { %v2901_v20 = vpop.permute.xlu1 %2900 }
0x17b2   : > { %2731 = vrot.lane.b32.xlu0 %v2724_v11, %s4188_s18  ;;  %2733 = vrot.lane.b32.xlu1 %v2725_v3, %s4188_s18  ;;  %v2903_v35 = vmul.f32 %v2901_v20, %v5715_v32  ;;  %v2904_v41 = vmul.f32 %v2901_v20, %v5717_v45  ;;  %v2905_v33 = vmul.f32 0.0, %v2901_v20 }
0x17b6   : > { %2885 = vrot.lane.b32.xlu0 %v2879_v48, %s4184_s7  ;;  %2887 = vrot.lane.b32.xlu1 %v2880_v9, %s4184_s7  ;;  %v2603_v30 = vpop.permute.xlu1 %2602 }
0x17b7   : > { %v2605_v15 = vmul.f32 %v2603_v30, %v5715_v32  ;;  %v2606_v11 = vmul.f32 %v2603_v30, %v5717_v45  ;;  %v2607_v9 = vmul.f32 0.0, %v2603_v30 }
0x17ba   : > { %2889 = vrot.lane.b32.xlu0 %v2881_v39, %s4184_s7  ;;  %3041 = vrot.lane.b32.xlu1 %v3035_v53, %s4183_s17 }
0x17bb   : > { %v2769_v3 = vpop.permute.xlu1 %2768 }
0x17bc   : > { %v2771_v61 = vmul.f32 %v2769_v3, %v5715_v32  ;;  %v2773_v53 = vmul.f32 0.0, %v2769_v3  ;;  %v2772_v39 = vmul.f32 %v2769_v3, %v5717_v45 }
0x17be   : > { %3043 = vrot.lane.b32.xlu0 %v3036_v16, %s4183_s17  ;;  %3045 = vrot.lane.b32.xlu1 %v3037_v17, %s4183_s17  ;;  %v2925_v17 = vpop.permute.xlu0 %2924  ;;  %s6906_s17 = smov 47  }
0x17bf   : > { %v2927_v63 = vmul.f32 %v2925_v17, %v5715_v32  ;;  %v2929_v54 = vmul.f32 0.0, %v2925_v17 }
0x17c0   : > { %v3081_v48 = vpop.permute.xlu1 %3080 }
0x17c2   : > { %2589 = vrot.lane.b32.xlu1 %v2582_v60, %s4185_s25  ;;  %2587 = vrot.lane.b32.xlu0 %v2581_v23, %s4185_s25  ;;  %v2928_v23 = vmul.f32 %v2925_v17, %v5717_v45 }
0x17c5   : > { %v2627_v16 = vpop.permute.xlu1 %2626 }
0x17c6   : > { %2753 = vrot.lane.b32.xlu1 %v2747_v0, %s4185_s25  ;;  %2591 = vrot.lane.b32.xlu0 %v2583_v62, %s4185_s25  ;;  %v3083_v62 = vmul.f32 %v3081_v48, %v5715_v32  ;;  %v3084_v0 = vmul.f32 %v3081_v48, %v5717_v45  ;;  %v2629_v20 = vmul.f32 %v2627_v16, %v5715_v32  ;;  %v2631_v30 = vmul.f32 0.0, %v2627_v16 }
0x17ca   : > { %2757 = vrot.lane.b32.xlu1 %v2749_v28, %s4185_s25  ;;  %2755 = vrot.lane.b32.xlu0 %v2748_v21, %s4185_s25  ;;  %v2949_v60 = vpop.permute.xlu1 %2948  ;;  %v3085_v28 = vmul.f32 0.0, %v3081_v48 }
0x17cb   : > { %v2951_v3 = vmul.f32 %v2949_v60, %v5715_v32 }
0x17ce   : > { %2911 = vrot.lane.b32.xlu1 %v2904_v41, %s4188_s18  ;;  %2909 = vrot.lane.b32.xlu0 %v2903_v35, %s4188_s18  ;;  %v2630_v35 = vmul.f32 %v2627_v16, %v5717_v45  ;;  %v2793_v41 = vpop.permute.xlu0 %2792 }
0x17cf   : > { %v3105_v21 = vpop.permute.xlu1 %3104 }
0x17d0   : > { %v3109_v16 = vmul.f32 0.0, %v3105_v21 }
0x17d2   : > { %2913 = vrot.lane.b32.xlu0 %v2905_v33, %s4188_s18  ;;  %3065 = vrot.lane.b32.xlu1 %v3059_v26, %s4184_s7  ;;  %v2795_v26 = vmul.f32 %v2793_v41, %v5715_v32  ;;  %v2797_v33 = vmul.f32 0.0, %v2793_v41 }
0x17d4   : > { %v3129_v18 = vpop.permute.xlu1 %3128 }
0x17d6   : > { %3069 = vrot.lane.b32.xlu1 %v3061_v8, %s4184_s7  ;;  %3067 = vrot.lane.b32.xlu0 %v3060_v36, %s4184_s7  ;;  %v2796_v36 = vmul.f32 %v2793_v41, %v5717_v45  ;;  %v3132_v41 = vmul.f32 %v3129_v18, %v5717_v45  ;;  %s6907_s7 = smov 46  }
0x17d9   : > { %v3153_v8 = vpop.permute.xlu1 %3152 }
0x17da   : > { %2613 = vrot.lane.b32.xlu1 %v2606_v11, %s4186_s2  ;;  %2611 = vrot.lane.b32.xlu0 %v2605_v15, %s4186_s2  ;;  %v2952_v15 = vmul.f32 %v2949_v60, %v5717_v45  ;;  %v2973_v11 = vpop.permute.xlu0 %2972 }
0x17de   : > { %2777 = vrot.lane.b32.xlu1 %v2771_v61, %s4186_s2  ;;  %2615 = vrot.lane.b32.xlu0 %v2607_v9, %s4186_s2  ;;  %v6090_v48 = vpop.permute.xlu1 %2845  ;;  %v2953_v9 = vmul.f32 0.0, %v2949_v60  ;;  %v3107_v61 = vmul.f32 %v3105_v21, %v5715_v32 }
0x17e2   : > { %2781 = vrot.lane.b32.xlu1 %v2773_v53, %s4186_s2  ;;  %2779 = vrot.lane.b32.xlu0 %v2772_v39, %s4186_s2  ;;  %v2666_v53 = vpop.permute.xlu0 %2665  ;;  %v3108_v39 = vmul.f32 %v3105_v21, %v5717_v45 }
0x17e3   : > { %v6098_v17 = vpop.permute.xlu1 %3025 }
0x17e6   : > { %2935 = vrot.lane.b32.xlu1 %v2928_v23, %s4185_s25  ;;  %2933 = vrot.lane.b32.xlu0 %v2927_v63, %s4185_s25  ;;  %v2975_v63 = vmul.f32 %v2973_v11, %v5715_v32  ;;  %v2976_v23 = vmul.f32 %v2973_v11, %v5717_v45 }
0x17ea   : > { %3089 = vrot.lane.b32.xlu1 %v3083_v62, %s4188_s18  ;;  %2937 = vrot.lane.b32.xlu0 %v2929_v54, %s4185_s25 }
0x17ee   : > { %3093 = vrot.lane.b32.xlu1 %v3085_v28, %s4188_s18  ;;  %3091 = vrot.lane.b32.xlu0 %v3084_v0, %s4188_s18  ;;  %v2977_v0 = vmul.f32 0.0, %v2973_v11  ;;  %v3131_v28 = vmul.f32 %v3129_v18, %v5715_v32  ;;  %v2669_v11 = vmul.f32 %v2666_v53, %v5715_v32  ;;  %s6387_s18 = sld [smem:[#allocation17 + $0x1]] }
0x17f2   : > { %2637 = vrot.lane.b32.xlu1 %v2630_v35, %s4187_s4  ;;  %2635 = vrot.lane.b32.xlu0 %v2629_v20, %s4187_s4 }
0x17f6   : > { %2639 = vrot.lane.b32.xlu0 %v2631_v30, %s4187_s4  ;;  %2801 = vrot.lane.b32.xlu1 %v2795_v26, %s4187_s4  ;;  %v3133_v26 = vmul.f32 0.0, %v3129_v18 }
0x17fa   : > { %2803 = vrot.lane.b32.xlu0 %v2796_v36, %s4187_s4  ;;  %2805 = vrot.lane.b32.xlu1 %v2797_v33, %s4187_s4  ;;  %v2670_v36 = vmul.f32 %v2666_v53, %v5717_v45 }
0x17fe   : > { %2957 = vrot.lane.b32.xlu0 %v2951_v3, %s4186_s2  ;;  %2959 = vrot.lane.b32.xlu1 %v2952_v15, %s4186_s2  ;;  %v2668_v15 = vmul.f32 0.0, %v2666_v53 }
0x1802   : > { %2961 = vrot.lane.b32.xlu0 %v2953_v9, %s4186_s2  ;;  %3113 = vrot.lane.b32.xlu1 %v3107_v61, %s4185_s25  ;;  %v3155_v61 = vmul.f32 %v3153_v8, %v5715_v32 }
0x1806   : > { %3115 = vrot.lane.b32.xlu0 %v3108_v39, %s4185_s25  ;;  %3117 = vrot.lane.b32.xlu1 %v3109_v16, %s4185_s25  ;;  %v3156_v39 = vmul.f32 %v3153_v8, %v5717_v45  ;;  %s6908_s25 = smov 45  }
0x1808   : > { %v2684_v60 = vpop.permute.xlu1 %2683  ;;  %v2682_v54 = vpop.permute.xlu0 %2681 }
0x1809   : > { %v2687_v62 = vsel %vm573_vm4, %v2682_v54, %v2684_v60 }
0x180a   : > { %2983 = vrot.lane.b32.xlu1 %v2976_v23, %s4187_s4  ;;  %2981 = vrot.lane.b32.xlu0 %v2975_v63, %s4187_s4  ;;  %v2692_v16 = vadd.f32 %v2687_v62, %v2668_v15  ;;  %v3157_v62 = vmul.f32 0.0, %v3153_v8  ;;  %v2527_v8 = vsel %vm573_vm4, %v5958_v13, %v5996_v44 }
0x180c   : > { %v2547_v21 = vpop.permute.xlu1 %2546  ;;  %v2686_v20 = vpop.permute.xlu0 %2685 }
0x180d   : > { %v2688_v35 = vsel %vm573_vm4, %v2684_v60, %v2686_v20  ;;  %v2694_v9 = vadd.f32 %v2686_v20, %v2670_v36  ;;  %v2507_v60 = vmul.f32 0.0, %v5956_v31 }
0x180e   : > { %3137 = vrot.lane.b32.xlu1 %v3131_v28, %s4186_s2  ;;  %2985 = vrot.lane.b32.xlu0 %v2977_v0, %s4187_s4  ;;  %v2693_v18 = vadd.f32 %v2688_v35, %v2669_v11  ;;  %v2526_v28 = vsel %vm573_vm4, %v5994_v46, %v5958_v13  ;;  %v2848_v35 = vmul.f32 0.0, %v6090_v48  ;;  %v2509_v46 = vmul.f32 %v5956_v31, %v5717_v45 }
0x180f   : > { %v2531_v15 = vadd.f32 %v2526_v28, %v2507_v60 }
0x1810   : > { %v2706_v30 = vpop.permute.xlu1 %2705  ;;  %v2549_v33 = vpop.permute.xlu0 %2548 }
0x1811   : > { %v2551_v3 = vsel %vm598_vm5, %v2547_v21, %v2549_v33 }
0x1812   : > { %3141 = vrot.lane.b32.xlu1 %v3133_v26, %s4186_s2  ;;  %3139 = vrot.lane.b32.xlu0 %v3132_v41, %s4186_s2  ;;  %v2550_v26 = vsel %vm598_vm5, %v5998_v29, %v2547_v21  ;;  %v2508_v29 = vmul.f32 %v5956_v31, %v5715_v32  ;;  %v2849_v21 = vmul.f32 %v6090_v48, %v5715_v32 }
0x1814   : > { %v2710_v63 = vpop.permute.xlu1 %2709  ;;  %v2708_v23 = vpop.permute.xlu0 %2707  ;;  %v2532_v13 = vadd.f32 %v2527_v8, %v2508_v29 }
0x1815   : > { %v2718_v54 = vadd.f32 %v2710_v63, %v2694_v9  ;;  %v2711_v0 = vsel %vm598_vm5, %v2706_v30, %v2708_v23  ;;  %v2712_v53 = vsel %vm598_vm5, %v2708_v23, %v2710_v63  ;;  %v2533_v63 = vadd.f32 %v5996_v44, %v2509_v46 }
0x1816   : > { %v2716_v20 = vadd.f32 %v2711_v0, %v2692_v16  ;;  %v2717_v41 = vadd.f32 %v2712_v53, %v2693_v18  ;;  %3163 = vrot.lane.b32.xlu1 %v3156_v39, %s4187_s4  ;;  %3161 = vrot.lane.b32.xlu0 %v3155_v61, %s4187_s4  ;;  %v2850_v61 = vmul.f32 %v6090_v48, %v5717_v45 }
0x1817   : > { %v2555_v39 = vadd.f32 %v2550_v26, %v2531_v15  ;;  %v2557_v28 = vadd.f32 %v2549_v33, %v2533_v63 }
0x1818   : > { %v2864_v36 = vpop.permute.xlu1 %2863  ;;  %v2862_v30 = vpop.permute.xlu0 %2861 }
0x1819   : > { %v2867_v11 = vsel %vm573_vm4, %v2862_v30, %v2864_v36 }
0x181a   : > { %v2872_v9 = vadd.f32 %v2867_v11, %v2848_v35  ;;  %3165 = vrot.lane.b32.xlu0 %v3157_v62, %s4187_s4  ;;  %v2556_v62 = vadd.f32 %v2551_v3, %v2532_v13  ;;  %s6272_s4 = sld [smem:[#allocation13 + $0x1]] }
0x181c   : > { %v2567_v16 = vpop.permute.xlu1 %2566  ;;  %v2866_v18 = vpop.permute.xlu0 %2865 }
0x181d   : > { %v6144_v23 = vadd.f32 %v2567_v16, %v2555_v39  ;;  %v2868_v60 = vsel %vm573_vm4, %v2864_v36, %v2866_v18  ;;  %v2874_v0 = vadd.f32 %v2866_v18, %v2850_v61 }
0x181e   : > { %v2873_v53 = vadd.f32 %v2868_v60, %v2849_v21 }
0x1820   : > { %v2730_v35 = vpop.permute.xlu1 %2729  ;;  %v2569_v26 = vpop.permute.xlu0 %2568 }
0x1821   : > { %v2740_v30 = vadd.f32 %v2730_v35, %v2716_v20  ;;  %v2570_v31 = vsel %vm623_vm3, %v2567_v16, %v2569_v26  ;;  %v6148_v15 = vadd.f32 %v2569_v26, %v2557_v28 }
0x1822   : > { %v2575_v48 = vadd.f32 %v2570_v31, %v2556_v62 }
0x1824   : > { %v2734_v11 = vpop.permute.xlu1 %2733  ;;  %v2732_v40 = vpop.permute.xlu0 %2731 }
0x1825   : > { %v2735_v44 = vsel %vm623_vm3, %v2730_v35, %v2732_v40  ;;  %v2736_v46 = vsel %vm623_vm3, %v2732_v40, %v2734_v11  ;;  %v3030_v40 = vmul.f32 %v6098_v17, %v5717_v45 }
0x1826   : > { %v6152_v36 = vadd.f32 %v2735_v44, %v2717_v41  ;;  %v6154_v8 = vadd.f32 %v2736_v46, %v2718_v54  ;;  %v3028_v54 = vmul.f32 0.0, %v6098_v17  ;;  %v3029_v41 = vmul.f32 %v6098_v17, %v5715_v32 }
0x1828   : > { %v2888_v33 = vpop.permute.xlu1 %2887  ;;  %v2886_v3 = vpop.permute.xlu0 %2885 }
0x1829   : > { %v2891_v61 = vsel %vm598_vm5, %v2886_v3, %v2888_v33 }
0x182a   : > { %v6157_v20 = vadd.f32 %v2891_v61, %v2872_v9 }
0x182c   : > { %v3042_v39 = vpop.permute.xlu1 %3041  ;;  %v2890_v29 = vpop.permute.xlu0 %2889 }
0x182d   : > { %v2892_v21 = vsel %vm598_vm5, %v2888_v33, %v2890_v29  ;;  %v6160_v16 = vadd.f32 %v2890_v29, %v2874_v0 }
0x182e   : > { %v6162_v18 = vadd.f32 %v2892_v21, %v2873_v53 }
0x1830   : > { %v3046_v63 = vpop.permute.xlu1 %3045  ;;  %v3044_v60 = vpop.permute.xlu0 %3043 }
0x1831   : > { %v6169_v9 = vadd.f32 %v3046_v63, %v3030_v40  ;;  %v3047_v13 = vsel %vm573_vm4, %v3042_v39, %v3044_v60  ;;  %v3048_v28 = vsel %vm573_vm4, %v3044_v60, %v3046_v63 }
0x1832   : > { %v6173_v0 = vadd.f32 %v3047_v13, %v3028_v54  ;;  %v6175_v53 = vadd.f32 %v3048_v28, %v3029_v41 }
0x1834   : > { %v2590_v62 = vpop.permute.xlu1 %2589  ;;  %v2588_v35 = vpop.permute.xlu0 %2587 }
0x1835   : > { %v2593_v28 = vsel %vm651_vm0, %v2588_v35, %v2590_v62  ;;  %v2598_v50 = vadd.f32 %v2588_v35, %v6144_v23 }
0x1836   : > { %v2599_v1 = vadd.f32 %v2593_v28, %v2575_v48 }
0x1838   : > { %v2754_v45 = vpop.permute.xlu1 %2753  ;;  %v2592_v26 = vpop.permute.xlu0 %2591 }
0x1839   : > { %v2594_v55 = vsel %vm651_vm0, %v2590_v62, %v2592_v26  ;;  %v2764_v25 = vadd.f32 %v2754_v45, %v2740_v30 }
0x183a   : > { %v2600_v24 = vadd.f32 %v2594_v55, %v6148_v15 }
0x183c   : > { %v2758_v31 = vpop.permute.xlu1 %2757  ;;  %v2756_v11 = vpop.permute.xlu0 %2755 }
0x183d   : > { %v2759_v23 = vsel %vm651_vm0, %v2754_v45, %v2756_v11  ;;  %v2760_v35 = vsel %vm651_vm0, %v2756_v11, %v2758_v31 }
0x1840   : > { %v6177_v44 = vpop.permute.xlu1 %2911  ;;  %v6179_v32 = vpop.permute.xlu0 %2909 }
0x1841   : > { %v2915_v11 = vsel %vm623_vm3, %v6179_v32, %v6177_v44 }
0x1844   : > { %v6181_v17 = vpop.permute.xlu1 %3065  ;;  %v6183_v46 = vpop.permute.xlu0 %2913 }
0x1848   : > { %v6185_v33 = vpop.permute.xlu1 %3069  ;;  %v6187_v3 = vpop.permute.xlu0 %3067 }
0x184c   : > { %v2614_v61 = vpop.permute.xlu1 %2613  ;;  %v2612_v39 = vpop.permute.xlu0 %2611 }
0x184d   : > { %v2617_v47 = vsel %vm676_vm1, %v2612_v39, %v2614_v61  ;;  %v2622_v4 = vadd.f32 %v2612_v39, %v2598_v50 }
0x184e   : > { %v2623_v14 = vadd.f32 %v2617_v47, %v2599_v1 }
0x1850   : > { %v2778_v29 = vpop.permute.xlu1 %2777  ;;  %v2616_v21 = vpop.permute.xlu0 %2615 }
0x1851   : > { %v2618_v5 = vsel %vm676_vm1, %v2614_v61, %v2616_v21  ;;  %v2788_v48 = vadd.f32 %v2778_v29, %v2764_v25  ;;  %v2920_v61 = vadd.f32 %v6179_v32, %v6157_v20 }
0x1852   : > { %v2624_v50 = vadd.f32 %v2618_v5, %v2600_v24 }
0x1854   : > { %v2782_v40 = vpop.permute.xlu1 %2781  ;;  %v2780_v54 = vpop.permute.xlu0 %2779 }
0x1855   : > { %v2783_v30 = vsel %vm676_vm1, %v2778_v29, %v2780_v54  ;;  %v2784_v62 = vsel %vm676_vm1, %v2780_v54, %v2782_v40  ;;  %v2921_v29 = vadd.f32 %v2915_v11, %v6162_v18  ;;  %v2916_v54 = vsel %vm623_vm3, %v6177_v44, %v6183_v46 }
0x1856   : > { %v2922_v20 = vadd.f32 %v2916_v54, %v6160_v16  ;;  %v3071_v44 = vsel %vm598_vm5, %v6181_v17, %v6187_v3 }
0x1858   : > { %v6189_v41 = vpop.permute.xlu1 %2935  ;;  %v2934_v63 = vpop.permute.xlu0 %2933 }
0x1859   : > { %v2939_v39 = vsel %vm651_vm0, %v2934_v63, %v6189_v41  ;;  %v2944_v28 = vadd.f32 %v2934_v63, %v2920_v61 }
0x185c   : > { %v6191_v60 = vpop.permute.xlu1 %3089  ;;  %v2938_v13 = vpop.permute.xlu0 %2937 }
0x1860   : > { %v6194_v52 = vpop.permute.xlu1 %3093  ;;  %v6196_v38 = vpop.permute.xlu0 %3091 }
0x1864   : > { %v2638_v6 = vpop.permute.xlu1 %2637  ;;  %v2636_v57 = vpop.permute.xlu0 %2635 }
0x1865   : > { %v2641_v12 = vsel %vm701_vm2, %v2636_v57, %v2638_v6  ;;  %v2646_v51 = vadd.f32 %v2636_v57, %v2622_v4  ;;  %v2766_v4 = vadd.f32 %v2760_v35, %v6154_v8  ;;  %v2945_v35 = vadd.f32 %v2939_v39, %v2921_v29 }
0x1866   : > { %v2647_v56 = vadd.f32 %v2641_v12, %v2623_v14  ;;  %v2765_v12 = vadd.f32 %v2759_v23, %v6152_v36 }
0x1867   : > { %2652 = vrot.lane.b32.xlu1 %v2646_v51, %s4186_s2  ;;  %v2790_v15 = vadd.f32 %v2784_v62, %v2766_v4 }
0x1868   : > { %v2802_v1 = vpop.permute.xlu1 %2801  ;;  %2654 = vrot.lane.b32.xlu0 %v2647_v56, %s4186_s2  ;;  %v2640_v47 = vpop.permute.xlu0 %2639  ;;  %v2789_v25 = vadd.f32 %v2783_v30, %v2765_v12  ;;  %v3095_v12 = vsel %vm623_vm3, %v6191_v60, %v6196_v38 }
0x1869   : > { %v2812_v57 = vadd.f32 %v2802_v1, %v2788_v48  ;;  %v2642_v55 = vsel %vm701_vm2, %v2638_v6, %v2640_v47  ;;  %v2940_v48 = vsel %vm651_vm0, %v6189_v41, %v2938_v13  ;;  %v3072_v41 = vsel %vm598_vm5, %v6187_v3, %v6185_v33 }
0x186a   : > { %v2648_v14 = vadd.f32 %v2642_v55, %v2624_v50  ;;  %v2946_v46 = vadd.f32 %v2940_v48, %v2922_v20  ;;  %v3076_v55 = vadd.f32 %v3071_v44, %v6173_v0  ;;  %v3077_v4 = vadd.f32 %v3072_v41, %v6175_v53  ;;  %v890_v44 = vld [vmem:[#allocation9 + $0x1] ss:$8 sm:$0x3] }
0x186b   : > { %v3096_v0 = vsel %vm623_vm3, %v6196_v38, %v6194_v52  ;;  %v3078_v53 = vadd.f32 %v6185_v33, %v6169_v9 }
0x186c   : > { %v2806_v51 = vpop.permute.xlu1 %2805  ;;  %2830 = vrot.lane.b32.xlu0 %v2812_v57, %s6906_s17  ;;  %2656 = vrot.lane.b32.xlu1 %v2648_v14, %s4186_s2  ;;  %v2804_v24 = vpop.permute.xlu0 %2803  ;;  %v3100_v3 = vadd.f32 %v6191_v60, %v3076_v55  ;;  %s6268_s2 = sld [smem:[#allocation13]] }
0x186d   : > { %v2807_v56 = vsel %vm701_vm2, %v2802_v1, %v2804_v24  ;;  %v2808_v5 = vsel %vm701_vm2, %v2804_v24, %v2806_v51 }
0x186e   : > { %v2813_v45 = vadd.f32 %v2807_v56, %v2789_v25  ;;  %v2814_v26 = vadd.f32 %v2808_v5, %v2790_v15  ;;  %v3101_v15 = vadd.f32 %v3095_v12, %v3077_v4 }
0x1870   : > { %v2960_v6 = vpop.permute.xlu1 %2959  ;;  %2834 = vrot.lane.b32.xlu0 %v2814_v26, %s6906_s17  ;;  %2832 = vrot.lane.b32.xlu1 %v2813_v45, %s6906_s17  ;;  %v2958_v36 = vpop.permute.xlu0 %2957 }
0x1871   : > { %v2963_v23 = vsel %vm676_vm1, %v2958_v36, %v2960_v6  ;;  %v2968_v50 = vadd.f32 %v2958_v36, %v2944_v28  ;;  %v3826_v28 = vld [vmem:[%s4568_s27] sm:$0xff] }
0x1872   : > { %v2969_v32 = vadd.f32 %v2963_v23, %v2945_v35  ;;  %v476_v23 = vrot.slane %v3826_v28, 4  ;;  %v1823_v12 = vstv %s6268_s2 }
0x1874   : > { %v3114_v8 = vpop.permute.xlu1 %3113  ;;  %v2962_v31 = vpop.permute.xlu0 %2961  ;;  %v477_v20 = vmax.f32 %v3826_v28, %v476_v23 }
0x1875   : > { %v2964_v18 = vsel %vm676_vm1, %v2960_v6, %v2962_v31  ;;  %v3124_v56 = vadd.f32 %v3114_v8, %v3100_v3  ;;  %v3102_v6 = vadd.f32 %v3096_v0, %v3078_v53 }
0x1876   : > { %v2970_v16 = vadd.f32 %v2964_v18, %v2946_v46 }
0x1878   : > { %v3118_v21 = vpop.permute.xlu1 %3117  ;;  %v3116_v40 = vpop.permute.xlu0 %3115 }
0x1879   : > { %v3119_v25 = vsel %vm651_vm0, %v3114_v8, %v3116_v40  ;;  %v3120_v60 = vsel %vm651_vm0, %v3116_v40, %v3118_v21  ;;  %v3825_v40 = vld [vmem:[%s4568_s27 + $0x8] sm:$0xff] }
0x187a   : > { %v3125_v45 = vadd.f32 %v3119_v25, %v3101_v15  ;;  %v3126_v8 = vadd.f32 %v3120_v60, %v3102_v6  ;;  %v482_v54 = vrot.slane %v3825_v40, 4 }
0x187c   : > { %v2984_v1 = vpop.permute.xlu1 %2983  ;;  %v2982_v47 = vpop.permute.xlu0 %2981  ;;  %v483_v35 = vmax.f32 %v3825_v40, %v482_v54  ;;  %v495_v48 = vadd.f32 %v3825_v40, %v482_v54 }
0x187d   : > { %v2987_v30 = vsel %vm701_vm2, %v2982_v47, %v2984_v1  ;;  %v2992_v62 = vadd.f32 %v2982_v47, %v2968_v50  ;;  %v712_v50 = vlaneseq }
0x187e   : > { %v2993_v63 = vadd.f32 %v2987_v30, %v2969_v32  ;;  %v489_v32 = vadd.f32 %v3826_v28, %v476_v23  ;;  %v496_v47 = vrot.slane %v495_v48, 2  ;;  %v478_v30 = vrot.slane %v477_v20, 2 }
0x187f   : > { %3010 = vrot.lane.b32.xlu1 %v2992_v62, %s6907_s7  ;;  %v6270_v18 = vshrl.u32 %v712_v50, 7 }
0x1880   : > { %v3138_v13 = vpop.permute.xlu1 %3137  ;;  %3012 = vrot.lane.b32.xlu0 %v2993_v63, %s6907_s7  ;;  %v2986_v57 = vpop.permute.xlu0 %2985  ;;  %v490_v62 = vrot.slane %v489_v32, 2  ;;  %v497_v63 = vadd.f32 %v496_v47, %v495_v48  ;;  %v6909_v47 = vld [vmem:[#allocation100_spill] sm:$0xff] }
0x1881   : > { %v2988_v17 = vsel %vm701_vm2, %v2984_v1, %v2986_v57  ;;  %v3148_v26 = vadd.f32 %v3138_v13, %v3124_v56  ;;  %v484_v1 = vrot.slane %v483_v35, 2  ;;  %v6275_v41 = vsub.s32 1, %v6270_v18 }
0x1882   : > { %v2994_v14 = vadd.f32 %v2988_v17, %v2970_v16  ;;  %v710_v16 = vld [vmem:[#allocation9] ss:$8 sm:$0x3]  ;;  %v479_v57 = vmax.f32 %v477_v20, %v478_v30  ;;  %v6279_v17 = vadd.f32 %v490_v62, %v489_v32  ;;  %v6282_v4 = vsub.s32 0, %v6270_v18 }
0x1883   : > { %v485_v46 = vmax.f32 %v483_v35, %v484_v1  ;;  %v899_v55 = vrot.slane %v890_v44, %v6275_v41  ;;  %v498_v25 = vrot.slane %v497_v63, 1  ;;  %v719_v15 = vrot.slane %v710_v16, %v6275_v41  ;;  %v6910_v62 = vld [vmem:[#allocation67_spill] sm:$0xff] }
0x1884   : > { %v3142_v51 = vpop.permute.xlu1 %3141  ;;  %3014 = vrot.lane.b32.xlu1 %v2994_v14, %s6907_s7  ;;  %v3140_v24 = vpop.permute.xlu0 %3139  ;;  %v913_v14 = vsel %vm911_vm6, %v5658_v37, %v5629_v59  ;;  %v895_v0 = vrot.slane %v890_v44, %v6282_v4  ;;  %v1095_v56 = vsel %vm1093_vm8, %v5660_v19, %v5631_v2  ;;  %v912_v59 = vsel %vm911_vm6, %v5641_v49, %v5658_v37  ;;  %v1415_v37 = vld [vmem:[#allocation9 + $0x4] ss:$8 sm:$0x3] }
0x1885   : > { %v3143_v5 = vsel %vm676_vm1, %v3138_v13, %v3140_v24  ;;  %v3144_v61 = vsel %vm676_vm1, %v3140_v24, %v3142_v51  ;;  %v1072_v13 = vld [vmem:[#allocation9 + $0x2] ss:$8 sm:$0x3]  ;;  %v486_v3 = vrot.slane %v485_v46, 1  ;;  %v733_v24 = vsel %vm731_vm7, %v5656_v42, %v5627_v10  ;;  %v6911_v44 = vld [vmem:[#allocation29_spill] sm:$0xff] }
0x1886   : > { %v3149_v36 = vadd.f32 %v3143_v5, %v3125_v45  ;;  %v3150_v9 = vadd.f32 %v3144_v61, %v3126_v8  ;;  %v1081_v51 = vrot.slane %v1072_v13, %v6275_v41  ;;  %v3827_v5 = vld [vmem:[%s4576_s26] sm:$0xff]  ;;  %v480_v45 = vrot.slane %v479_v57, 1 }
0x1887   : > { %v1889_v53 = vrot.slane %v3827_v5, 4  ;;  %v917_v60 = vmul.f32 %v913_v14, %v899_v55  ;;  %v715_v10 = vrot.slane %v710_v16, %v6282_v4  ;;  %v732_v2 = vsel %vm731_vm7, %v5639_v22, %v5656_v42  ;;  %v1779_v16 = vld [vmem:[#allocation9 + $0x6] ss:$8 sm:$0x3] }
0x1888   : > { %v3164_v31 = vpop.permute.xlu1 %3163  ;;  %v3162_v11 = vpop.permute.xlu0 %3161  ;;  %v737_v61 = vmul.f32 %v733_v24, %v719_v15  ;;  %v1099_v49 = vmul.f32 %v1095_v56, %v1081_v51  ;;  %v916_v8 = vmul.f32 %v912_v59, %v895_v0  ;;  %v1424_v42 = vrot.slane %v1415_v37, %v6275_v41  ;;  %v6914_v15 = vld [vmem:[#allocation44_spill] sm:$0xff]  ;;  %v6915_v51 = vld [vmem:[#allocation58_spill] sm:$0xff] }
0x1889   : > { %v3167_v52 = vsel %vm701_vm2, %v3162_v11, %v3164_v31  ;;  %v3172_v38 = vadd.f32 %v3162_v11, %v3148_v26  ;;  %v3828_v26 = vld [vmem:[%s4576_s26 + $0x8] sm:$0xff]  ;;  %v1077_v11 = vrot.slane %v1072_v13, %v6282_v4  ;;  %v736_v28 = vmul.f32 %v732_v2, %v715_v10  ;;  %s6338_s26 = sld [smem:[#allocation17]] }
0x188a   : > { %v3173_v39 = vadd.f32 %v3167_v52, %v3149_v36  ;;  %v1895_v6 = vrot.slane %v3828_v26, 4  ;;  %v1846_v36 = vstv %s6272_s4  ;;  %v1094_v52 = vsel %vm1093_vm8, %v5643_v34, %v5660_v19  ;;  %v6916_v10 = vld [vmem:[#allocation86_spill] sm:$0xff] }
0x188b   : > { %3190 = vrot.lane.b32.xlu0 %v3172_v38, %s6908_s25  ;;  %v487_v38 = vmax.f32 %v485_v46, %v486_v3  ;;  %v1098_v22 = vmul.f32 %v1094_v52, %v1077_v11  ;;  %v1420_v34 = vrot.slane %v1415_v37, %v6282_v4  ;;  %v1438_v19 = vsel %vm1436_vm9, %v5664_v43, %v5635_v7 }
0x188c   : > { %3192 = vrot.lane.b32.xlu1 %v3173_v39, %s6908_s25  ;;  %v3166_v33 = vpop.permute.xlu0 %3165  ;;  %v1597_v39 = vld [vmem:[#allocation9 + $0x5] ss:$8 sm:$0x3]  ;;  %v1896_v40 = vmax.f32 %v3828_v26, %v1895_v6  ;;  %v918_v50 = vadd.f32 %v916_v8, %v736_v28  ;;  %v1258_v20 = vsel %vm676_vm1, %v5662_v58, %v5633_v27  ;;  %v1437_v30 = vsel %vm1436_vm9, %v6909_v47, %v5664_v43  ;;  %v2294_v8 = vld [vmem:[#allocation9 + $0x1] ss:$8 sm:$0x3] }
0x188d   : > { %v3168_v29 = vsel %vm701_vm2, %v3164_v31, %v3166_v33  ;;  %v492_v31 = vrot.slane %v6279_v17, 1  ;;  %v499_v33 = vadd.f32 %v498_v25, %v497_v63  ;;  %v1602_v35 = vrot.slane %v1597_v39, %v6282_v4  ;;  %v6912_v27 = vld [vmem:[#allocation32_spill] sm:$0xff]  ;;  %v6913_v25 = vld [vmem:[#allocation42_spill] sm:$0xff] }
0x188e   : > { %v3174_v21 = vadd.f32 %v3168_v29, %v3150_v9  ;;  %v1890_v9 = vmax.f32 %v3827_v5, %v1889_v53  ;;  %v481_v29 = vmax.f32 %v479_v57, %v480_v45  ;;  %v1606_v32 = vrot.slane %v1597_v39, %v6275_v41  ;;  %v6919_v47 = vld [vmem:[#allocation34_spill] sm:$0xff] }
0x188f   : > { %v1620_v7 = vsel %vm1618_vm10, %v6911_v44, %v6910_v62  ;;  %v1897_v46 = vrot.slane %v1896_v40, 2  ;;  %v1902_v63 = vadd.f32 %v3827_v5, %v1889_v53  ;;  %v1100_v13 = vadd.f32 %v1098_v22, %v918_v50 }
0x1890   : > { %3194 = vrot.lane.b32.xlu0 %v3174_v21, %s6908_s25  ;;  %v919_v21 = vadd.f32 %v917_v60, %v737_v61  ;;  %v1891_v1 = vrot.slane %v1890_v9, 2  ;;  %v1442_v57 = vmul.f32 %v1438_v19, %v1424_v42  ;;  %v1788_v55 = vrot.slane %v1779_v16, %v6275_v41 }
0x1891   : > { %v1257_v14 = vsel %vm676_vm1, %v6912_v27, %v5662_v58  ;;  %v1619_v43 = vsel %vm1618_vm10, %v6913_v25, %v6911_v44  ;;  %v1802_v24 = vsel %vm1800_vm11, %v6915_v51, %v6914_v15  ;;  %v1441_v56 = vmul.f32 %v1437_v30, %v1420_v34  ;;  %v6920_v30 = vld [vmem:[#allocation30_spill] sm:$0xff]  ;;  %v2815_v27 = vld [vmem:[#allocation9 + $0x4] ss:$8 sm:$0x3] }
0x1892   : > { %v1101_v23 = vadd.f32 %v1099_v49, %v919_v21  ;;  %v1624_v5 = vmul.f32 %v1620_v7, %v1606_v32  ;;  %v1908_v53 = vadd.f32 %v3828_v26, %v1895_v6  ;;  %v1784_v58 = vrot.slane %v1779_v16, %v6282_v4 }
0x1893   : > { %v1892_v45 = vmax.f32 %v1890_v9, %v1891_v1  ;;  %v1898_v59 = vmax.f32 %v1896_v40, %v1897_v46  ;;  %v1903_v60 = vrot.slane %v1902_v63, 2  ;;  %v1801_v11 = vsel %vm1800_vm11, %v6916_v10, %v6915_v51  ;;  %v2116_v9 = vld [vmem:[#allocation9] ss:$8 sm:$0x3] }
0x1894   : > { %v1262_v3 = vadd.f32 %v1258_v20, %v1101_v23  ;;  %v1261_v61 = vadd.f32 %v1257_v14, %v1100_v13  ;;  %v1623_v49 = vmul.f32 %v1619_v43, %v1602_v35  ;;  %v1806_v37 = vmul.f32 %v1802_v24, %v1788_v55  ;;  %v2474_v23 = vld [vmem:[#allocation9 + $0x2] ss:$8 sm:$0x3]  ;;  %v6921_v13 = vld [vmem:[#allocation61_spill] sm:$0xff] }
0x1895   : > { %v6349_v39 = vmul.f32 0.125, %v499_v33  ;;  %v6353_v21 = vmul.f32 %v1823_v12, %v487_v38  ;;  %v493_v26 = vadd.f32 %v492_v31, %v6279_v17  ;;  %v6358_v6 = vmul.f32 %v1823_v12, %v481_v29  ;;  %v6917_v31 = vld [vmem:[#allocation76_spill] sm:$0xff]  ;;  %v6918_v12 = vld [vmem:[#allocation46_spill] sm:$0xff]  ;;  %v6923_v43 = vld [vmem:[#allocation33_spill] sm:$0xff] }
0x1896   : > { %v1444_v52 = vadd.f32 %v1442_v57, %v1262_v3  ;;  %v1443_v40 = vadd.f32 %v1441_v56, %v1261_v61  ;;  %v1909_v22 = vrot.slane %v1908_v53, 2  ;;  %v1805_v42 = vmul.f32 %v1801_v11, %v1784_v58  ;;  %v6922_v57 = vld [vmem:[#allocation36_spill] sm:$0xff] }
0x1897   : > { %v1893_v34 = vrot.slane %v1892_v45, 1  ;;  %v1899_v19 = vrot.slane %v1898_v59, 1  ;;  %v1904_v35 = vadd.f32 %v1903_v60, %v1902_v63  ;;  %v2299_v33 = vrot.slane %v2294_v8, %v6282_v4  ;;  %v2995_v58 = vld [vmem:[#allocation9 + $0x5] ss:$8 sm:$0x3] }
0x1898   : > { %v1626_v28 = vadd.f32 %v1624_v5, %v1444_v52  ;;  %v1625_v38 = vadd.f32 %v1623_v49, %v1443_v40  ;;  %v2121_v17 = vrot.slane %v2116_v9, %v6282_v4  ;;  %v2315_v29 = vsel %vm911_vm6, %v6918_v12, %v6917_v31  ;;  %v6924_v60 = vld [vmem:[#allocation72_spill] sm:$0xff] }
0x1899   : > { %v6365_v32 = vmul.f32 0.125, %v493_v26  ;;  %v3218_v1 = vstv %s6338_s26  ;;  %v2137_v62 = vsel %vm731_vm7, %v6920_v30, %v6919_v47  ;;  %v2479_v44 = vrot.slane %v2474_v23, %v6282_v4 }
0x189a   : > { %v1808_v20 = vadd.f32 %v1806_v37, %v1626_v28  ;;  %v1910_v46 = vadd.f32 %v1909_v22, %v1908_v53  ;;  %v1807_v63 = vadd.f32 %v1805_v42, %v1625_v38  ;;  %v2303_v16 = vrot.slane %v2294_v8, %v6275_v41  ;;  %v6925_v37 = vld [vmem:[#allocation104_spill] sm:$0xff] }
0x189b   : > { %v2495_v55 = vsel %vm1093_vm8, %v6922_v57, %v6921_v13  ;;  %v1894_v14 = vmax.f32 %v1892_v45, %v1893_v34  ;;  %v6376_v3 = vmax.f32 %v1898_v59, %v1899_v19  ;;  %v2319_v25 = vmul.f32 %v2315_v29, %v2299_v33  ;;  %v3175_v19 = vld [vmem:[#allocation9 + $0x6] ss:$8 sm:$0x3] }
0x189c   : > { %v2316_v15 = vsel %vm911_vm6, %v6917_v31, %v6923_v43  ;;  %v1905_v24 = vrot.slane %v1904_v35, 1  ;;  %v1815_v56 = vrot.slane %v1808_v20, 4  ;;  %v2141_v5 = vmul.f32 %v2137_v62, %v2121_v17 }
0x189d   : > { %v2125_v53 = vrot.slane %v2116_v9, %v6275_v41  ;;  %v2138_v10 = vsel %vm731_vm7, %v6919_v47, %v6924_v60  ;;  %v2499_v11 = vmul.f32 %v2495_v55, %v2479_v44  ;;  %v2483_v45 = vrot.slane %v2474_v23, %v6275_v41 }
0x189e   : > { %v2820_v59 = vrot.slane %v2815_v27, %v6282_v4  ;;  %v1809_v52 = vrot.slane %v1807_v63, 4  ;;  %v2320_v49 = vmul.f32 %v2316_v15, %v2303_v16  ;;  %v2496_v8 = vsel %vm1093_vm8, %v6921_v13, %v6925_v37 }
0x189f   : > { %v1911_v9 = vrot.slane %v1910_v46, 1  ;;  %v2321_v40 = vadd.f32 %v2319_v25, %v2141_v5  ;;  %v3000_v28 = vrot.slane %v2995_v58, %v6282_v4  ;;  %v1816_v22 = vadd.f32 %v1815_v56, %v1808_v20 }
0x18a0   : > { %v2142_v42 = vmul.f32 %v2138_v10, %v2125_v53  ;;  %v2500_v33 = vmul.f32 %v2496_v8, %v2483_v45  ;;  %v2824_v31 = vrot.slane %v2815_v27, %v6275_v41  ;;  %v1810_v29 = vadd.f32 %v1809_v52, %v1807_v63 }
0x18a1   : > { %v2501_v38 = vadd.f32 %v2499_v11, %v2321_v40  ;;  %v3004_v44 = vrot.slane %v2995_v58, %v6275_v41  ;;  %v4217_v16 = vmov 1966171168   ;;  %v1817_v57 = vrot.slane %v1816_v22, 2 }
0x18a2   : > { %v2322_v47 = vadd.f32 %v2320_v49, %v2142_v42  ;;  %v1830_v13 = vunpack.c.l.s4 %v4217_v16  ;;  %v1912_v27 = vadd.f32 %v1911_v9, %v1910_v46  ;;  %v3241_v15 = vstv %s6387_s18 }
0x18a3   : > { %v3184_v56 = vrot.slane %v3175_v19, %v6275_v41  ;;  %v3219_v46 = vmul.f32 %v3218_v1, %v1894_v14  ;;  %v1818_v10 = vadd.f32 %v1817_v57, %v1816_v22  ;;  %v3220_v45 = vmul.f32 %v3218_v1, %v6376_v3 }
0x18a4   : > { %v1831_v60 = vunpack.c.0.s8 %v1830_v13  ;;  %v1914_v11 = vmul.f32 0.125, %v1912_v27  ;;  %v1848_v49 = vmul.f32 %v1846_v36, %v6349_v39  ;;  %v3216_v13 = vld [vmem:[#allocation16] sm:$0x3] }
0x18a5   : > { %v1819_v3 = vrot.slane %v1818_v10, 1 }
0x18a6   : > { %v1834_v1 = vsub.s32 %v1831_v60, %v6270_v18  ;;  %v3243_v42 = vmul.f32 %v3241_v15, %v1914_v11  ;;  %v3289_v11 = vld [vmem:[%s4568_s27] sm:$0xff] }
0x18d9   : > { %v6311_v54 = vpop.permute.xlu1 %2652 }
0x18da   : > { %v6319_v48 = vpop.permute.xlu0 %2654 }
0x18db   : > { %v2658_v23 = vsel %vm676_vm1, %v6311_v54, %v6319_v48  ;;  %v3180_v54 = vrot.slane %v3175_v19, %v6282_v4 }
0x18dc   : > { %v2662_v20 = vadd.f32 %v2658_v23, %v2501_v38 }
0x18de   : > { %v6343_v0 = vpop.permute.xlu1 %2656  ;;  %v2831_v2 = vpop.permute.xlu0 %2830 }
0x18df   : > { %v2659_v55 = vsel %vm676_vm1, %v6319_v48, %v6343_v0 }
0x18e2   : > { %v2833_v50 = vpop.permute.xlu1 %2832  ;;  %v2835_v7 = vpop.permute.xlu0 %2834 }
0x18e3   : > { %v2836_v26 = vsel %vm1436_vm9, %v2831_v2, %v2833_v50  ;;  %v1906_v2 = vadd.f32 %v1905_v24, %v1904_v35  ;;  %v2837_v30 = vsel %vm1436_vm9, %v2833_v50, %v2835_v7  ;;  %v2502_v50 = vadd.f32 %v2500_v33, %v2322_v47 }
0x18e4   : > { %v2840_v17 = vmul.f32 %v2836_v26, %v2820_v59  ;;  %v2841_v25 = vmul.f32 %v2837_v30, %v2824_v31  ;;  %v1828_v26 = vcombine.low %v6358_v6, %v6353_v21  ;;  %v1820_v31 = vadd.f32 %v1819_v3, %v1818_v10 }
0x18e5   : > { %v2663_v5 = vadd.f32 %v2659_v55, %v2502_v50  ;;  %v1913_v58 = vmul.f32 0.125, %v1906_v2 }
0x18e6   : > { %v2842_v7 = vadd.f32 %v2840_v17, %v2662_v20  ;;  %v1835_v21 = vrot.slane %v1828_v26, %v1834_v1  ;;  %v1821_v20 = vld [vmem:[#allocation12] sm:$0x3] }
0x18e7   : > { %v2843_v59 = vadd.f32 %v2841_v25, %v2663_v5  ;;  %v3242_v22 = vmul.f32 %v3241_v15, %v1913_v58 }
0x18e9   : > { %v3246_v2 = vcombine.low %v3242_v22, %v3243_v42 }
0x18f1   : > { %v3011_v51 = vpop.permute.xlu1 %3010 }
0x18f2   : > { %v3013_v61 = vpop.permute.xlu0 %3012 }
0x18f3   : > { %v3016_v34 = vsel %vm1618_vm10, %v3011_v51, %v3013_v61  ;;  %v1811_v51 = vrot.slane %v1810_v29, 2 }
0x18f4   : > { %v3020_v62 = vmul.f32 %v3016_v34, %v3000_v28  ;;  %v1847_v28 = vmul.f32 %v1846_v36, %v6365_v32  ;;  %v3223_v34 = vcombine.low %v3219_v46, %v3220_v45  ;;  %v1842_v32 = vrot.slane %v1835_v21, %v1834_v1  ;;  %v3290_v45 = vld [vmem:[%s4568_s27 + $0x8] sm:$0xff]  ;;  %s4218_s27 = smov [#allocation19]  }
0x18f5   : > { %v1812_v37 = vadd.f32 %v1811_v51, %v1810_v29  ;;  %s4059_s22 = sshll.u32 %s4218_s27, 4  ;;  %s4060_s22 = int_to_ptr.vmem [resolvable:$false] %s4059_s22 }
0x18f6   : > { %v3015_v12 = vpop.permute.xlu1 %3014  ;;  %v3022_v53 = vadd.f32 %v3020_v62, %v2842_v7  ;;  %v1851_v17 = vcombine.low %v1847_v28, %v1848_v49  ;;  %v1844_v55 = vadd.f32 %v1842_v32, %v1821_v20  ;;  %s4061_s20 = scalar_lea.vmem %s4060_s22, 512  ;;  %p4062_p10 = scmp.lt.s32.totalorder %s6435_s13, %s4060_s22 }
0x18f7   : > { %v3017_v35 = vsel %vm1618_vm10, %v3013_v61, %v3015_v12  ;;  %v1813_v19 = vrot.slane %v1812_v37, 1  ;;  %v3230_v12 = vrot.slane %v3223_v34, %v1834_v1  ;;  %p4063_p8 = scmp.lt.s32.totalorder %s4061_s20, %s4055_s5 }
0x18f8   : > { %v3021_v48 = vmul.f32 %v3017_v35, %v3004_v44  ;;  %v1858_v30 = vrot.slane %v1851_v17, %v1834_v1 }
0x18f9   : > { %v1814_v47 = vadd.f32 %v1813_v19, %v1812_v37  ;;  %v3237_v44 = vrot.slane %v3230_v12, %v1834_v1  ;;  %p4064_p7 = por %p4063_p8, %p4062_p10 }
0x18fa   : > { %v3023_v9 = vadd.f32 %v3021_v48, %v2843_v59  ;;  %v1865_v35 = vrot.slane %v1858_v30, %v1834_v1 }
0x18fb   : > { %v1870_v18 = vcombine.low %v1814_v47, %v1820_v31  ;;  %v3239_v50 = vadd.f32 %v3237_v44, %v3216_v13  ;;  %p4065_p4 = pnand %p4064_p7, %p4058_p3 }
0x18fc   : > { %v1867_v15 = vadd.f32 %v1865_v35, %v1844_v55 }
0x18fd   : > { %v3191_v63 = vpop.permute.xlu0 %3190 }
0x18fe   : > { %v3193_v43 = vpop.permute.xlu1 %3192 }
0x18ff   : > { %v3196_v24 = vsel %vm1800_vm11, %v3191_v63, %v3193_v43  ;;  %v1877_v63 = vrot.slane %v1870_v18, %v1834_v1 }
0x1900   : > { %v3200_v0 = vmul.f32 %v3196_v24, %v3180_v54  ;;  %v3253_v54 = vrot.slane %v3246_v2, %v1834_v1 }
0x1901   : > { %v1884_v51 = vrot.slane %v1877_v63, %v1834_v1 }
0x1902   : > { %v3202_v61 = vadd.f32 %v3200_v0, %v3022_v53  ;;  %v3195_v52 = vpop.permute.xlu0 %3194  ;;  %v3260_v7 = vrot.slane %v3253_v54, %v1834_v1 }
0x1903   : > { %v3197_v8 = vsel %vm1800_vm11, %v3193_v43, %v3195_v52  ;;  %v1886_v53 = vadd.f32 %v1884_v51, %v1867_v15 }
0x1904   : > { %v3204_v14 = vrot.slane %v3202_v61, 4  ;;  %v3201_v40 = vmul.f32 %v3197_v8, %v3184_v56  ;;  %v3262_v24 = vadd.f32 %v3260_v7, %v3239_v50 }
0x1906   : > { %v3205_v23 = vadd.f32 %v3204_v14, %v3202_v61  ;;  %v3203_v39 = vadd.f32 %v3201_v40, %v3023_v9 }
0x1908   : > { %v3206_v33 = vrot.slane %v3205_v23, 2  ;;  %v3210_v38 = vrot.slane %v3203_v39, 4 }
0x190a   : > { %v3207_v6 = vadd.f32 %v3206_v33, %v3205_v23  ;;  %v3211_v29 = vadd.f32 %v3210_v38, %v3203_v39 }
0x190c   : > { %v3212_v36 = vrot.slane %v3211_v29, 2  ;;  %v3208_v62 = vrot.slane %v3207_v6, 1 }
0x190e   : > { %v3213_v16 = vadd.f32 %v3212_v36, %v3211_v29  ;;  %v3209_v27 = vadd.f32 %v3208_v62, %v3207_v6 }
0x1910   : > { %v3214_v57 = vrot.slane %v3213_v16, 1 }
0x1912   : > { %v3215_v25 = vadd.f32 %v3214_v57, %v3213_v16 }
0x1914   : > { %v3265_v43 = vcombine.low %v3209_v27, %v3215_v25 }
0x1916   : > { %v3272_v56 = vrot.slane %v3265_v43, %v1834_v1 }
0x1918   : > { %v3279_v5 = vrot.slane %v3272_v56, %v1834_v1 }
0x191a   : > { %v3281_v48 = vadd.f32 %v3279_v5, %v3262_v24 }
0x191c   : > { %v3282_v0 = vadd.f32 %v3281_v48, %v1886_v53 }
0x191e   : > { %v3512_v58 = vmul.f32 -1.442695, %v3282_v0 }
0x1920   : > { %3820 = vpow2.f32 %v3512_v58 }
0x192a   : > { %v3821_v46 = vpop.eup %3820 }
0x192b   : > { %v3286_v60 = vadd.f32 1.0, %v3821_v46 }
0x192d   : > { %3822 = vrcp.f32 %v3286_v60 }
0x1937   : > { %v3823_v10 = vpop.eup %3822 }
0x1938   : > { %v3295_v59 = vrot.slane %v3823_v10, %v6282_v4  ;;  %v3299_v61 = vrot.slane %v3823_v10, %v6275_v41 }
0x193a   : > { %v3302_v52 = vmul.f32 %v3295_v59, %v3289_v11  ;;  %v3303_v49 = vmul.f32 %v3299_v61, %v3290_v45 }
0x193c   : > { %3304 = vst [vmem:[%s471_s24] sm:$0xff] %v3302_v52  ;;  %3305 = vst [vmem:[%s471_s24 + $0x8] sm:$0xff] %v3303_v49 }
0x193d   : > { %4068 = shalt.err (!%p4065_p4)
}
0x193e   : > { %s4069_s3 = scalar_lea.hbm %s6433_s6, 256  ;;  %s4073_s25 = scalar_lea.hbm %s6486_s9, 512 }
0x193f   : > { %p4070_p11 = scmp.ne.s32.totalorder %s6433_s6, %s4069_s3  ;;  %p4074_p2 = scmp.lt.u32.totalorder %s6433_s6, %s6486_s9 }
0x1940   : > { %p4075_p6 = scmp.lt.u32.totalorder %s4073_s25, %s4069_s3  ;;  %p4077_p1 = scmp.lt.u32.totalorder %s4069_s3, %s6433_s6 }
0x1941   : > { %p4071_p13 = pnand %p4070_p11, %p6926_p5 }
0x1942   : > { %p4076_p9 = por %p4075_p6, %p4074_p2 }
0x1943   : > { %p4072_p0 = pneg %p4071_p13 }
0x1944   : > { %p4078_p12 = por %p4077_p1, %p4076_p9 }
0x1946   : > { %p4079_p3 = pnand %p4078_p12, %p4072_p0 }
0x1948   : > { %4082 = shalt.err (!%p4079_p3)
}
0x1949   : > { %3565 = dma.vmem_to_hbm [thread:$0]  (%p6926_p5), %s6435_s13, 256, %s6433_s6, %s3307_s15  }
0x194a PF: > { %s3333_s26 = sand.u32 1, %s4133_s30   ;;  %p6927_p10 = scmp.ne.s32.totalorder %s6640_s14, 0 }
0x194b   : > { %p6928_p8 = scmp.ge.s32.totalorder %s4145_s12, 2  ;;  %s3334_s18 = scalar_lea.sflag [#allocation5], %s3333_s26 }
0x194d   : > { %p3597_p7 = pnand %p6928_p8, %p6927_p10 }
0x194f   : > { %4128 = dma.done.wait (!%p3597_p7), %s3334_s18, 256  }
0x1950   : > { %4130 = vsyncadd (!%p3597_p7), %s3334_s18, 4294967040  ;;  %p29_p4 = scmp.ge.s32.totalorder %s4462_s21, 4   ;;  %s6929_s30 = smov %s4137_s10 }
0x1951   : > { %s6930_s10 = smov %s4141_s11  ;;  %s6931_s11 = smov %s4474_s23 }
0x1952   : > { %s6932_s12 = smov %s4462_s21  ;;  %31 = sbr.rel (!%p29_p4) target bundleno = 18 (0x12), region = 148 }
0x1959   :  { %3339 = vsyncpa [#allocation4], 1 }
0x195a   :  { %3341 = vsyncpa [#allocation4 + $0x1], 1 }
0x195b   :  { %3342 = vsyncpa [#allocation8], 1 }
0x195c   :  { %3344 = vsyncpa [#allocation8 + $0x1], 1 }
0x195d   :  { %3345 = vsyncpa [#allocation11], 1 }
0x195e   :  { %3346 = vsyncpa [#allocation15], 1 }
0x195f   :  { %3347 = vsyncpa [#allocation5], 1 }
0x1960   :  { %3349 = vsyncpa [#allocation5 + $0x1], 1 }
0x1961   :  { %3350 = vsyncpa [#allocation6], 1 }
0x1962   :  { %3352 = vsyncpa [#allocation6 + $0x1], 1 }
0x1963   :  { %3353 = vsyncpa [#allocation18], 1 }

</bundles_post_ra>
